<compile_context>
chip_gen: v5e
topology: v5e:2x2
jax: 0.10.0
libtpu: 0.0.40
codegen_flags: <defaults>
</compile_context>

<pallas_src>
import jax
import jax.numpy as jnp
from jax import lax
from jax.experimental import pallas as pl
from jax.experimental.pallas import tpu as pltpu


def scm_kernel(x_ref, w1_ref, b1_ref, w2_ref, b2_ref, w3_ref, b3_ref,
               w4_ref, b4_ref, w5_ref, b5_ref, out_ref, pad1, pad3):
    """Processes one image per grid step. Entire SCM fused in VMEM."""
    H = x_ref.shape[1]
    W = x_ref.shape[2]
    Cin = x_ref.shape[3]            # 3
    C2 = w3_ref.shape[-1]           # out_channels // 2

    x = x_ref[0]                    # (H, W, 3)

    def conv3x3_im2col(pad, inp, w_ref, b_ref):
        """3x3 'same' conv as one im2col matmul: (H*W, 9*Cc) x (9*Cc, Cout)."""
        Cc = pad.shape[-1]
        # Zero only the 1-pixel border; the interior is fully overwritten
        # below.  Done every step so it stays correct under megacore grid
        # sharding (per-core scratch never sees stale border data).
        zrow = jnp.zeros((1, W + 2, Cc), pad.dtype)
        zcol = jnp.zeros((H + 2, 1, Cc), pad.dtype)
        pad[0:1, :, :] = zrow
        pad[H + 1:H + 2, :, :] = zrow
        pad[:, 0:1, :] = zcol
        pad[:, W + 1:W + 2, :] = zcol
        pad[1:H + 1, 1:W + 1, :] = inp

        # Lane-axis concat of the 9 shifted taps -> single MXU push with
        # K = 9*Cc (27 for conv1, 144 for conv3).  Tap order (dy, dx) matches
        # the wrapper's weight reshape (3,3,Cc,Cout) -> (9*Cc, Cout).
        taps = [pad[dy:dy + H, dx:dx + W, :].reshape(H * W, Cc)
                for dy in range(3) for dx in range(3)]
        patch = jnp.concatenate(taps, axis=-1)              # (H*W, 9*Cc)
        return jnp.dot(patch, w_ref[...],
                       preferred_element_type=jnp.float32) + b_ref[...]

    # --- conv1: 3x3, 3 -> C/4, ReLU ---
    z1 = jnp.maximum(conv3x3_im2col(pad1, x, w1_ref, b1_ref), 0.0)

    # --- conv2: 1x1, C/4 -> C/2, ReLU ---
    z2 = jnp.maximum(
        jnp.dot(z1, w2_ref[...], preferred_element_type=jnp.float32)
        + b2_ref[...], 0.0)                                 # (H*W, C/2)

    # --- conv3: 3x3, C/2 -> C/2, ReLU ---
    z3 = jnp.maximum(
        conv3x3_im2col(pad3, z2.reshape(H, W, C2), w3_ref, b3_ref), 0.0)

    # --- conv4: 1x1, C/2 -> C-3, ReLU ---
    z4 = jnp.maximum(
        jnp.dot(z3, w4_ref[...], preferred_element_type=jnp.float32)
        + b4_ref[...], 0.0)                                 # (H*W, C-3)

    # --- concat([x, body(x)], channels) then 1x1 conv C -> C (no act) ---
    cat = jnp.concatenate([x.reshape(H * W, Cin), z4], axis=-1)   # (H*W, C)
    out = (jnp.dot(cat, w5_ref[...], preferred_element_type=jnp.float32)
           + b5_ref[...])
    out_ref[0] = out.reshape(H, W, out.shape[-1]).astype(out_ref.dtype)


def scm_forward(x, params):
    """x: (N, H, W, 3) float32, returns (N, H, W, out_channels)."""
    N, H, W, _ = x.shape
    w1, b1, w2, b2, w3, b3, w4, b4, w5, b5 = params
    C = w5.shape[-1]
    C2 = w3.shape[-1]

    def full_spec(a):
        nd = a.ndim
        return pl.BlockSpec(a.shape, lambda n, _nd=nd: (0,) * _nd)

    return pl.pallas_call(
        scm_kernel,
        out_shape=jax.ShapeDtypeStruct((N, H, W, C), jnp.float32),
        grid_spec=pltpu.PrefetchScalarGridSpec(
            num_scalar_prefetch=0,
            grid=(N,),
            in_specs=[pl.BlockSpec((1, H, W, 3), lambda n: (n, 0, 0, 0))]
                     + [full_spec(p) for p in params],
            out_specs=pl.BlockSpec((1, H, W, C), lambda n: (n, 0, 0, 0)),
            scratch_shapes=[pltpu.VMEM((H + 2, W + 2, 3), jnp.float32),
                            pltpu.VMEM((H + 2, W + 2, C2), jnp.float32)]),
        compiler_params=pltpu.CompilerParams(
            # Images are independent -> let v7x shard the batch across its
            # two TensorCores (harmless on single-TC v5e/v6e).
            dimension_semantics=("parallel",)),
    )(x, *params)


def init_params(key, out_channels):
    C = out_channels
    C4, C2 = C // 4, C // 2
    ks = jax.random.split(key, 10)

    def rnd(k, shape):
        return jax.random.normal(k, shape, jnp.float32) * 0.1

    # 3x3 weights stored pre-reshaped for im2col: (3,3,Cin,Cout) -> (9*Cin, Cout)
    w1 = rnd(ks[0], (3, 3, 3, C4)).reshape(9 * 3, C4)
    b1 = rnd(ks[1], (1, C4))
    w2 = rnd(ks[2], (C4, C2))                              # 1x1
    b2 = rnd(ks[3], (1, C2))
    w3 = rnd(ks[4], (3, 3, C2, C2)).reshape(9 * C2, C2)
    b3 = rnd(ks[5], (1, C2))
    w4 = rnd(ks[6], (C2, C - 3))                           # 1x1
    b4 = rnd(ks[7], (1, C - 3))
    w5 = rnd(ks[8], (C, C))                                # final 1x1
    b5 = rnd(ks[9], (1, C))
    return (w1, b1, w2, b2, w3, b3, w4, b4, w5, b5)


def ref_scm(x, params):
    """Plain-JAX reference (matches PyTorch Conv2d cross-correlation + bias)."""
    w1, b1, w2, b2, w3, b3, w4, b4, w5, b5 = params
    C4 = w1.shape[-1]
    C2 = w3.shape[-1]

    def conv(inp, w_hwio, b):
        y = lax.conv_general_dilated(inp, w_hwio, (1, 1), "SAME",
                                     dimension_numbers=("NHWC", "HWIO", "NHWC"))
        return y + b.reshape(1, 1, 1, -1)

    relu = lambda t: jnp.maximum(t, 0.0)
    z = relu(conv(x, w1.reshape(3, 3, 3, C4), b1))
    z = relu(conv(z, w2.reshape(1, 1, *w2.shape), b2))
    z = relu(conv(z, w3.reshape(3, 3, C2, C2), b3))
    z = relu(conv(z, w4.reshape(1, 1, *w4.shape), b4))
    cat = jnp.concatenate([x, z], axis=-1)
    return conv(cat, w5.reshape(1, 1, *w5.shape), b5)


if __name__ == "__main__":
    key = jax.random.PRNGKey(0)
    k_x, k_p = jax.random.split(key)

    N, H, W = 2, 16, 16
    out_channels = 32                       # C/4 = 8, C/2 = 16, C-3 = 29

    x = jax.random.normal(k_x, (N, H, W, 3), jnp.float32)
    params = init_params(k_p, out_channels)

    out = jax.block_until_ready(scm_forward(x, params))
    ref = jax.block_until_ready(ref_scm(x, params))

    assert out.shape == (N, H, W, out_channels)
    assert jnp.allclose(out, ref, rtol=1e-3, atol=1e-3), "mismatch vs reference"

    print("KERNEL_OK")
</pallas_src>

<mosaic_0001>
module attributes {stable_mosaic.version = 11 : i64} {
  func.func @scm_kernel(%arg0: i32, %arg1: memref<1x16x16x3xf32, #tpu.memory_space<vmem>>, %arg2: memref<27x8xf32, #tpu.memory_space<vmem>>, %arg3: memref<1x8xf32, #tpu.memory_space<vmem>>, %arg4: memref<8x16xf32, #tpu.memory_space<vmem>>, %arg5: memref<1x16xf32, #tpu.memory_space<vmem>>, %arg6: memref<144x16xf32, #tpu.memory_space<vmem>>, %arg7: memref<1x16xf32, #tpu.memory_space<vmem>>, %arg8: memref<16x29xf32, #tpu.memory_space<vmem>>, %arg9: memref<1x29xf32, #tpu.memory_space<vmem>>, %arg10: memref<32x32xf32, #tpu.memory_space<vmem>>, %arg11: memref<1x32xf32, #tpu.memory_space<vmem>>, %arg12: memref<1x16x16x32xf32, #tpu.memory_space<vmem>>, %arg13: memref<18x18x3xf32, #tpu.memory_space<vmem>>, %arg14: memref<18x18x16xf32, #tpu.memory_space<vmem>>) attributes {dimension_semantics = [#tpu.dimension_semantics<parallel>], iteration_bounds = array<i64: 2>, scalar_prefetch = 0 : i64, scratch_operands = 2 : i64, tpu.core_type = #tpu.core_type<tc>, window_params = [{transform_indices = @transform_0, window_bounds = array<i64: 1, 16, 16, 3>}, {pipeline_mode = #tpu.pipeline_mode<synchronous>, transform_indices = @transform_1, window_bounds = array<i64: 27, 8>}, {pipeline_mode = #tpu.pipeline_mode<synchronous>, transform_indices = @transform_2, window_bounds = array<i64: 1, 8>}, {pipeline_mode = #tpu.pipeline_mode<synchronous>, transform_indices = @transform_3, window_bounds = array<i64: 8, 16>}, {pipeline_mode = #tpu.pipeline_mode<synchronous>, transform_indices = @transform_4, window_bounds = array<i64: 1, 16>}, {pipeline_mode = #tpu.pipeline_mode<synchronous>, transform_indices = @transform_5, window_bounds = array<i64: 144, 16>}, {pipeline_mode = #tpu.pipeline_mode<synchronous>, transform_indices = @transform_6, window_bounds = array<i64: 1, 16>}, {pipeline_mode = #tpu.pipeline_mode<synchronous>, transform_indices = @transform_7, window_bounds = array<i64: 16, 29>}, {pipeline_mode = #tpu.pipeline_mode<synchronous>, transform_indices = @transform_8, window_bounds = array<i64: 1, 29>}, {pipeline_mode = #tpu.pipeline_mode<synchronous>, transform_indices = @transform_9, window_bounds = array<i64: 32, 32>}, {pipeline_mode = #tpu.pipeline_mode<synchronous>, transform_indices = @transform_10, window_bounds = array<i64: 1, 32>}, {transform_indices = @transform_11, window_bounds = array<i64: 1, 16, 16, 32>}]} {
    %c0 = arith.constant 0 : index
    %c0_0 = arith.constant 0 : index
    %c0_1 = arith.constant 0 : index
    %c0_2 = arith.constant 0 : index
    %0 = vector.load %arg1[%c0, %c0_0, %c0_1, %c0_2] : memref<1x16x16x3xf32, #tpu.memory_space<vmem>>, vector<1x16x16x3xf32>
    %1 = vector.shape_cast %0 : vector<1x16x16x3xf32> to vector<16x16x3xf32>
    %cst = arith.constant 0.000000e+00 : f32
    %2 = vector.broadcast %cst : f32 to vector<1x18x3xf32>
    %cst_3 = arith.constant 0.000000e+00 : f32
    %3 = vector.broadcast %cst_3 : f32 to vector<18x1x3xf32>
    %c0_4 = arith.constant 0 : index
    %c0_5 = arith.constant 0 : index
    %c0_6 = arith.constant 0 : index
    %4 = vector.load %arg13[%c0_4, %c0_5, %c0_6] : memref<18x18x3xf32, #tpu.memory_space<vmem>>, vector<1x18x3xf32>
    tpu.vector_store %arg13[%c0_4, %c0_5, %c0_6], %2 {strides = array<i32>} : memref<18x18x3xf32, #tpu.memory_space<vmem>>, vector<1x18x3xf32>,
    %c17 = arith.constant 17 : index
    %c0_7 = arith.constant 0 : index
    %c0_8 = arith.constant 0 : index
    %5 = vector.load %arg13[%c17, %c0_7, %c0_8] : memref<18x18x3xf32, #tpu.memory_space<vmem>>, vector<1x18x3xf32>
    tpu.vector_store %arg13[%c17, %c0_7, %c0_8], %2 {strides = array<i32>} : memref<18x18x3xf32, #tpu.memory_space<vmem>>, vector<1x18x3xf32>,
    %c0_9 = arith.constant 0 : index
    %c0_10 = arith.constant 0 : index
    %c0_11 = arith.constant 0 : index
    %6 = vector.load %arg13[%c0_9, %c0_10, %c0_11] : memref<18x18x3xf32, #tpu.memory_space<vmem>>, vector<18x1x3xf32>
    tpu.vector_store %arg13[%c0_9, %c0_10, %c0_11], %3 {strides = array<i32>} : memref<18x18x3xf32, #tpu.memory_space<vmem>>, vector<18x1x3xf32>,
    %c0_12 = arith.constant 0 : index
    %c17_13 = arith.constant 17 : index
    %c0_14 = arith.constant 0 : index
    %7 = vector.load %arg13[%c0_12, %c17_13, %c0_14] : memref<18x18x3xf32, #tpu.memory_space<vmem>>, vector<18x1x3xf32>
    tpu.vector_store %arg13[%c0_12, %c17_13, %c0_14], %3 {strides = array<i32>} : memref<18x18x3xf32, #tpu.memory_space<vmem>>, vector<18x1x3xf32>,
    %c1 = arith.constant 1 : index
    %c1_15 = arith.constant 1 : index
    %c0_16 = arith.constant 0 : index
    %8 = vector.load %arg13[%c1, %c1_15, %c0_16] : memref<18x18x3xf32, #tpu.memory_space<vmem>>, vector<16x16x3xf32>
    tpu.vector_store %arg13[%c1, %c1_15, %c0_16], %1 {strides = array<i32>} : memref<18x18x3xf32, #tpu.memory_space<vmem>>, vector<16x16x3xf32>,
    %c0_17 = arith.constant 0 : index
    %c0_18 = arith.constant 0 : index
    %c0_19 = arith.constant 0 : index
    %9 = vector.load %arg13[%c0_17, %c0_18, %c0_19] : memref<18x18x3xf32, #tpu.memory_space<vmem>>, vector<16x16x3xf32>
    %10 = vector.shape_cast %9 : vector<16x16x3xf32> to vector<256x3xf32>
    %c0_20 = arith.constant 0 : index
    %c1_21 = arith.constant 1 : index
    %c0_22 = arith.constant 0 : index
    %11 = vector.load %arg13[%c0_20, %c1_21, %c0_22] : memref<18x18x3xf32, #tpu.memory_space<vmem>>, vector<16x16x3xf32>
    %12 = vector.shape_cast %11 : vector<16x16x3xf32> to vector<256x3xf32>
    %c0_23 = arith.constant 0 : index
    %c2 = arith.constant 2 : index
    %c0_24 = arith.constant 0 : index
    %13 = vector.load %arg13[%c0_23, %c2, %c0_24] : memref<18x18x3xf32, #tpu.memory_space<vmem>>, vector<16x16x3xf32>
    %14 = vector.shape_cast %13 : vector<16x16x3xf32> to vector<256x3xf32>
    %c1_25 = arith.constant 1 : index
    %c0_26 = arith.constant 0 : index
    %c0_27 = arith.constant 0 : index
    %15 = vector.load %arg13[%c1_25, %c0_26, %c0_27] : memref<18x18x3xf32, #tpu.memory_space<vmem>>, vector<16x16x3xf32>
    %16 = vector.shape_cast %15 : vector<16x16x3xf32> to vector<256x3xf32>
    %c1_28 = arith.constant 1 : index
    %c1_29 = arith.constant 1 : index
    %c0_30 = arith.constant 0 : index
    %17 = vector.load %arg13[%c1_28, %c1_29, %c0_30] : memref<18x18x3xf32, #tpu.memory_space<vmem>>, vector<16x16x3xf32>
    %18 = vector.shape_cast %17 : vector<16x16x3xf32> to vector<256x3xf32>
    %c1_31 = arith.constant 1 : index
    %c2_32 = arith.constant 2 : index
    %c0_33 = arith.constant 0 : index
    %19 = vector.load %arg13[%c1_31, %c2_32, %c0_33] : memref<18x18x3xf32, #tpu.memory_space<vmem>>, vector<16x16x3xf32>
    %20 = vector.shape_cast %19 : vector<16x16x3xf32> to vector<256x3xf32>
    %c2_34 = arith.constant 2 : index
    %c0_35 = arith.constant 0 : index
    %c0_36 = arith.constant 0 : index
    %21 = vector.load %arg13[%c2_34, %c0_35, %c0_36] : memref<18x18x3xf32, #tpu.memory_space<vmem>>, vector<16x16x3xf32>
    %22 = vector.shape_cast %21 : vector<16x16x3xf32> to vector<256x3xf32>
    %c2_37 = arith.constant 2 : index
    %c1_38 = arith.constant 1 : index
    %c0_39 = arith.constant 0 : index
    %23 = vector.load %arg13[%c2_37, %c1_38, %c0_39] : memref<18x18x3xf32, #tpu.memory_space<vmem>>, vector<16x16x3xf32>
    %24 = vector.shape_cast %23 : vector<16x16x3xf32> to vector<256x3xf32>
    %c2_40 = arith.constant 2 : index
    %c2_41 = arith.constant 2 : index
    %c0_42 = arith.constant 0 : index
    %25 = vector.load %arg13[%c2_40, %c2_41, %c0_42] : memref<18x18x3xf32, #tpu.memory_space<vmem>>, vector<16x16x3xf32>
    %26 = vector.shape_cast %25 : vector<16x16x3xf32> to vector<256x3xf32>
    %27 = tpu.concatenate %10, %12, %14, %16, %18, %20, %22, %24, %26 in 1 : vector<256x3xf32>, vector<256x3xf32>, vector<256x3xf32>, vector<256x3xf32>, vector<256x3xf32>, vector<256x3xf32>, vector<256x3xf32>, vector<256x3xf32>, vector<256x3xf32> -> vector<256x27xf32>
    %c0_43 = arith.constant 0 : index
    %c0_44 = arith.constant 0 : index
    %28 = vector.load %arg2[%c0_43, %c0_44] : memref<27x8xf32, #tpu.memory_space<vmem>>, vector<27x8xf32>
    %cst_45 = arith.constant dense<0.000000e+00> : vector<256x8xf32>
    %29 = tpu.matmul %27, %28, %cst_45 {dimension_numbers = #tpu.dot_dimension_numbers<[1], [0], [0], [1], [0, 0, 1, 1], [], []>} : vector<256x27xf32>, vector<27x8xf32>, vector<256x8xf32> -> vector<256x8xf32>
    %c0_46 = arith.constant 0 : index
    %c0_47 = arith.constant 0 : index
    %30 = vector.load %arg3[%c0_46, %c0_47] : memref<1x8xf32, #tpu.memory_space<vmem>>, vector<1x8xf32>
    %31 = vector.broadcast %30 : vector<1x8xf32> to vector<256x8xf32>
    %32 = arith.addf %29, %31 : vector<256x8xf32>
    %cst_48 = arith.constant 0.000000e+00 : f32
    %33 = vector.broadcast %cst_48 : f32 to vector<256x8xf32>
    %34 = arith.maximumf %32, %33 : vector<256x8xf32>
    %c0_49 = arith.constant 0 : index
    %c0_50 = arith.constant 0 : index
    %35 = vector.load %arg4[%c0_49, %c0_50] : memref<8x16xf32, #tpu.memory_space<vmem>>, vector<8x16xf32>
    %cst_51 = arith.constant dense<0.000000e+00> : vector<256x16xf32>
    %36 = tpu.matmul %34, %35, %cst_51 {dimension_numbers = #tpu.dot_dimension_numbers<[1], [0], [0], [1], [0, 0, 1, 1], [], []>} : vector<256x8xf32>, vector<8x16xf32>, vector<256x16xf32> -> vector<256x16xf32>
    %c0_52 = arith.constant 0 : index
    %c0_53 = arith.constant 0 : index
    %37 = vector.load %arg5[%c0_52, %c0_53] : memref<1x16xf32, #tpu.memory_space<vmem>>, vector<1x16xf32>
    %38 = vector.broadcast %37 : vector<1x16xf32> to vector<256x16xf32>
    %39 = arith.addf %36, %38 : vector<256x16xf32>
    %cst_54 = arith.constant 0.000000e+00 : f32
    %40 = vector.broadcast %cst_54 : f32 to vector<256x16xf32>
    %41 = arith.maximumf %39, %40 : vector<256x16xf32>
    %42 = vector.shape_cast %41 : vector<256x16xf32> to vector<16x16x16xf32>
    %cst_55 = arith.constant 0.000000e+00 : f32
    %43 = vector.broadcast %cst_55 : f32 to vector<1x18x16xf32>
    %cst_56 = arith.constant 0.000000e+00 : f32
    %44 = vector.broadcast %cst_56 : f32 to vector<18x1x16xf32>
    %c0_57 = arith.constant 0 : index
    %c0_58 = arith.constant 0 : index
    %c0_59 = arith.constant 0 : index
    %45 = vector.load %arg14[%c0_57, %c0_58, %c0_59] : memref<18x18x16xf32, #tpu.memory_space<vmem>>, vector<1x18x16xf32>
    tpu.vector_store %arg14[%c0_57, %c0_58, %c0_59], %43 {strides = array<i32>} : memref<18x18x16xf32, #tpu.memory_space<vmem>>, vector<1x18x16xf32>,
    %c17_60 = arith.constant 17 : index
    %c0_61 = arith.constant 0 : index
    %c0_62 = arith.constant 0 : index
    %46 = vector.load %arg14[%c17_60, %c0_61, %c0_62] : memref<18x18x16xf32, #tpu.memory_space<vmem>>, vector<1x18x16xf32>
    tpu.vector_store %arg14[%c17_60, %c0_61, %c0_62], %43 {strides = array<i32>} : memref<18x18x16xf32, #tpu.memory_space<vmem>>, vector<1x18x16xf32>,
    %c0_63 = arith.constant 0 : index
    %c0_64 = arith.constant 0 : index
    %c0_65 = arith.constant 0 : index
    %47 = vector.load %arg14[%c0_63, %c0_64, %c0_65] : memref<18x18x16xf32, #tpu.memory_space<vmem>>, vector<18x1x16xf32>
    tpu.vector_store %arg14[%c0_63, %c0_64, %c0_65], %44 {strides = array<i32>} : memref<18x18x16xf32, #tpu.memory_space<vmem>>, vector<18x1x16xf32>,
    %c0_66 = arith.constant 0 : index
    %c17_67 = arith.constant 17 : index
    %c0_68 = arith.constant 0 : index
    %48 = vector.load %arg14[%c0_66, %c17_67, %c0_68] : memref<18x18x16xf32, #tpu.memory_space<vmem>>, vector<18x1x16xf32>
    tpu.vector_store %arg14[%c0_66, %c17_67, %c0_68], %44 {strides = array<i32>} : memref<18x18x16xf32, #tpu.memory_space<vmem>>, vector<18x1x16xf32>,
    %c1_69 = arith.constant 1 : index
    %c1_70 = arith.constant 1 : index
    %c0_71 = arith.constant 0 : index
    %49 = vector.load %arg14[%c1_69, %c1_70, %c0_71] : memref<18x18x16xf32, #tpu.memory_space<vmem>>, vector<16x16x16xf32>
    tpu.vector_store %arg14[%c1_69, %c1_70, %c0_71], %42 {strides = array<i32>} : memref<18x18x16xf32, #tpu.memory_space<vmem>>, vector<16x16x16xf32>,
    %c0_72 = arith.constant 0 : index
    %c0_73 = arith.constant 0 : index
    %c0_74 = arith.constant 0 : index
    %50 = vector.load %arg14[%c0_72, %c0_73, %c0_74] : memref<18x18x16xf32, #tpu.memory_space<vmem>>, vector<16x16x16xf32>
    %51 = vector.shape_cast %50 : vector<16x16x16xf32> to vector<256x16xf32>
    %c0_75 = arith.constant 0 : index
    %c1_76 = arith.constant 1 : index
    %c0_77 = arith.constant 0 : index
    %52 = vector.load %arg14[%c0_75, %c1_76, %c0_77] : memref<18x18x16xf32, #tpu.memory_space<vmem>>, vector<16x16x16xf32>
    %53 = vector.shape_cast %52 : vector<16x16x16xf32> to vector<256x16xf32>
    %c0_78 = arith.constant 0 : index
    %c2_79 = arith.constant 2 : index
    %c0_80 = arith.constant 0 : index
    %54 = vector.load %arg14[%c0_78, %c2_79, %c0_80] : memref<18x18x16xf32, #tpu.memory_space<vmem>>, vector<16x16x16xf32>
    %55 = vector.shape_cast %54 : vector<16x16x16xf32> to vector<256x16xf32>
    %c1_81 = arith.constant 1 : index
    %c0_82 = arith.constant 0 : index
    %c0_83 = arith.constant 0 : index
    %56 = vector.load %arg14[%c1_81, %c0_82, %c0_83] : memref<18x18x16xf32, #tpu.memory_space<vmem>>, vector<16x16x16xf32>
    %57 = vector.shape_cast %56 : vector<16x16x16xf32> to vector<256x16xf32>
    %c1_84 = arith.constant 1 : index
    %c1_85 = arith.constant 1 : index
    %c0_86 = arith.constant 0 : index
    %58 = vector.load %arg14[%c1_84, %c1_85, %c0_86] : memref<18x18x16xf32, #tpu.memory_space<vmem>>, vector<16x16x16xf32>
    %59 = vector.shape_cast %58 : vector<16x16x16xf32> to vector<256x16xf32>
    %c1_87 = arith.constant 1 : index
    %c2_88 = arith.constant 2 : index
    %c0_89 = arith.constant 0 : index
    %60 = vector.load %arg14[%c1_87, %c2_88, %c0_89] : memref<18x18x16xf32, #tpu.memory_space<vmem>>, vector<16x16x16xf32>
    %61 = vector.shape_cast %60 : vector<16x16x16xf32> to vector<256x16xf32>
    %c2_90 = arith.constant 2 : index
    %c0_91 = arith.constant 0 : index
    %c0_92 = arith.constant 0 : index
    %62 = vector.load %arg14[%c2_90, %c0_91, %c0_92] : memref<18x18x16xf32, #tpu.memory_space<vmem>>, vector<16x16x16xf32>
    %63 = vector.shape_cast %62 : vector<16x16x16xf32> to vector<256x16xf32>
    %c2_93 = arith.constant 2 : index
    %c1_94 = arith.constant 1 : index
    %c0_95 = arith.constant 0 : index
    %64 = vector.load %arg14[%c2_93, %c1_94, %c0_95] : memref<18x18x16xf32, #tpu.memory_space<vmem>>, vector<16x16x16xf32>
    %65 = vector.shape_cast %64 : vector<16x16x16xf32> to vector<256x16xf32>
    %c2_96 = arith.constant 2 : index
    %c2_97 = arith.constant 2 : index
    %c0_98 = arith.constant 0 : index
    %66 = vector.load %arg14[%c2_96, %c2_97, %c0_98] : memref<18x18x16xf32, #tpu.memory_space<vmem>>, vector<16x16x16xf32>
    %67 = vector.shape_cast %66 : vector<16x16x16xf32> to vector<256x16xf32>
    %68 = tpu.concatenate %51, %53, %55, %57, %59, %61, %63, %65, %67 in 1 : vector<256x16xf32>, vector<256x16xf32>, vector<256x16xf32>, vector<256x16xf32>, vector<256x16xf32>, vector<256x16xf32>, vector<256x16xf32>, vector<256x16xf32>, vector<256x16xf32> -> vector<256x144xf32>
    %c0_99 = arith.constant 0 : index
    %c0_100 = arith.constant 0 : index
    %69 = vector.load %arg6[%c0_99, %c0_100] : memref<144x16xf32, #tpu.memory_space<vmem>>, vector<144x16xf32>
    %cst_101 = arith.constant dense<0.000000e+00> : vector<256x16xf32>
    %70 = tpu.matmul %68, %69, %cst_101 {dimension_numbers = #tpu.dot_dimension_numbers<[1], [0], [0], [1], [0, 0, 1, 1], [], []>} : vector<256x144xf32>, vector<144x16xf32>, vector<256x16xf32> -> vector<256x16xf32>
    %c0_102 = arith.constant 0 : index
    %c0_103 = arith.constant 0 : index
    %71 = vector.load %arg7[%c0_102, %c0_103] : memref<1x16xf32, #tpu.memory_space<vmem>>, vector<1x16xf32>
    %72 = vector.broadcast %71 : vector<1x16xf32> to vector<256x16xf32>
    %73 = arith.addf %70, %72 : vector<256x16xf32>
    %cst_104 = arith.constant 0.000000e+00 : f32
    %74 = vector.broadcast %cst_104 : f32 to vector<256x16xf32>
    %75 = arith.maximumf %73, %74 : vector<256x16xf32>
    %c0_105 = arith.constant 0 : index
    %c0_106 = arith.constant 0 : index
    %76 = vector.load %arg8[%c0_105, %c0_106] : memref<16x29xf32, #tpu.memory_space<vmem>>, vector<16x29xf32>
    %cst_107 = arith.constant dense<0.000000e+00> : vector<256x29xf32>
    %77 = tpu.matmul %75, %76, %cst_107 {dimension_numbers = #tpu.dot_dimension_numbers<[1], [0], [0], [1], [0, 0, 1, 1], [], []>} : vector<256x16xf32>, vector<16x29xf32>, vector<256x29xf32> -> vector<256x29xf32>
    %c0_108 = arith.constant 0 : index
    %c0_109 = arith.constant 0 : index
    %78 = vector.load %arg9[%c0_108, %c0_109] : memref<1x29xf32, #tpu.memory_space<vmem>>, vector<1x29xf32>
    %79 = vector.broadcast %78 : vector<1x29xf32> to vector<256x29xf32>
    %80 = arith.addf %77, %79 : vector<256x29xf32>
    %cst_110 = arith.constant 0.000000e+00 : f32
    %81 = vector.broadcast %cst_110 : f32 to vector<256x29xf32>
    %82 = arith.maximumf %80, %81 : vector<256x29xf32>
    %83 = vector.shape_cast %1 : vector<16x16x3xf32> to vector<256x3xf32>
    %84 = tpu.concatenate %83, %82 in 1 : vector<256x3xf32>, vector<256x29xf32> -> vector<256x32xf32>
    %c0_111 = arith.constant 0 : index
    %c0_112 = arith.constant 0 : index
    %85 = vector.load %arg10[%c0_111, %c0_112] : memref<32x32xf32, #tpu.memory_space<vmem>>, vector<32x32xf32>
    %cst_113 = arith.constant dense<0.000000e+00> : vector<256x32xf32>
    %86 = tpu.matmul %84, %85, %cst_113 {dimension_numbers = #tpu.dot_dimension_numbers<[1], [0], [0], [1], [0, 0, 1, 1], [], []>} : vector<256x32xf32>, vector<32x32xf32>, vector<256x32xf32> -> vector<256x32xf32>
    %c0_114 = arith.constant 0 : index
    %c0_115 = arith.constant 0 : index
    %87 = vector.load %arg11[%c0_114, %c0_115] : memref<1x32xf32, #tpu.memory_space<vmem>>, vector<1x32xf32>
    %88 = vector.broadcast %87 : vector<1x32xf32> to vector<256x32xf32>
    %89 = arith.addf %86, %88 : vector<256x32xf32>
    %90 = vector.shape_cast %89 : vector<256x32xf32> to vector<16x16x32xf32>
    %c0_116 = arith.constant 0 : index
    %c0_117 = arith.constant 0 : index
    %c0_118 = arith.constant 0 : index
    %c0_119 = arith.constant 0 : index
    %91 = vector.load %arg12[%c0_116, %c0_117, %c0_118, %c0_119] : memref<1x16x16x32xf32, #tpu.memory_space<vmem>>, vector<1x16x16x32xf32>
    %92 = vector.shape_cast %91 : vector<1x16x16x32xf32> to vector<16x16x32xf32>
    %93 = vector.shape_cast %90 : vector<16x16x32xf32> to vector<1x16x16x32xf32>
    tpu.vector_store %arg12[%c0_116, %c0_117, %c0_118, %c0_119], %93 {strides = array<i32>} : memref<1x16x16x32xf32, #tpu.memory_space<vmem>>, vector<1x16x16x32xf32>,
    return
  }
  func.func @transform_0(%arg0: i32) -> (i32, i32, i32, i32) {
    %c0_i32 = arith.constant 0 : i32
    %c0_i32_0 = arith.constant 0 : i32
    %c0_i32_1 = arith.constant 0 : i32
    %c0_i32_2 = arith.constant 0 : i32
    return %arg0, %c0_i32, %c0_i32_0, %c0_i32_1 : i32, i32, i32, i32
  }
  func.func @transform_1(%arg0: i32) -> (i32, i32) {
    %c0_i32 = arith.constant 0 : i32
    %c0_i32_0 = arith.constant 0 : i32
    %c0_i32_1 = arith.constant 0 : i32
    return %c0_i32, %c0_i32_0 : i32, i32
  }
  func.func @transform_2(%arg0: i32) -> (i32, i32) {
    %c0_i32 = arith.constant 0 : i32
    %c0_i32_0 = arith.constant 0 : i32
    %c0_i32_1 = arith.constant 0 : i32
    return %c0_i32, %c0_i32_0 : i32, i32
  }
  func.func @transform_3(%arg0: i32) -> (i32, i32) {
    %c0_i32 = arith.constant 0 : i32
    %c0_i32_0 = arith.constant 0 : i32
    %c0_i32_1 = arith.constant 0 : i32
    return %c0_i32, %c0_i32_0 : i32, i32
  }
  func.func @transform_4(%arg0: i32) -> (i32, i32) {
    %c0_i32 = arith.constant 0 : i32
    %c0_i32_0 = arith.constant 0 : i32
    %c0_i32_1 = arith.constant 0 : i32
    return %c0_i32, %c0_i32_0 : i32, i32
  }
  func.func @transform_5(%arg0: i32) -> (i32, i32) {
    %c0_i32 = arith.constant 0 : i32
    %c0_i32_0 = arith.constant 0 : i32
    %c0_i32_1 = arith.constant 0 : i32
    return %c0_i32, %c0_i32_0 : i32, i32
  }
  func.func @transform_6(%arg0: i32) -> (i32, i32) {
    %c0_i32 = arith.constant 0 : i32
    %c0_i32_0 = arith.constant 0 : i32
    %c0_i32_1 = arith.constant 0 : i32
    return %c0_i32, %c0_i32_0 : i32, i32
  }
  func.func @transform_7(%arg0: i32) -> (i32, i32) {
    %c0_i32 = arith.constant 0 : i32
    %c0_i32_0 = arith.constant 0 : i32
    %c0_i32_1 = arith.constant 0 : i32
    return %c0_i32, %c0_i32_0 : i32, i32
  }
  func.func @transform_8(%arg0: i32) -> (i32, i32) {
    %c0_i32 = arith.constant 0 : i32
    %c0_i32_0 = arith.constant 0 : i32
    %c0_i32_1 = arith.constant 0 : i32
    return %c0_i32, %c0_i32_0 : i32, i32
  }
  func.func @transform_9(%arg0: i32) -> (i32, i32) {
    %c0_i32 = arith.constant 0 : i32
    %c0_i32_0 = arith.constant 0 : i32
    %c0_i32_1 = arith.constant 0 : i32
    return %c0_i32, %c0_i32_0 : i32, i32
  }
  func.func @transform_10(%arg0: i32) -> (i32, i32) {
    %c0_i32 = arith.constant 0 : i32
    %c0_i32_0 = arith.constant 0 : i32
    %c0_i32_1 = arith.constant 0 : i32
    return %c0_i32, %c0_i32_0 : i32, i32
  }
  func.func @transform_11(%arg0: i32) -> (i32, i32, i32, i32) {
    %c0_i32 = arith.constant 0 : i32
    %c0_i32_0 = arith.constant 0 : i32
    %c0_i32_1 = arith.constant 0 : i32
    %c0_i32_2 = arith.constant 0 : i32
    return %arg0, %c0_i32, %c0_i32_0, %c0_i32_1 : i32, i32, i32, i32
  }
}

</mosaic_0001>

<bundles_post_ra>
// kernel: tpu_custom_call.1
= control target key start
LH: loop header
LB: loop body
LE: loop exit
PB: predicated region body
PF: predicated region fallthrough
CT: control target
= control target key end

     0   :  { %s9193_s0 = inlined_call_operand.vmem [shape: f32[2,16,16,3], index: 0, kind: input, shape index: {}]   ;;  %s9194_s1 = inlined_call_operand.vmem [shape: f32[27,8], index: 1, kind: input, shape index: {}]   ;;  %s9195_s2 = inlined_call_operand.vmem [shape: f32[1,8], index: 2, kind: input, shape index: {}]   ;;  %s9196_s3 = inlined_call_operand.vmem [shape: f32[8,16], index: 3, kind: input, shape index: {}]   ;;  %s9197_s4 = inlined_call_operand.vmem [shape: f32[1,16], index: 4, kind: input, shape index: {}]   ;;  %s9198_s5 = inlined_call_operand.vmem [shape: f32[144,16], index: 5, kind: input, shape index: {}]   ;;  %s9199_s6 = inlined_call_operand.vmem [shape: f32[1,16], index: 6, kind: input, shape index: {}]   ;;  %s9200_s7 = inlined_call_operand.vmem [shape: f32[16,29], index: 7, kind: input, shape index: {}]   ;;  %s9201_s8 = inlined_call_operand.vmem [shape: f32[1,29], index: 8, kind: input, shape index: {}]   ;;  %s9202_s9 = inlined_call_operand.vmem [shape: f32[32,32], index: 9, kind: input, shape index: {}]   ;;  %s9203_s10 = inlined_call_operand.vmem [shape: f32[1,32], index: 10, kind: input, shape index: {}]   ;;  %s9204_s11 = inlined_call_operand.hbm [shape: f32[2,16,16,32], index: 11, kind: output, shape index: {}]  }
   0x1   :  { %9262 = sst [smem:[#allocation107_spill]] %s9193_s0 }
   0x2   :  { %16 = vsyncpa [#allocation5], 0 }
   0x3   :  { %18 = vsyncpa [#allocation5 + $0x1], 0  ;;  %s6151_s17 = smov 0   ;;  %s6153_s18 = smov 0  }
   0x4   :  { %s6155_s19 = smov 0   ;;  %s6157_s20 = smov 0  }
   0x5 LB: > { %s6172_s21 = sadd.s32 4294967295, %s6071_s20   ;;  %s5177_s22 = sadd.s32 4294967294, %s6071_s20   ;;  %s6071_s20 = sphi %s6157_s20, %s9481_s20   ;;  %s6067_s19 = sphi %s6155_s19, %s9480_s19   ;;  %s6063_s18 = sphi %s6153_s18, %s9479_s18   ;;  %s6059_s17 = sphi %s6151_s17, %s9478_s17  }
   0x6   : > { %s6176_s23 = sadd.s32 1, %s6071_s20   ;;  %s267_s24 = sadd.s32 1, %s6067_s19 }
   0x7   : > { %s264_s25 = ssub.s32 %s6071_s20, %s6176_s23  ;;  %p277_p0 = scmp.ne.s32.totalorder %s6067_s19, %s6063_s18 }
   0x8   : > { %p265_p1 = scmp.eq.s32.totalorder %s264_s25, 0  ;;  %p278_p2 = scmp.eq.s32.totalorder %s6172_s21, 1 }
   0x9   : > { %p283_p3 = scmp.ne.s32.totalorder %s6063_s18, %s6059_s17  ;;  %p284_p4 = scmp.eq.s32.totalorder %s5177_s22, 1 }
   0xa   : > { %s6187_s26 = scalar_select %p265_p1, %s6067_s19, %s267_s24  }
   0xb   : > { %p6189_p5 = por %p278_p2, %p277_p0  ;;  %p6193_p6 = por %p284_p4, %p283_p3 }
   0xc   : > { %p5180_p7 = scmp.ge.s32.totalorder %s6071_s20, 1  ;;  %p340_p8 = scmp.lt.s32.totalorder %s6071_s20, 3 }
   0xe   : > { %p341_p9 = pnand %p5180_p7, %p340_p8 }
  0x10   : > { %344 = sbr.rel (%p341_p9) target bundleno = 1908 (0x774), region = 64 }
  0x15   : > { %vm417_vm0 = vcmask 23552   ;;  %p380_p10 = scmp.lt.s32.totalorder %s6172_s21, 1  ;;  %v9205_v0 = vmov 0.0   ;;  %vm420_vm1 = vcmask 17408   ;;  %s9265_s0 = sld [smem:[#allocation107_spill]]  ;;  %vm426_vm2 = vcmask 16384  }
  0x16   : > { %418 = vst.msk [vmem:[#allocation2] sm:$0xff] %vm417_vm0, %v9205_v0  ;;  %s9240_s15 = smov 3   ;;  %s6075_s16 = smov 6   ;;  %vm2177_vm3 = vcmask 1042432   ;;  %vm1841_vm4 = vcmask 48128   ;;  %vm1907_vm5 = vcmask 97280  }
  0x17   : > { %419 = vst.msk [vmem:[#allocation2 + $0x8] sm:$0xff] %vm417_vm0, %v9205_v0  ;;  %s381_s29 = scalar_select %p380_p10, %s6172_s21, 1  ;;  %vm1874_vm6 = vcmask 72704   ;;  %vm1940_vm7 = vcmask 121856   ;;  %vm1973_vm8 = vcmask 146432   ;;  %vm2006_vm9 = vcmask 171008  }
  0x18   : > { %423 = vst.msk [vmem:[#allocation2 + $0x198] sm:$0xff] %vm417_vm0, %v9205_v0  ;;  %s9242_s22 = smov 9   ;;  %s9244_s24 = smov 15   ;;  %vm2039_vm10 = vcmask 195584   ;;  %vm2080_vm11 = vcmask 220160   ;;  %vm2331_vm12 = vcmask 64512  }
  0x19   : > { %424 = vst.msk [vmem:[#allocation2 + $0x1a0] sm:$0xff] %vm417_vm0, %v9205_v0  ;;  %s5350_s30 = sshll.u32 %s381_s29, 8  ;;  %s6078_s25 = smov 12   ;;  %vm2573_vm13 = vcmask 130048   ;;  %vm2582_vm14 = vcmask 122880   ;;  %vm2576_vm15 = vcmask 123904  }
  0x1a   : > { %421 = vst.msk [vmem:[#allocation2 + $0x10] sm:$0x3] %vm420_vm1, %v9205_v0  ;;  %s9246_s29 = smov 18   ;;  %s6081_s12 = smov 21  }
  0x1b   : > { %s6212_s14 = scalar_lea.vmem %s9265_s0, %s5350_s30  ;;  %425 = vst.msk [vmem:[#allocation2 + $0x1a8] sm:$0x3] %vm420_vm1, %v9205_v0  ;;  %s6080_s30 = smov 24   ;;  %vm3869_vm1 = vcmask 261120  }
  0x1c   : > { %v6216_v1 = vld [vmem:[%s6212_s14 + $0x10] sm:$0xff]  ;;  %v6219_v2 = vld [vmem:[%s6212_s14] sm:$0xff]  ;;  %v6223_v3 = vld [vmem:[%s6212_s14 + $0x18] sm:$0xff]  ;;  %445 = vst.msk [vmem:[#allocation2 + $0x11] sm:$0x1] %vm426_vm2, %v9205_v0  ;;  %s9362_s13 = smov 18  }
  0x1d   : > { %9266 = vst [vmem:[#allocation7_spill] sm:$0xff] %v6216_v1  ;;  %v6228_v4 = vld [vmem:[%s6212_s14 + $0x8] sm:$0xff]  ;;  %v6233_v5 = vld [vmem:[%s6212_s14 + $0x20] sm:$0xff]  ;;  %v6238_v7 = vld [vmem:[%s6212_s14 + $0x30] sm:$0xff] }
  0x1e   : > { %9267 = vst [vmem:[#allocation8_spill] sm:$0xff] %v6219_v2  ;;  %v528_v6 = vld [vmem:[#allocation2 + $0x1] sm:$0xff]  ;;  %v6249_v9 = vld [vmem:[%s6212_s14 + $0x38] sm:$0xff]  ;;  %v6266_v13 = vld [vmem:[%s6212_s14 + $0x50] sm:$0xff] }
  0x1f   : > { %9268 = vst [vmem:[#allocation9_spill] sm:$0xff] %v6223_v3  ;;  %817 = vrot.lane.b32.xlu0 %v528_v6, %s9240_s15  ;;  %v6244_v8 = vld [vmem:[%s6212_s14 + $0x28] sm:$0xff]  ;;  %v6259_v11 = vld [vmem:[%s6212_s14 + $0x40] sm:$0xff]  ;;  %v6282_v17 = vld [vmem:[%s6212_s14 + $0x58] sm:$0xff] }
  0x20   : > { %466 = vst.msk [vmem:[#allocation2 + $0x31] sm:$0xff] %vm417_vm0, %v6216_v1  ;;  %v6254_v10 = vld [vmem:[%s6212_s14 + $0x48] sm:$0xff]  ;;  %v6275_v16 = vld [vmem:[%s6212_s14 + $0x60] sm:$0xff]  ;;  %v6293_v19 = vld [vmem:[%s6212_s14 + $0x78] sm:$0xff] }
  0x21   : > { %9269 = vst [vmem:[#allocation10_spill] sm:$0xff] %v6228_v4  ;;  %v529_v15 = vld [vmem:[#allocation2 + $0x9] sm:$0xff]  ;;  %v6305_v22 = vld [vmem:[%s6212_s14 + $0x80] sm:$0xff]  ;;  %v6332_v27 = vld [vmem:[%s6212_s14 + $0x98] sm:$0xff] }
  0x22   : > { %464 = vst.msk [vmem:[#allocation2 + $0x19] sm:$0xff] %vm417_vm0, %v6219_v2  ;;  %v6287_v18 = vld [vmem:[%s6212_s14 + $0x68] sm:$0xff]  ;;  %v6298_v20 = vld [vmem:[%s6212_s14 + $0x70] sm:$0xff]  ;;  %v6350_v32 = vld [vmem:[%s6212_s14 + $0xa0] sm:$0xff] }
  0x23   : > { %9270 = vst [vmem:[#allocation11_spill] sm:$0xff] %v6233_v5  ;;  %v6320_v25 = vld [vmem:[%s6212_s14 + $0x90] sm:$0xff]  ;;  %v6323_v26 = vld [vmem:[%s6212_s14 + $0x88] sm:$0xff]  ;;  %v6367_v37 = vld [vmem:[%s6212_s14 + $0xc0] sm:$0xff] }
  0x24   : > { %467 = vst.msk [vmem:[#allocation2 + $0x39] sm:$0xff] %vm417_vm0, %v6223_v3  ;;  %v6347_v31 = vld [vmem:[%s6212_s14 + $0xa8] sm:$0xff]  ;;  %v6359_v33 = vld [vmem:[%s6212_s14 + $0xb0] sm:$0xff]  ;;  %v6370_v38 = vld [vmem:[%s6212_s14 + $0xb8] sm:$0xff] }
  0x25   : > { %9271 = vst [vmem:[#allocation12_spill] sm:$0xff] %v6238_v7  ;;  %v6378_v39 = vld [vmem:[%s6212_s14 + $0xc8] sm:$0xff]  ;;  %v6385_v43 = vld [vmem:[%s6212_s14 + $0xd8] sm:$0xff]  ;;  %v6388_v44 = vld [vmem:[%s6212_s14 + $0xd0] sm:$0xff] }
  0x26   : > { %465 = vst.msk [vmem:[#allocation2 + $0x21] sm:$0xff] %vm417_vm0, %v6228_v4  ;;  %v6396_v45 = vld [vmem:[%s6212_s14 + $0xe0] sm:$0xff]  ;;  %v6403_v49 = vld [vmem:[%s6212_s14 + $0xe8] sm:$0xff] }
  0x27   : > { %9272 = vst [vmem:[#allocation13_spill] sm:$0xff] %v6244_v8  ;;  %v6261_v12 = vld [vmem:[#allocation2 + $0x31] sm:$0xff]  ;;  %819 = vrot.lane.b32.xlu0 %v529_v15, %s9240_s15  ;;  %v560_v62 = vld [vmem:[#allocation2 + $0x2] sm:$0xff] }
  0x28   : > { %468 = vst.msk [vmem:[#allocation2 + $0x49] sm:$0xff] %vm417_vm0, %v6233_v5  ;;  %825 = vrot.lane.b32.xlu2 %v6261_v12, %s9240_s15  ;;  %v561_v6 = vld [vmem:[#allocation2 + $0xa] sm:$0xff] }
  0x29   : > { %9273 = vst [vmem:[#allocation14_spill] sm:$0xff] %v6249_v9  ;;  %v6270_v14 = vld [vmem:[#allocation2 + $0x19] sm:$0xff] }
  0x2a   : > { %470 = vst.msk [vmem:[#allocation2 + $0x61] sm:$0xff] %vm417_vm0, %v6238_v7  ;;  %821 = vrot.lane.b32.xlu1 %v6270_v14, %s9240_s15 }
  0x2b   : > { %9274 = vst [vmem:[#allocation15_spill] sm:$0xff] %v6254_v10  ;;  %v6300_v21 = vld [vmem:[#allocation2 + $0x39] sm:$0xff] }
  0x2c   : > { %469 = vst.msk [vmem:[#allocation2 + $0x51] sm:$0xff] %vm417_vm0, %v6244_v8 }
  0x2d   : > { %9275 = vst [vmem:[#allocation16_spill] sm:$0xff] %v6259_v11  ;;  %v6307_v23 = vld [vmem:[#allocation2 + $0x21] sm:$0xff] }
  0x2e   : > { %471 = vst.msk [vmem:[#allocation2 + $0x69] sm:$0xff] %vm417_vm0, %v6249_v9  ;;  %v6644_v9 = vld [vmem:[#allocation2 + $0x38] sm:$0xff] }
  0x2f   : > { %9276 = vst [vmem:[#allocation17_spill] sm:$0xff] %v6266_v13  ;;  %v6315_v24 = vld [vmem:[#allocation2 + $0x49] sm:$0xff] }
  0x30   : > { %473 = vst.msk [vmem:[#allocation2 + $0x81] sm:$0xff] %vm417_vm0, %v6254_v10  ;;  %827 = vrot.lane.b32.xlu2 %v6300_v21, %s9240_s15  ;;  %829 = vrot.lane.b32.xlu0 %v6315_v24, %s9240_s15 }
  0x31   : > { %9277 = vst [vmem:[#allocation18_spill] sm:$0xff] %v6275_v16  ;;  %v6338_v28 = vld [vmem:[#allocation2 + $0x61] sm:$0xff] }
  0x32   : > { %472 = vst.msk [vmem:[#allocation2 + $0x79] sm:$0xff] %vm417_vm0, %v6259_v11  ;;  %823 = vrot.lane.b32.xlu1 %v6307_v23, %s9240_s15 }
  0x33   : > { %9278 = vst [vmem:[#allocation19_spill] sm:$0xff] %v6282_v17  ;;  %v6340_v29 = vld [vmem:[#allocation2 + $0x51] sm:$0xff] }
  0x34   : > { %474 = vst.msk [vmem:[#allocation2 + $0x91] sm:$0xff] %vm417_vm0, %v6266_v13  ;;  %v6650_v7 = vld [vmem:[#allocation2 + $0x50] sm:$0xff] }
  0x35   : > { %9279 = vst [vmem:[#allocation20_spill] sm:$0xff] %v6287_v18  ;;  %v6344_v30 = vld [vmem:[#allocation2 + $0x69] sm:$0xff] }
  0x36   : > { %476 = vst.msk [vmem:[#allocation2 + $0xa9] sm:$0xff] %vm417_vm0, %v6275_v16  ;;  %v6660_v1 = vld [vmem:[#allocation2 + $0x68] sm:$0xff] }
  0x37   : > { %9280 = vst [vmem:[#allocation21_spill] sm:$0xff] %v6293_v19  ;;  %v539_v34 = vld [vmem:[#allocation2 + $0x81] sm:$0xff] }
  0x38   : > { %475 = vst.msk [vmem:[#allocation2 + $0x99] sm:$0xff] %vm417_vm0, %v6282_v17  ;;  %833 = vrot.lane.b32.xlu2 %v6338_v28, %s9240_s15  ;;  %835 = vrot.lane.b32.xlu0 %v6344_v30, %s9240_s15 }
  0x39   : > { %9281 = vst [vmem:[#allocation22_spill] sm:$0xff] %v6298_v20  ;;  %v538_v35 = vld [vmem:[#allocation2 + $0x79] sm:$0xff] }
  0x3a   : > { %477 = vst.msk [vmem:[#allocation2 + $0xb1] sm:$0xff] %vm417_vm0, %v6287_v18  ;;  %831 = vrot.lane.b32.xlu1 %v6340_v29, %s9240_s15 }
  0x3b   : > { %9282 = vst [vmem:[#allocation23_spill] sm:$0xff] %v6305_v22  ;;  %v540_v36 = vld [vmem:[#allocation2 + $0x91] sm:$0xff] }
  0x3c   : > { %479 = vst.msk [vmem:[#allocation2 + $0xc9] sm:$0xff] %vm417_vm0, %v6293_v19 }
  0x3d   : > { %478 = vst.msk [vmem:[#allocation2 + $0xc1] sm:$0xff] %vm417_vm0, %v6298_v20  ;;  %v542_v40 = vld [vmem:[#allocation2 + $0xa9] sm:$0xff] }
  0x3e   : > { %480 = vst.msk [vmem:[#allocation2 + $0xd9] sm:$0xff] %vm417_vm0, %v6305_v22 }
  0x3f   : > { %9283 = vst [vmem:[#allocation24_spill] sm:$0xff] %v6320_v25  ;;  %v541_v41 = vld [vmem:[#allocation2 + $0x99] sm:$0xff] }
  0x40   : > { %9284 = vst [vmem:[#allocation25_spill] sm:$0xff] %v6323_v26  ;;  %839 = vrot.lane.b32.xlu2 %v539_v34, %s9240_s15  ;;  %841 = vrot.lane.b32.xlu0 %v540_v36, %s9240_s15  ;;  %v6498_v34 = vld [vmem:[#allocation2 + $0x1a] sm:$0xff] }
  0x41   : > { %482 = vst.msk [vmem:[#allocation2 + $0xf1] sm:$0xff] %vm417_vm0, %v6320_v25  ;;  %v543_v42 = vld [vmem:[#allocation2 + $0xb1] sm:$0xff] }
  0x42   : > { %481 = vst.msk [vmem:[#allocation2 + $0xe1] sm:$0xff] %vm417_vm0, %v6323_v26  ;;  %837 = vrot.lane.b32.xlu1 %v538_v35, %s9240_s15  ;;  %v6502_v35 = vld [vmem:[#allocation2 + $0x32] sm:$0xff] }
  0x43   : > { %9285 = vst [vmem:[#allocation26_spill] sm:$0xff] %v6332_v27  ;;  %v545_v46 = vld [vmem:[#allocation2 + $0xc9] sm:$0xff] }
  0x44   : > { %483 = vst.msk [vmem:[#allocation2 + $0xf9] sm:$0xff] %vm417_vm0, %v6332_v27  ;;  %v544_v47 = vld [vmem:[#allocation2 + $0xc1] sm:$0xff] }
  0x45   : > { %9286 = vst [vmem:[#allocation27_spill] sm:$0xff] %v6347_v31  ;;  %v546_v48 = vld [vmem:[#allocation2 + $0xd9] sm:$0xff] }
  0x46   : > { %9287 = vst [vmem:[#allocation28_spill] sm:$0xff] %v6350_v32 }
  0x47   : > { %485 = vst.msk [vmem:[#allocation2 + $0x111] sm:$0xff] %vm417_vm0, %v6347_v31 }
  0x48   : > { %484 = vst.msk [vmem:[#allocation2 + $0x109] sm:$0xff] %vm417_vm0, %v6350_v32  ;;  %845 = vrot.lane.b32.xlu2 %v542_v40, %s9240_s15  ;;  %847 = vrot.lane.b32.xlu0 %v543_v42, %s9240_s15  ;;  %v548_v50 = vld [vmem:[#allocation2 + $0xf1] sm:$0xff] }
  0x49   : > { %9288 = vst [vmem:[#allocation29_spill] sm:$0xff] %v6359_v33  ;;  %v547_v51 = vld [vmem:[#allocation2 + $0xe1] sm:$0xff]  ;;  %v6510_v40 = vld [vmem:[#allocation2 + $0x4a] sm:$0xff] }
  0x4a   : > { %486 = vst.msk [vmem:[#allocation2 + $0x121] sm:$0xff] %vm417_vm0, %v6359_v33  ;;  %843 = vrot.lane.b32.xlu1 %v541_v41, %s9240_s15 }
  0x4b   : > { %9289 = vst [vmem:[#allocation30_spill] sm:$0xff] %v6367_v37  ;;  %v549_v52 = vld [vmem:[#allocation2 + $0xf9] sm:$0xff] }
  0x4c   : > { %9290 = vst [vmem:[#allocation31_spill] sm:$0xff] %v6370_v38 }
  0x4d   : > { %488 = vst.msk [vmem:[#allocation2 + $0x139] sm:$0xff] %vm417_vm0, %v6367_v37 }
  0x4e   : > { %487 = vst.msk [vmem:[#allocation2 + $0x129] sm:$0xff] %vm417_vm0, %v6370_v38  ;;  %v551_v53 = vld [vmem:[#allocation2 + $0x111] sm:$0xff] }
  0x4f   : > { %9291 = vst [vmem:[#allocation32_spill] sm:$0xff] %v6378_v39  ;;  %v550_v54 = vld [vmem:[#allocation2 + $0x109] sm:$0xff]  ;;  %v580_v38 = vld [vmem:[#allocation2 + $0xf2] sm:$0xff] }
  0x50   : > { %489 = vst.msk [vmem:[#allocation2 + $0x141] sm:$0xff] %vm417_vm0, %v6378_v39  ;;  %851 = vrot.lane.b32.xlu2 %v545_v46, %s9240_s15  ;;  %853 = vrot.lane.b32.xlu0 %v546_v48, %s9240_s15  ;;  %v6526_v48 = vld [vmem:[#allocation2 + $0x62] sm:$0xff]  ;;  %v582_v33 = vld [vmem:[#allocation2 + $0x10a] sm:$0xff] }
  0x51   : > { %9292 = vst [vmem:[#allocation33_spill] sm:$0xff] %v6385_v43  ;;  %v552_v55 = vld [vmem:[#allocation2 + $0x121] sm:$0xff] }
  0x52   : > { %9293 = vst [vmem:[#allocation34_spill] sm:$0xff] %v6388_v44  ;;  %849 = vrot.lane.b32.xlu1 %v544_v47, %s9240_s15 }
  0x53   : > { %491 = vst.msk [vmem:[#allocation2 + $0x159] sm:$0xff] %vm417_vm0, %v6385_v43 }
  0x54   : > { %490 = vst.msk [vmem:[#allocation2 + $0x151] sm:$0xff] %vm417_vm0, %v6388_v44  ;;  %v554_v56 = vld [vmem:[#allocation2 + $0x139] sm:$0xff] }
  0x55   : > { %9294 = vst [vmem:[#allocation35_spill] sm:$0xff] %v6396_v45  ;;  %v553_v57 = vld [vmem:[#allocation2 + $0x129] sm:$0xff] }
  0x56   : > { %492 = vst.msk [vmem:[#allocation2 + $0x169] sm:$0xff] %vm417_vm0, %v6396_v45 }
  0x57   : > { %9295 = vst [vmem:[#allocation36_spill] sm:$0xff] %v6403_v49  ;;  %v555_v58 = vld [vmem:[#allocation2 + $0x141] sm:$0xff] }
  0x58   : > { %493 = vst.msk [vmem:[#allocation2 + $0x171] sm:$0xff] %vm417_vm0, %v6403_v49  ;;  %857 = vrot.lane.b32.xlu2 %v548_v50, %s9240_s15  ;;  %859 = vrot.lane.b32.xlu0 %v549_v52, %s9240_s15  ;;  %v6530_v50 = vld [vmem:[#allocation2 + $0x7a] sm:$0xff] }
  0x59   : > { %427 = vst.msk [vmem:[#allocation2] sm:$0x1] %vm426_vm2, %v9205_v0  ;;  %v586_v22 = vld [vmem:[#allocation2 + $0x13a] sm:$0xff] }
  0x5a   : > { %428 = vst.msk [vmem:[#allocation2 + $0x18] sm:$0x1] %vm426_vm2, %v9205_v0  ;;  %855 = vrot.lane.b32.xlu1 %v547_v51, %s9240_s15  ;;  %v557_v59 = vld [vmem:[#allocation2 + $0x159] sm:$0xff] }
  0x5b   : > { %429 = vst.msk [vmem:[#allocation2 + $0x30] sm:$0x1] %vm426_vm2, %v9205_v0  ;;  %v556_v60 = vld [vmem:[#allocation2 + $0x151] sm:$0xff] }
  0x5c   : > { %430 = vst.msk [vmem:[#allocation2 + $0x48] sm:$0x1] %vm426_vm2, %v9205_v0  ;;  %v588_v19 = vld [vmem:[#allocation2 + $0x152] sm:$0xff] }
  0x5d   : > { %431 = vst.msk [vmem:[#allocation2 + $0x60] sm:$0x1] %vm426_vm2, %v9205_v0  ;;  %v558_v61 = vld [vmem:[#allocation2 + $0x169] sm:$0xff] }
  0x5e   : > { %432 = vst.msk [vmem:[#allocation2 + $0x78] sm:$0x1] %vm426_vm2, %v9205_v0 }
  0x5f   : > { %433 = vst.msk [vmem:[#allocation2 + $0x90] sm:$0x1] %vm426_vm2, %v9205_v0  ;;  %v559_v63 = vld [vmem:[#allocation2 + $0x171] sm:$0xff] }
  0x60   : > { %434 = vst.msk [vmem:[#allocation2 + $0xa8] sm:$0x1] %vm426_vm2, %v9205_v0  ;;  %863 = vrot.lane.b32.xlu2 %v551_v53, %s9240_s15  ;;  %865 = vrot.lane.b32.xlu0 %v552_v55, %s9240_s15  ;;  %v6540_v53 = vld [vmem:[#allocation2 + $0x92] sm:$0xff] }
  0x61   : > { %435 = vst.msk [vmem:[#allocation2 + $0xc0] sm:$0x1] %vm426_vm2, %v9205_v0  ;;  %v6626_v13 = vld [vmem:[#allocation2 + $0x18] sm:$0xff] }
  0x62   : > { %436 = vst.msk [vmem:[#allocation2 + $0xd8] sm:$0x1] %vm426_vm2, %v9205_v0  ;;  %861 = vrot.lane.b32.xlu1 %v550_v54, %s9240_s15 }
  0x63   : > { %437 = vst.msk [vmem:[#allocation2 + $0xf0] sm:$0x1] %vm426_vm2, %v9205_v0  ;;  %v6642_v11 = vld [vmem:[#allocation2 + $0x48] sm:$0xff] }
  0x64   : > { %438 = vst.msk [vmem:[#allocation2 + $0x108] sm:$0x1] %vm426_vm2, %v9205_v0  ;;  %v6662_v4 = vld [vmem:[#allocation2 + $0x60] sm:$0xff] }
  0x65   : > { %439 = vst.msk [vmem:[#allocation2 + $0x120] sm:$0x1] %vm426_vm2, %v9205_v0  ;;  %v6668_v2 = vld [vmem:[#allocation2 + $0x78] sm:$0xff] }
  0x66   : > { %440 = vst.msk [vmem:[#allocation2 + $0x138] sm:$0x1] %vm426_vm2, %v9205_v0 }
  0x67   : > { %441 = vst.msk [vmem:[#allocation2 + $0x150] sm:$0x1] %vm426_vm2, %v9205_v0 }
  0x68   : > { %442 = vst.msk [vmem:[#allocation2 + $0x168] sm:$0x1] %vm426_vm2, %v9205_v0  ;;  %869 = vrot.lane.b32.xlu2 %v554_v56, %s9240_s15  ;;  %871 = vrot.lane.b32.xlu0 %v555_v58, %s9240_s15 }
  0x69   : > { %443 = vst.msk [vmem:[#allocation2 + $0x180] sm:$0x1] %vm426_vm2, %v9205_v0 }
  0x6a   : > { %444 = vst.msk [vmem:[#allocation2 + $0x198] sm:$0x1] %vm426_vm2, %v9205_v0  ;;  %867 = vrot.lane.b32.xlu1 %v553_v57, %s9240_s15 }
  0x6b   : > { %446 = vst.msk [vmem:[#allocation2 + $0x29] sm:$0x1] %vm426_vm2, %v9205_v0 }
  0x6c   : > { %447 = vst.msk [vmem:[#allocation2 + $0x41] sm:$0x1] %vm426_vm2, %v9205_v0 }
  0x6d   : > { %448 = vst.msk [vmem:[#allocation2 + $0x59] sm:$0x1] %vm426_vm2, %v9205_v0 }
  0x6e   : > { %449 = vst.msk [vmem:[#allocation2 + $0x71] sm:$0x1] %vm426_vm2, %v9205_v0 }
  0x6f   : > { %450 = vst.msk [vmem:[#allocation2 + $0x89] sm:$0x1] %vm426_vm2, %v9205_v0 }
  0x70   : > { %451 = vst.msk [vmem:[#allocation2 + $0xa1] sm:$0x1] %vm426_vm2, %v9205_v0  ;;  %875 = vrot.lane.b32.xlu2 %v557_v59, %s9240_s15  ;;  %877 = vrot.lane.b32.xlu0 %v558_v61, %s9240_s15  ;;  %v6564_v61 = vld [vmem:[#allocation2 + $0xc2] sm:$0xff] }
  0x71   : > { %452 = vst.msk [vmem:[#allocation2 + $0xb9] sm:$0x1] %vm426_vm2, %v9205_v0 }
  0x72   : > { %453 = vst.msk [vmem:[#allocation2 + $0xd1] sm:$0x1] %vm426_vm2, %v9205_v0  ;;  %873 = vrot.lane.b32.xlu1 %v556_v60, %s9240_s15  ;;  %v6496_v15 = vld [vmem:[#allocation2 + $0x22] sm:$0xff]  ;;  %v6560_v60 = vld [vmem:[#allocation2 + $0xaa] sm:$0xff] }
  0x73   : > { %454 = vst.msk [vmem:[#allocation2 + $0xe9] sm:$0x1] %vm426_vm2, %v9205_v0  ;;  %v6512_v41 = vld [vmem:[#allocation2 + $0x3a] sm:$0xff] }
  0x74   : > { %455 = vst.msk [vmem:[#allocation2 + $0x101] sm:$0x1] %vm426_vm2, %v9205_v0  ;;  %v6516_v42 = vld [vmem:[#allocation2 + $0x52] sm:$0xff] }
  0x75   : > { %456 = vst.msk [vmem:[#allocation2 + $0x119] sm:$0x1] %vm426_vm2, %v9205_v0  ;;  %v6524_v47 = vld [vmem:[#allocation2 + $0x6a] sm:$0xff] }
  0x76   : > { %457 = vst.msk [vmem:[#allocation2 + $0x131] sm:$0x1] %vm426_vm2, %v9205_v0  ;;  %v6542_v54 = vld [vmem:[#allocation2 + $0x82] sm:$0xff] }
  0x77   : > { %458 = vst.msk [vmem:[#allocation2 + $0x149] sm:$0x1] %vm426_vm2, %v9205_v0  ;;  %v6546_v55 = vld [vmem:[#allocation2 + $0x9a] sm:$0xff] }
  0x78   : > { %459 = vst.msk [vmem:[#allocation2 + $0x161] sm:$0x1] %vm426_vm2, %v9205_v0  ;;  %945 = vrot.lane.b32.xlu2 %v560_v62, %s6075_s16  ;;  %947 = vrot.lane.b32.xlu0 %v561_v6, %s6075_s16  ;;  %v6558_v59 = vld [vmem:[#allocation2 + $0xb2] sm:$0xff] }
  0x79   : > { %460 = vst.msk [vmem:[#allocation2 + $0x179] sm:$0x1] %vm426_vm2, %v9205_v0  ;;  %v6576_v49 = vld [vmem:[#allocation2 + $0xca] sm:$0xff] }
  0x7a   : > { %461 = vst.msk [vmem:[#allocation2 + $0x191] sm:$0x1] %vm426_vm2, %v9205_v0  ;;  %879 = vrot.lane.b32.xlu1 %v559_v63, %s9240_s15  ;;  %v579_v45 = vld [vmem:[#allocation2 + $0xe2] sm:$0xff]  ;;  %s9258_s15 = smov 96  }
  0x7b   : > { %462 = vst.msk [vmem:[#allocation2 + $0x1a9] sm:$0x1] %vm426_vm2, %v9205_v0  ;;  %v578_v0 = vld [vmem:[#allocation2 + $0xda] sm:$0xff]  ;;  %vm3902_vm2 = vcmask 392192  }
  0x7c   : > { %v581_v37 = vld [vmem:[#allocation2 + $0xfa] sm:$0xff]  ;;  %v583_v27 = vld [vmem:[#allocation2 + $0x112] sm:$0xff] }
  0x7d   : > { %v585_v25 = vld [vmem:[#allocation2 + $0x12a] sm:$0xff] }
  0x7f   : > { %v589_v18 = vld [vmem:[#allocation2 + $0x15a] sm:$0xff] }
  0x80   : > { %951 = vrot.lane.b32.xlu2 %v6496_v15, %s6075_s16  ;;  %953 = vrot.lane.b32.xlu0 %v6502_v35, %s6075_s16  ;;  %v591_v16 = vld [vmem:[#allocation2 + $0x172] sm:$0xff] }
  0x82   : > { %949 = vrot.lane.b32.xlu1 %v6498_v34, %s6075_s16  ;;  %v6506_v36 = vpop.permute.xlu2 %825 }
  0x88   : > { %957 = vrot.lane.b32.xlu2 %v6510_v40, %s6075_s16  ;;  %959 = vrot.lane.b32.xlu0 %v6516_v42, %s6075_s16 }
  0x8a   : > { %955 = vrot.lane.b32.xlu1 %v6512_v41, %s6075_s16  ;;  %v6520_v46 = vpop.permute.xlu2 %827 }
  0x90   : > { %963 = vrot.lane.b32.xlu2 %v6524_v47, %s6075_s16  ;;  %965 = vrot.lane.b32.xlu0 %v6530_v50, %s6075_s16 }
  0x91   : > { %v6538_v52 = vpop.permute.xlu0 %817 }
  0x92   : > { %961 = vrot.lane.b32.xlu1 %v6526_v48, %s6075_s16  ;;  %v6534_v51 = vpop.permute.xlu2 %833 }
  0x93   : > { %9296 = vst [vmem:[#allocation37_spill] sm:$0xff] %v6534_v51 }
  0x98   : > { %969 = vrot.lane.b32.xlu2 %v6540_v53, %s6075_s16  ;;  %971 = vrot.lane.b32.xlu0 %v6546_v55, %s6075_s16 }
  0x99   : > { %v6556_v58 = vpop.permute.xlu0 %819 }
  0x9a   : > { %967 = vrot.lane.b32.xlu1 %v6542_v54, %s6075_s16  ;;  %v6550_v56 = vpop.permute.xlu2 %839 }
  0x9b   : > { %9297 = vst [vmem:[#allocation38_spill] sm:$0xff] %v6550_v56  ;;  %v6732_v56 = vld [vmem:[#allocation2 + $0xf8] sm:$0xff] }
  0x9c   : > { %v6554_v57 = vpop.permute.xlu1 %821  ;;  %9327 = vst [vmem:[#allocation68_spill] sm:$0xff] %v6732_v56 }
  0xa0   : > { %975 = vrot.lane.b32.xlu2 %v6558_v59, %s6075_s16  ;;  %977 = vrot.lane.b32.xlu0 %v6564_v61, %s6075_s16 }
  0xa2   : > { %973 = vrot.lane.b32.xlu1 %v6560_v60, %s6075_s16  ;;  %v6568_v62 = vpop.permute.xlu2 %845  ;;  %v6574_v6 = vpop.permute.xlu0 %829 }
  0xa3   : > { %9298 = vst [vmem:[#allocation39_spill] sm:$0xff] %v6568_v62  ;;  %v6722_v62 = vld [vmem:[#allocation2 + $0xe0] sm:$0xff] }
  0xa4   : > { %v6572_v63 = vpop.permute.xlu1 %823  ;;  %9324 = vst [vmem:[#allocation65_spill] sm:$0xff] %v6722_v62 }
  0xa8   : > { %981 = vrot.lane.b32.xlu2 %v578_v0, %s6075_s16  ;;  %983 = vrot.lane.b32.xlu0 %v579_v45, %s6075_s16  ;;  %v584_v45 = vld [vmem:[#allocation2 + $0x122] sm:$0xff] }
  0xaa   : > { %979 = vrot.lane.b32.xlu1 %v6576_v49, %s6075_s16  ;;  %v6581_v43 = vpop.permute.xlu2 %851  ;;  %v6586_v39 = vpop.permute.xlu0 %835 }
  0xab   : > { %9299 = vst [vmem:[#allocation40_spill] sm:$0xff] %v6581_v43 }
  0xac   : > { %v6584_v44 = vpop.permute.xlu1 %831  ;;  %9301 = vst [vmem:[#allocation42_spill] sm:$0xff] %v6586_v39 }
  0xad   : > { %9300 = vst [vmem:[#allocation41_spill] sm:$0xff] %v6584_v44  ;;  %v519_v44 = vld [vmem:[#allocation2 + $0x110] sm:$0xff] }
  0xb0   : > { %987 = vrot.lane.b32.xlu2 %v581_v37, %s6075_s16  ;;  %989 = vrot.lane.b32.xlu0 %v582_v33, %s6075_s16  ;;  %v587_v33 = vld [vmem:[#allocation2 + $0x142] sm:$0xff] }
  0xb2   : > { %985 = vrot.lane.b32.xlu1 %v580_v38, %s6075_s16  ;;  %v6590_v0 = vpop.permute.xlu2 %857  ;;  %v6595_v32 = vpop.permute.xlu0 %841 }
  0xb3   : > { %9302 = vst [vmem:[#allocation43_spill] sm:$0xff] %v6590_v0  ;;  %v6698_v0 = vld [vmem:[#allocation2 + $0xa8] sm:$0xff] }
  0xb4   : > { %v6593_v31 = vpop.permute.xlu1 %837  ;;  %9304 = vst [vmem:[#allocation45_spill] sm:$0xff] %v6595_v32 }
  0xb5   : > { %9303 = vst [vmem:[#allocation44_spill] sm:$0xff] %v6593_v31  ;;  %v516_v31 = vld [vmem:[#allocation2 + $0xf0] sm:$0xff] }
  0xb8   : > { %993 = vrot.lane.b32.xlu2 %v584_v45, %s6075_s16  ;;  %995 = vrot.lane.b32.xlu0 %v585_v25, %s6075_s16  ;;  %v590_v25 = vld [vmem:[#allocation2 + $0x16a] sm:$0xff] }
  0xba   : > { %991 = vrot.lane.b32.xlu1 %v583_v27, %s6075_s16  ;;  %v6599_v26 = vpop.permute.xlu2 %863  ;;  %v6604_v38 = vpop.permute.xlu0 %847 }
  0xbb   : > { %9305 = vst [vmem:[#allocation46_spill] sm:$0xff] %v6599_v26  ;;  %v6686_v26 = vld [vmem:[#allocation2 + $0x98] sm:$0xff] }
  0xbc   : > { %v6602_v37 = vpop.permute.xlu1 %843  ;;  %9307 = vst [vmem:[#allocation48_spill] sm:$0xff] %v6604_v38  ;;  %v6716_v38 = vld [vmem:[#allocation2 + $0xc8] sm:$0xff] }
  0xbd   : > { %9306 = vst [vmem:[#allocation47_spill] sm:$0xff] %v6602_v37 }
  0xc0   : > { %999 = vrot.lane.b32.xlu2 %v587_v33, %s6075_s16  ;;  %1001 = vrot.lane.b32.xlu0 %v588_v19, %s6075_s16  ;;  %v6624_v19 = vld [vmem:[#allocation2 + $0x20] sm:$0xff] }
  0xc2   : > { %997 = vrot.lane.b32.xlu1 %v586_v22, %s6075_s16  ;;  %v6608_v20 = vpop.permute.xlu2 %869  ;;  %v6613_v45 = vpop.permute.xlu0 %853 }
  0xc3   : > { %9308 = vst [vmem:[#allocation49_spill] sm:$0xff] %v6608_v20 }
  0xc4   : > { %v6611_v27 = vpop.permute.xlu1 %849  ;;  %9310 = vst [vmem:[#allocation51_spill] sm:$0xff] %v6613_v45 }
  0xc5   : > { %9309 = vst [vmem:[#allocation50_spill] sm:$0xff] %v6611_v27  ;;  %v6714_v27 = vld [vmem:[#allocation2 + $0xd8] sm:$0xff] }
  0xc8   : > { %1005 = vrot.lane.b32.xlu2 %v590_v25, %s6075_s16  ;;  %1007 = vrot.lane.b32.xlu0 %v591_v16, %s6075_s16 }
  0xca   : > { %1003 = vrot.lane.b32.xlu1 %v589_v18, %s6075_s16  ;;  %v6617_v17 = vpop.permute.xlu2 %875  ;;  %v6622_v33 = vpop.permute.xlu0 %859  ;;  %v6632_v18 = vld [vmem:[#allocation2 + $0x30] sm:$0xff]  ;;  %s9363_s16 = smov 15  }
  0xcb   : > { %9311 = vst [vmem:[#allocation52_spill] sm:$0xff] %v6617_v17 }
  0xcc   : > { %v6620_v22 = vpop.permute.xlu1 %855  ;;  %9313 = vst [vmem:[#allocation54_spill] sm:$0xff] %v6622_v33  ;;  %v6696_v33 = vld [vmem:[#allocation2 + $0xb0] sm:$0xff] }
  0xcd   : > { %9312 = vst [vmem:[#allocation53_spill] sm:$0xff] %v6620_v22  ;;  %v6704_v22 = vld [vmem:[#allocation2 + $0xc0] sm:$0xff] }
  0xd0   : > { %1075 = vrot.lane.b32.xlu2 %v6624_v19, %s9242_s22  ;;  %1077 = vrot.lane.b32.xlu0 %v6632_v18, %s9242_s22 }
  0xd2   : > { %1073 = vrot.lane.b32.xlu1 %v6626_v13, %s9242_s22  ;;  %v6634_v25 = vpop.permute.xlu2 %945  ;;  %v6640_v10 = vpop.permute.xlu0 %865 }
  0xd3   : > { %9315 = vst [vmem:[#allocation56_spill] sm:$0xff] %v6640_v10  ;;  %v6680_v10 = vld [vmem:[#allocation2 + $0x80] sm:$0xff] }
  0xd4   : > { %v6638_v16 = vpop.permute.xlu1 %861 }
  0xd5   : > { %9314 = vst [vmem:[#allocation55_spill] sm:$0xff] %v6638_v16 }
  0xd8   : > { %1081 = vrot.lane.b32.xlu2 %v6642_v11, %s9242_s22  ;;  %1083 = vrot.lane.b32.xlu0 %v6650_v7, %s9242_s22 }
  0xda   : > { %1079 = vrot.lane.b32.xlu1 %v6644_v9, %s9242_s22  ;;  %v6652_v8 = vpop.permute.xlu2 %951  ;;  %v6658_v3 = vpop.permute.xlu0 %871 }
  0xdb   : > { %9317 = vst [vmem:[#allocation58_spill] sm:$0xff] %v6658_v3 }
  0xdc   : > { %v6656_v5 = vpop.permute.xlu1 %867 }
  0xdd   : > { %9316 = vst [vmem:[#allocation57_spill] sm:$0xff] %v6656_v5  ;;  %v6678_v5 = vld [vmem:[#allocation2 + $0x90] sm:$0xff] }
  0xe0   : > { %1087 = vrot.lane.b32.xlu2 %v6660_v1, %s9242_s22  ;;  %1089 = vrot.lane.b32.xlu0 %v6668_v2, %s9242_s22 }
  0xe2   : > { %1085 = vrot.lane.b32.xlu1 %v6662_v4, %s9242_s22  ;;  %v6670_v17 = vpop.permute.xlu2 %957  ;;  %v6676_v3 = vpop.permute.xlu0 %877 }
  0xe3   : > { %9318 = vst [vmem:[#allocation59_spill] sm:$0xff] %v6670_v17  ;;  %v522_v17 = vld [vmem:[#allocation2 + $0x138] sm:$0xff] }
  0xe4   : > { %v6674_v20 = vpop.permute.xlu1 %873  ;;  %9320 = vst [vmem:[#allocation61_spill] sm:$0xff] %v6676_v3 }
  0xe5   : > { %9319 = vst [vmem:[#allocation60_spill] sm:$0xff] %v6674_v20 }
  0xe8   : > { %1093 = vrot.lane.b32.xlu2 %v6678_v5, %s9242_s22  ;;  %1095 = vrot.lane.b32.xlu0 %v6686_v26, %s9242_s22 }
  0xea   : > { %1091 = vrot.lane.b32.xlu1 %v6680_v10, %s9242_s22  ;;  %v6688_v16 = vpop.permute.xlu2 %963  ;;  %v6694_v3 = vpop.permute.xlu0 %947 }
  0xeb   : > { %9321 = vst [vmem:[#allocation62_spill] sm:$0xff] %v6688_v16  ;;  %v6737_v16 = vld [vmem:[#allocation2 + $0x108] sm:$0xff] }
  0xec   : > { %v6692_v20 = vpop.permute.xlu1 %879  ;;  %9328 = vst [vmem:[#allocation69_spill] sm:$0xff] %v6737_v16 }
  0xed   : > { %9322 = vst [vmem:[#allocation63_spill] sm:$0xff] %v6692_v20 }
  0xf0   : > { %1099 = vrot.lane.b32.xlu2 %v6696_v33, %s9242_s22  ;;  %1101 = vrot.lane.b32.xlu0 %v6704_v22, %s9242_s22 }
  0xf2   : > { %1097 = vrot.lane.b32.xlu1 %v6698_v0, %s9242_s22  ;;  %v6706_v45 = vpop.permute.xlu2 %969  ;;  %v6712_v43 = vpop.permute.xlu0 %953 }
  0xf3   : > { %9323 = vst [vmem:[#allocation64_spill] sm:$0xff] %v6706_v45 }
  0xf4   : > { %v6710_v20 = vpop.permute.xlu1 %949 }
  0xf8   : > { %1105 = vrot.lane.b32.xlu2 %v6714_v27, %s9242_s22  ;;  %1107 = vrot.lane.b32.xlu0 %v6722_v62, %s9242_s22 }
  0xfa   : > { %1103 = vrot.lane.b32.xlu1 %v6716_v38, %s9242_s22  ;;  %v6724_v37 = vpop.permute.xlu2 %975  ;;  %v6730_v32 = vpop.permute.xlu0 %959 }
  0xfb   : > { %9325 = vst [vmem:[#allocation66_spill] sm:$0xff] %v6724_v37 }
  0xfc   : > { %v6728_v45 = vpop.permute.xlu1 %955  ;;  %9326 = vst [vmem:[#allocation67_spill] sm:$0xff] %v6730_v32  ;;  %v520_v32 = vld [vmem:[#allocation2 + $0x120] sm:$0xff] }
 0x100   : > { %1111 = vrot.lane.b32.xlu2 %v6732_v56, %s9242_s22  ;;  %1113 = vrot.lane.b32.xlu0 %v6737_v16, %s9242_s22  ;;  %v521_v56 = vld [vmem:[#allocation2 + $0x128] sm:$0xff]  ;;  %v523_v16 = vld [vmem:[#allocation2 + $0x140] sm:$0xff] }
 0x102   : > { %1109 = vrot.lane.b32.xlu1 %v516_v31, %s9242_s22  ;;  %v6739_v39 = vpop.permute.xlu2 %981  ;;  %v6745_v51 = vpop.permute.xlu0 %965 }
 0x103   : > { %9329 = vst [vmem:[#allocation70_spill] sm:$0xff] %v6739_v39 }
 0x104   : > { %v6743_v37 = vpop.permute.xlu1 %961  ;;  %9331 = vst [vmem:[#allocation72_spill] sm:$0xff] %v6745_v51  ;;  %v524_v51 = vld [vmem:[#allocation2 + $0x150] sm:$0xff] }
 0x105   : > { %9330 = vst [vmem:[#allocation71_spill] sm:$0xff] %v6743_v37 }
 0x108   : > { %1117 = vrot.lane.b32.xlu2 %v520_v32, %s9242_s22  ;;  %1119 = vrot.lane.b32.xlu0 %v521_v56, %s9242_s22  ;;  %v526_v56 = vld [vmem:[#allocation2 + $0x168] sm:$0xff] }
 0x10a   : > { %1115 = vrot.lane.b32.xlu1 %v519_v44, %s9242_s22  ;;  %v6749_v62 = vpop.permute.xlu2 %987  ;;  %v6754_v39 = vpop.permute.xlu0 %971 }
 0x10b   : > { %9332 = vst [vmem:[#allocation73_spill] sm:$0xff] %v6749_v62  ;;  %v525_v62 = vld [vmem:[#allocation2 + $0x158] sm:$0xff] }
 0x10c   : > { %v6752_v31 = vpop.permute.xlu1 %967  ;;  %9334 = vst [vmem:[#allocation75_spill] sm:$0xff] %v6754_v39  ;;  %v527_v39 = vld [vmem:[#allocation2 + $0x170] sm:$0xff] }
 0x10d   : > { %9333 = vst [vmem:[#allocation74_spill] sm:$0xff] %v6752_v31 }
 0x110   : > { %1123 = vrot.lane.b32.xlu2 %v523_v16, %s9242_s22  ;;  %1125 = vrot.lane.b32.xlu0 %v524_v51, %s9242_s22 }
 0x112   : > { %1121 = vrot.lane.b32.xlu1 %v522_v17, %s9242_s22  ;;  %v6758_v37 = vpop.permute.xlu2 %993  ;;  %v6763_v44 = vpop.permute.xlu0 %977 }
 0x113   : > { %9335 = vst [vmem:[#allocation76_spill] sm:$0xff] %v6758_v37 }
 0x114   : > { %v6761_v32 = vpop.permute.xlu1 %973  ;;  %9337 = vst [vmem:[#allocation78_spill] sm:$0xff] %v6763_v44 }
 0x115   : > { %9336 = vst [vmem:[#allocation77_spill] sm:$0xff] %v6761_v32 }
 0x118   : > { %1129 = vrot.lane.b32.xlu2 %v526_v56, %s9242_s22  ;;  %1131 = vrot.lane.b32.xlu0 %v527_v39, %s9242_s22 }
 0x11a   : > { %1127 = vrot.lane.b32.xlu1 %v525_v62, %s9242_s22  ;;  %v6767_v31 = vpop.permute.xlu2 %999  ;;  %v6772_v16 = vpop.permute.xlu0 %983  ;;  %s9248_s22 = smov 112  }
 0x11b   : > { %9338 = vst [vmem:[#allocation79_spill] sm:$0xff] %v6767_v31 }
 0x11c   : > { %v6770_v17 = vpop.permute.xlu1 %979  ;;  %9340 = vst [vmem:[#allocation81_spill] sm:$0xff] %v6772_v16 }
 0x11d   : > { %9339 = vst [vmem:[#allocation80_spill] sm:$0xff] %v6770_v17 }
 0x120   : > { %1329 = vrot.lane.b32.xlu2 %v6498_v34, %s9244_s24  ;;  %1457 = vrot.lane.b32.xlu0 %v6632_v18, %s9246_s29 }
 0x122   : > { %1201 = vrot.lane.b32.xlu1 %v6270_v14, %s6078_s25  ;;  %v6778_v51 = vpop.permute.xlu2 %1005  ;;  %v6784_v39 = vpop.permute.xlu0 %989 }
 0x123   : > { %9341 = vst [vmem:[#allocation82_spill] sm:$0xff] %v6778_v51 }
 0x124   : > { %v6782_v62 = vpop.permute.xlu1 %985  ;;  %9343 = vst [vmem:[#allocation84_spill] sm:$0xff] %v6784_v39 }
 0x125   : > { %9342 = vst [vmem:[#allocation83_spill] sm:$0xff] %v6782_v62 }
 0x128   : > { %1713 = vrot.lane.b32.xlu2 %v6502_v35, %s6080_s30  ;;  %1203 = vrot.lane.b32.xlu0 %v6307_v23, %s6078_s25 }
 0x12a   : > { %1585 = vrot.lane.b32.xlu1 %v6261_v12, %s6081_s12  ;;  %v6790_v34 = vpop.permute.xlu2 %1075  ;;  %v6796_v56 = vpop.permute.xlu0 %995 }
 0x12b   : > { %9345 = vst [vmem:[#allocation86_spill] sm:$0xff] %v6796_v56 }
 0x12c   : > { %v6794_v14 = vpop.permute.xlu1 %991 }
 0x12d   : > { %9344 = vst [vmem:[#allocation85_spill] sm:$0xff] %v6794_v14 }
 0x130   : > { %1459 = vrot.lane.b32.xlu2 %v6644_v9, %s9246_s29  ;;  %1587 = vrot.lane.b32.xlu0 %v6300_v21, %s6081_s12 }
 0x132   : > { %1331 = vrot.lane.b32.xlu1 %v6496_v15, %s9244_s24  ;;  %v6802_v51 = vpop.permute.xlu2 %1081  ;;  %v6808_v37 = vpop.permute.xlu0 %1001 }
 0x133   : > { %9347 = vst [vmem:[#allocation88_spill] sm:$0xff] %v6808_v37 }
 0x134   : > { %v6806_v31 = vpop.permute.xlu1 %997 }
 0x135   : > { %9346 = vst [vmem:[#allocation87_spill] sm:$0xff] %v6806_v31 }
 0x138   : > { %1205 = vrot.lane.b32.xlu2 %v6261_v12, %s6078_s25  ;;  %1333 = vrot.lane.b32.xlu0 %v6502_v35, %s9244_s24 }
 0x13a   : > { %1715 = vrot.lane.b32.xlu1 %v6512_v41, %s6080_s30  ;;  %v6814_v23 = vpop.permute.xlu2 %1087  ;;  %v6820_v56 = vpop.permute.xlu0 %1007 }
 0x13b   : > { %9349 = vst [vmem:[#allocation90_spill] sm:$0xff] %v6820_v56 }
 0x13c   : > { %v6818_v15 = vpop.permute.xlu1 %1003 }
 0x13d   : > { %9348 = vst [vmem:[#allocation89_spill] sm:$0xff] %v6818_v15 }
 0x140   : > { %1589 = vrot.lane.b32.xlu2 %v6315_v24, %s6081_s12  ;;  %1717 = vrot.lane.b32.xlu0 %v6510_v40, %s6080_s30 }
 0x142   : > { %1461 = vrot.lane.b32.xlu1 %v6642_v11, %s9246_s29  ;;  %v6826_v37 = vpop.permute.xlu2 %1093  ;;  %v6832_v31 = vpop.permute.xlu0 %1077 }
 0x144   : > { %v6830_v12 = vpop.permute.xlu1 %1073 }
 0x148   : > { %1335 = vrot.lane.b32.xlu2 %v6512_v41, %s9244_s24  ;;  %1463 = vrot.lane.b32.xlu0 %v6650_v7, %s9246_s29 }
 0x14a   : > { %1207 = vrot.lane.b32.xlu1 %v6300_v21, %s6078_s25  ;;  %v6838_v35 = vpop.permute.xlu2 %1099  ;;  %v6844_v15 = vpop.permute.xlu0 %1083 }
 0x14c   : > { %v6842_v56 = vpop.permute.xlu1 %1079 }
 0x150   : > { %1719 = vrot.lane.b32.xlu2 %v6516_v42, %s6080_s30  ;;  %1209 = vrot.lane.b32.xlu0 %v6315_v24, %s6078_s25 }
 0x152   : > { %1591 = vrot.lane.b32.xlu1 %v6340_v29, %s6081_s12  ;;  %v6850_v14 = vpop.permute.xlu2 %1105  ;;  %v6856_v41 = vpop.permute.xlu0 %1089 }
 0x153   : > { %9350 = vst [vmem:[#allocation91_spill] sm:$0xff] %v6850_v14  ;;  %v727_v14 = vld [vmem:[#allocation2 + $0x79] sm:$0xff] }
 0x154   : > { %v6854_v21 = vpop.permute.xlu1 %1085 }
 0x158   : > { %1465 = vrot.lane.b32.xlu2 %v6662_v4, %s9246_s29  ;;  %1593 = vrot.lane.b32.xlu0 %v6338_v28, %s6081_s12 }
 0x15a   : > { %1337 = vrot.lane.b32.xlu1 %v6510_v40, %s9244_s24  ;;  %v6862_v39 = vpop.permute.xlu2 %1111  ;;  %v6868_v16 = vpop.permute.xlu0 %1095 }
 0x15b   : > { %9351 = vst [vmem:[#allocation92_spill] sm:$0xff] %v6862_v39 }
 0x15c   : > { %v6866_v62 = vpop.permute.xlu1 %1091 }
 0x160   : > { %1211 = vrot.lane.b32.xlu2 %v6340_v29, %s6078_s25  ;;  %1339 = vrot.lane.b32.xlu0 %v6516_v42, %s9244_s24  ;;  %v630_v42 = vld [vmem:[#allocation2 + $0x61] sm:$0xff] }
 0x162   : > { %1721 = vrot.lane.b32.xlu1 %v6526_v48, %s6080_s30  ;;  %v6874_v24 = vpop.permute.xlu2 %1117  ;;  %v6880_v39 = vpop.permute.xlu0 %1101 }
 0x163   : > { %9352 = vst [vmem:[#allocation93_spill] sm:$0xff] %v6874_v24 }
 0x164   : > { %v6878_v40 = vpop.permute.xlu1 %1097  ;;  %9353 = vst [vmem:[#allocation94_spill] sm:$0xff] %v6880_v39  ;;  %v496_v39 = vld [vmem:[#allocation2] sm:$0xff] }
 0x168   : > { %1595 = vrot.lane.b32.xlu2 %v6344_v30, %s6081_s12  ;;  %1723 = vrot.lane.b32.xlu0 %v6524_v47, %s6080_s30 }
 0x16a   : > { %1467 = vrot.lane.b32.xlu1 %v6660_v1, %s9246_s29  ;;  %v6886_v28 = vpop.permute.xlu2 %1123  ;;  %v6892_v24 = vpop.permute.xlu0 %1107 }
 0x16b   : > { %9354 = vst [vmem:[#allocation95_spill] sm:$0xff] %v6886_v28 }
 0x16c   : > { %v6890_v29 = vpop.permute.xlu1 %1103  ;;  %9356 = vst [vmem:[#allocation97_spill] sm:$0xff] %v6892_v24  ;;  %v2075_v24 = vld [vmem:[%s9194_s1 + $0x18] sm:$0x7] }
 0x16d   : > { %9355 = vst [vmem:[#allocation96_spill] sm:$0xff] %v6890_v29  ;;  %5184 = vmatpush.msk.msra.mxu0 %vm2177_vm3, %v2075_v24  ;;  %v2072_v24 = vld [vmem:[%s9194_s1] sm:$0xff]  ;;  %vm3935_vm3 = vcmask 523264  }
 0x170   : > { %1341 = vrot.lane.b32.xlu2 %v6526_v48, %s9244_s24  ;;  %1469 = vrot.lane.b32.xlu0 %v6668_v2, %s9246_s29  ;;  %v2074_v48 = vld [vmem:[%s9194_s1 + $0x10] sm:$0xff]  ;;  %s9411_s29 = smov 9   ;;  %s9442_s24 = smov 32  }
 0x171   : > { %2194 = vmatpush.msra.mxu0 %v2074_v48  ;;  %v728_v48 = vld [vmem:[#allocation2 + $0x81] sm:$0xff] }
 0x172   : > { %1213 = vrot.lane.b32.xlu1 %v630_v42, %s6078_s25  ;;  %v6897_v17 = vpop.permute.xlu2 %1129  ;;  %v6903_v28 = vpop.permute.xlu0 %1113  ;;  %v631_v42 = vld [vmem:[#allocation2 + $0x69] sm:$0xff] }
 0x173   : > { %9357 = vst [vmem:[#allocation98_spill] sm:$0xff] %v6897_v17  ;;  %v2073_v17 = vld [vmem:[%s9194_s1 + $0x8] sm:$0xff] }
 0x174   : > { %v6901_v30 = vpop.permute.xlu1 %1109  ;;  %9359 = vst [vmem:[#allocation100_spill] sm:$0xff] %v6903_v28  ;;  %2195 = vmatpush.msra.mxu0 %v2073_v17 }
 0x175   : > { %9358 = vst [vmem:[#allocation99_spill] sm:$0xff] %v6901_v30 }
 0x176   : > { %2196 = vmatpush.msra.mxu0 %v2072_v24 }
 0x178   : > { %1725 = vrot.lane.b32.xlu2 %v6530_v50, %s6080_s30  ;;  %1215 = vrot.lane.b32.xlu0 %v631_v42, %s6078_s25 }
 0x17a   : > { %1597 = vrot.lane.b32.xlu1 %v727_v14, %s6081_s12  ;;  %v1330_v28 = vpop.permute.xlu2 %1329  ;;  %v6923_v44 = vpop.permute.xlu0 %1119 }
 0x17b   : > { %9361 = vst [vmem:[#allocation102_spill] sm:$0xff] %v6923_v44 }
 0x17c   : > { %v6918_v30 = vpop.permute.xlu1 %1115 }
 0x17d   : > { %9360 = vst [vmem:[#allocation101_spill] sm:$0xff] %v6918_v30 }
 0x180   : > { %1471 = vrot.lane.b32.xlu2 %v6680_v10, %s9362_s13  ;;  %1599 = vrot.lane.b32.xlu0 %v728_v48, %s6081_s12 }
 0x182   : > { %1343 = vrot.lane.b32.xlu1 %v6524_v47, %s9363_s16  ;;  %v1714_v29 = vpop.permute.xlu2 %1713  ;;  %v6932_v17 = vpop.permute.xlu0 %1125  ;;  %v729_v47 = vld [vmem:[#allocation2 + $0x91] sm:$0xff] }
 0x183   : > { %9365 = vst [vmem:[#allocation104_spill] sm:$0xff] %v6932_v17 }
 0x184   : > { %v6930_v42 = vpop.permute.xlu1 %1121 }
 0x185   : > { %9364 = vst [vmem:[#allocation103_spill] sm:$0xff] %v6930_v42 }
 0x188   : > { %1217 = vrot.lane.b32.xlu2 %v727_v14, %s6078_s25  ;;  %1345 = vrot.lane.b32.xlu0 %v6530_v50, %s9363_s16  ;;  %v1809_v14 = vsel %vm417_vm0, %v496_v39, %v6538_v52 }
 0x189   : > { %v1842_v50 = vsel %vm1841_vm4, %v1809_v14, %v6634_v25 }
 0x18a   : > { %1727 = vrot.lane.b32.xlu1 %v6542_v54, %s6080_s30  ;;  %v1460_v24 = vpop.permute.xlu2 %1459  ;;  %v6941_v30 = vpop.permute.xlu0 %1131 }
 0x18b   : > { %9367 = vst [vmem:[#allocation106_spill] sm:$0xff] %v6941_v30 }
 0x18c   : > { %v6939_v44 = vpop.permute.xlu1 %1127 }
 0x18d   : > { %9366 = vst [vmem:[#allocation105_spill] sm:$0xff] %v6939_v44  ;;  %v1875_v44 = vsel %vm1874_vm6, %v1842_v50, %v6830_v12 }
 0x190   : > { %1601 = vrot.lane.b32.xlu2 %v729_v47, %s6081_s12  ;;  %1729 = vrot.lane.b32.xlu0 %v6540_v53, %s6080_s30 }
 0x192   : > { %1473 = vrot.lane.b32.xlu1 %v6678_v5, %s9362_s13  ;;  %v1206_v17 = vpop.permute.xlu2 %1205  ;;  %v1458_v32 = vpop.permute.xlu0 %1457 }
 0x194   : > { %v1202_v30 = vpop.permute.xlu1 %1201 }
 0x195   : > { %v1908_v42 = vsel %vm1907_vm5, %v1875_v44, %v1202_v30 }
 0x196   : > { %v1941_v52 = vsel %vm1940_vm7, %v1908_v42, %v1330_v28  ;;  %v497_v42 = vld [vmem:[#allocation2 + $0x8] sm:$0xff] }
 0x197   : > { %v1974_v39 = vsel %vm1973_vm8, %v1941_v52, %v1458_v32  ;;  %v1810_v32 = vsel %vm417_vm0, %v497_v42, %v6556_v58  ;;  %v731_v58 = vld [vmem:[#allocation2 + $0xa9] sm:$0xff] }
 0x198   : > { %1347 = vrot.lane.b32.xlu2 %v6542_v54, %s9363_s16  ;;  %1475 = vrot.lane.b32.xlu0 %v6686_v26, %s9362_s13  ;;  %v730_v54 = vld [vmem:[#allocation2 + $0x99] sm:$0xff] }
 0x19a   : > { %1219 = vrot.lane.b32.xlu1 %v728_v48, %s6078_s25  ;;  %v1590_v25 = vpop.permute.xlu2 %1589  ;;  %v1204_v30 = vpop.permute.xlu0 %1203  ;;  %v1843_v48 = vsel %vm1841_vm4, %v1810_v32, %v6694_v3 }
 0x19b   : > { %v1876_v50 = vsel %vm1874_vm6, %v1843_v48, %v6790_v34 }
 0x19c   : > { %v1586_v12 = vpop.permute.xlu1 %1585  ;;  %v1909_v52 = vsel %vm1907_vm5, %v1876_v50, %v1204_v30 }
 0x19d   : > { %v2007_v44 = vsel %vm2006_vm9, %v1974_v39, %v1586_v12 }
 0x19e   : > { %v2040_v28 = vsel %vm2039_vm10, %v2007_v44, %v1714_v29 }
 0x19f   : > { %5185 = vmatmul.msk.f32.vlgmr.msra.gmra.mxu0 %vm2080_vm11, %v2040_v28 }
 0x1a0   : > { %1731 = vrot.lane.b32.xlu2 %v6546_v55, %s6080_s30  ;;  %1221 = vrot.lane.b32.xlu0 %v729_v47, %s6078_s25 }
 0x1a2   : > { %1603 = vrot.lane.b32.xlu1 %v730_v54, %s6081_s12  ;;  %v1336_v14 = vpop.permute.xlu2 %1335  ;;  %v1588_v12 = vpop.permute.xlu0 %1587 }
 0x1a4   : > { %v1332_v29 = vpop.permute.xlu1 %1331 }
 0x1a5   : > { %v1942_v39 = vsel %vm1940_vm7, %v1909_v52, %v1332_v29  ;;  %v732_v29 = vld [vmem:[#allocation2 + $0xb1] sm:$0xff] }
 0x1a6   : > { %v1975_v44 = vsel %vm1973_vm8, %v1942_v39, %v1460_v24  ;;  %v1811_v24 = vsel %vm417_vm0, %v6626_v13, %v6554_v57 }
 0x1a7   : > { %v2008_v34 = vsel %vm2006_vm9, %v1975_v44, %v1588_v12  ;;  %v1844_v42 = vsel %vm1841_vm4, %v1811_v24, %v6710_v20 }
 0x1a8   : > { %1477 = vrot.lane.b32.xlu2 %v6698_v0, %s9362_s13  ;;  %1605 = vrot.lane.b32.xlu0 %v731_v58, %s6081_s12 }
 0x1aa   : > { %1349 = vrot.lane.b32.xlu1 %v6540_v53, %s9363_s16  ;;  %v1720_v3 = vpop.permute.xlu2 %1719  ;;  %v1334_v28 = vpop.permute.xlu0 %1333  ;;  %v1877_v53 = vsel %vm1874_vm6, %v1844_v42, %v6832_v31 }
 0x1ab   : > { %v1910_v32 = vsel %vm1907_vm5, %v1877_v53, %v1206_v17 }
 0x1ac   : > { %v1716_v47 = vpop.permute.xlu1 %1715  ;;  %v1943_v50 = vsel %vm1940_vm7, %v1910_v32, %v1334_v28 }
 0x1ad   : > { %v2041_v30 = vsel %vm2039_vm10, %v2008_v34, %v1716_v47 }
 0x1ae   : > { %5186 = vmatmul.msk.f32.gmra.mxu0 %vm2080_vm11, %v2041_v30 }
 0x1b0   : > { %1223 = vrot.lane.b32.xlu2 %v730_v54, %s6078_s25  ;;  %1351 = vrot.lane.b32.xlu0 %v6546_v55, %s9363_s16  ;;  %v1812_v55 = vsel %vm417_vm0, %v6624_v19, %v6572_v63 }
 0x1b1   : > { %v1845_v52 = vsel %vm1841_vm4, %v1812_v55, %v6652_v8 }
 0x1b2   : > { %1733 = vrot.lane.b32.xlu1 %v6560_v60, %s6080_s30  ;;  %v1466_v48 = vpop.permute.xlu2 %1465  ;;  %v1718_v20 = vpop.permute.xlu0 %1717  ;;  %v1878_v39 = vsel %vm1874_vm6, %v1845_v52, %v6842_v56 }
 0x1b4   : > { %v1462_v13 = vpop.permute.xlu1 %1461 }
 0x1b5   : > { %v1976_v57 = vsel %vm1973_vm8, %v1943_v50, %v1462_v13 }
 0x1b6   : > { %v2009_v54 = vsel %vm2006_vm9, %v1976_v57, %v1590_v25 }
 0x1b7   : > { %v2042_v31 = vsel %vm2039_vm10, %v2009_v54, %v1718_v20 }
 0x1b8   : > { %5187 = vmatmul.msk.f32.gmra.mxu0 %vm2080_vm11, %v2042_v31  ;;  %1607 = vrot.lane.b32.xlu2 %v732_v29, %s6081_s12 }
 0x1b9   : > { %1735 = vrot.lane.b32.xlu0 %v6558_v59, %s6080_s30 }
 0x1ba   : > { %1479 = vrot.lane.b32.xlu1 %v6696_v33, %s9362_s13  ;;  %v1212_v17 = vpop.permute.xlu2 %1211  ;;  %v1464_v44 = vpop.permute.xlu0 %1463 }
 0x1bc   : > { %v1208_v25 = vpop.permute.xlu1 %1207 }
 0x1bd   : > { %v1911_v12 = vsel %vm1907_vm5, %v1878_v39, %v1208_v25 }
 0x1be   : > { %v1944_v33 = vsel %vm1940_vm7, %v1911_v12, %v1336_v14  ;;  %v733_v14 = vld [vmem:[#allocation2 + $0xc1] sm:$0xff] }
 0x1bf   : > { %v1977_v8 = vsel %vm1973_vm8, %v1944_v33, %v1464_v44  ;;  %v671_v33 = vld [vmem:[#allocation2 + $0xca] sm:$0xff] }
 0x1c0   : > { %1353 = vrot.lane.b32.xlu2 %v6560_v60, %s9363_s16  ;;  %v1813_v60 = vsel %vm417_vm0, %v6632_v18, %v6506_v36  ;;  %v734_v36 = vld [vmem:[#allocation2 + $0xc9] sm:$0xff] }
 0x1c1   : > { %1481 = vrot.lane.b32.xlu0 %v6704_v22, %s9362_s13  ;;  %v1846_v22 = vsel %vm1841_vm4, %v1813_v60, %v6712_v43 }
 0x1c2   : > { %1225 = vrot.lane.b32.xlu1 %v731_v58, %s6078_s25  ;;  %v1596_v63 = vpop.permute.xlu2 %1595  ;;  %v1210_v56 = vpop.permute.xlu0 %1209  ;;  %v1879_v30 = vsel %vm1874_vm6, %v1846_v22, %v6802_v51  ;;  %v9371_v22 = vld [vmem:[#allocation67_spill] sm:$0xff] }
 0x1c3   : > { %v1912_v28 = vsel %vm1907_vm5, %v1879_v30, %v1210_v56  ;;  %v768_v56 = vld [vmem:[#allocation2 + $0xe2] sm:$0xff] }
 0x1c4   : > { %v1592_v19 = vpop.permute.xlu1 %1591 }
 0x1c5   : > { %v2010_v34 = vsel %vm2006_vm9, %v1977_v8, %v1592_v19 }
 0x1c6   : > { %v2043_v47 = vsel %vm2039_vm10, %v2010_v34, %v1720_v3 }
 0x1c7   : > { %5188 = vmatmul.msk.f32.gmra.mxu0 %vm2080_vm11, %v2043_v47  ;;  %v736_v47 = vld [vmem:[#allocation2 + $0xe1] sm:$0xff] }
 0x1c8   : > { %1737 = vrot.lane.b32.xlu2 %v6564_v61, %s6080_s30 }
 0x1c9   : > { %1227 = vrot.lane.b32.xlu0 %v732_v29, %s6078_s25  ;;  %v735_v29 = vld [vmem:[#allocation2 + $0xd9] sm:$0xff] }
 0x1ca   : > { %1609 = vrot.lane.b32.xlu1 %v733_v14, %s6081_s12  ;;  %v1342_v58 = vpop.permute.xlu2 %1341  ;;  %v1594_v24 = vpop.permute.xlu0 %1593 }
 0x1cc   : > { %v1338_v3 = vpop.permute.xlu1 %1337 }
 0x1cd   : > { %v1945_v61 = vsel %vm1940_vm7, %v1912_v28, %v1338_v3 }
 0x1ce   : > { %v1978_v42 = vsel %vm1973_vm8, %v1945_v61, %v1466_v48  ;;  %v1814_v48 = vsel %vm417_vm0, %v6644_v9, %v6520_v46 }
 0x1cf   : > { %v2011_v18 = vsel %vm2006_vm9, %v1978_v42, %v1594_v24 }
 0x1d0   : > { %1483 = vrot.lane.b32.xlu2 %v6716_v38, %s9362_s13  ;;  %v1847_v38 = vsel %vm1841_vm4, %v1814_v48, %v6728_v45  ;;  %v769_v48 = vld [vmem:[#allocation2 + $0xf2] sm:$0xff] }
 0x1d1   : > { %1611 = vrot.lane.b32.xlu0 %v734_v36, %s6081_s12  ;;  %v1880_v50 = vsel %vm1874_vm6, %v1847_v38, %v6844_v15  ;;  %v1815_v15 = vsel %vm417_vm0, %v6642_v11, %v6574_v6  ;;  %v2326_v38 = vld [vmem:[%s9196_s3] sm:$0xff] }
 0x1d2   : > { %1355 = vrot.lane.b32.xlu1 %v6558_v59, %s9363_s16  ;;  %v1726_v43 = vpop.permute.xlu2 %1725  ;;  %v1340_v32 = vpop.permute.xlu0 %1339  ;;  %v670_v59 = vld [vmem:[#allocation2 + $0xc2] sm:$0xff]  ;;  %v1913_v13 = vsel %vm1907_vm5, %v1880_v50, %v1212_v17  ;;  %2443 = vmatpush.msra.mxu1 %v2326_v38 }
 0x1d3   : > { %v1946_v20 = vsel %vm1940_vm7, %v1913_v13, %v1340_v32  ;;  %v9368_v17 = vld [vmem:[#allocation59_spill] sm:$0xff]  ;;  %5352 = vmatpush.msra.mxu2 %v2326_v38 }
 0x1d4   : > { %v1722_v51 = vpop.permute.xlu1 %1721  ;;  %v1848_v52 = vsel %vm1841_vm4, %v1815_v15, %v9368_v17  ;;  %v9373_v13 = vld [vmem:[#allocation71_spill] sm:$0xff]  ;;  %v9375_v17 = vld [vmem:[#allocation42_spill] sm:$0xff] }
 0x1d5   : > { %v2044_v53 = vsel %vm2039_vm10, %v2011_v18, %v1722_v51  ;;  %v1881_v39 = vsel %vm1874_vm6, %v1848_v52, %v6854_v21  ;;  %v1818_v52 = vsel %vm417_vm0, %v6660_v1, %v9375_v17  ;;  %v709_v17 = vld [vmem:[#allocation2 + $0x120] sm:$0xff] }
 0x1d6   : > { %5189 = vmatmul.msk.f32.gmra.mxu0 %vm2080_vm11, %v2044_v53 }
 0x1d8   : > { %1229 = vrot.lane.b32.xlu2 %v733_v14, %s6078_s25  ;;  %v9370_v14 = vld [vmem:[#allocation41_spill] sm:$0xff] }
 0x1d9   : > { %1357 = vrot.lane.b32.xlu0 %v670_v59, %s9363_s16  ;;  %v1816_v60 = vsel %vm417_vm0, %v6650_v7, %v9370_v14  ;;  %v9372_v59 = vld [vmem:[#allocation37_spill] sm:$0xff]  ;;  %v7150_v14 = vld [vmem:[%s9195_s2] ss:$0 sm:$0xff] }
 0x1da   : > { %1739 = vrot.lane.b32.xlu1 %v6576_v49, %s6080_s30  ;;  %v1472_v57 = vpop.permute.xlu2 %1471  ;;  %v1724_v45 = vpop.permute.xlu0 %1723  ;;  %v767_v49 = vld [vmem:[#allocation2 + $0xda] sm:$0xff]  ;;  %v1817_v50 = vsel %vm417_vm0, %v6662_v4, %v9372_v59  ;;  %v772_v59 = vld [vmem:[#allocation2 + $0x112] sm:$0xff] }
 0x1dc   : > { %v1468_v9 = vpop.permute.xlu1 %1467 }
 0x1dd   : > { %v1979_v46 = vsel %vm1973_vm8, %v1946_v20, %v1468_v9 }
 0x1de   : > { %v2012_v54 = vsel %vm2006_vm9, %v1979_v46, %v1596_v63  ;;  %v9369_v63 = vld [vmem:[#allocation65_spill] sm:$0xff] }
 0x1df   : > { %v2045_v31 = vsel %vm2039_vm10, %v2012_v54, %v1724_v45 }
 0x1e0   : > { %5190 = vmatmul.msk.f32.gmra.mxu0 %vm2080_vm11, %v2045_v31  ;;  %1613 = vrot.lane.b32.xlu2 %v735_v29, %s6081_s12 }
 0x1e1   : > { %1741 = vrot.lane.b32.xlu0 %v767_v49, %s6080_s30 }
 0x1e2   : > { %1485 = vrot.lane.b32.xlu1 %v6714_v27, %s9362_s13  ;;  %v1218_v55 = vpop.permute.xlu2 %1217  ;;  %v1470_v44 = vpop.permute.xlu0 %1469 }
 0x1e4   : > { %v1214_v25 = vpop.permute.xlu1 %1213 }
 0x1e5   : > { %v1914_v12 = vsel %vm1907_vm5, %v1881_v39, %v1214_v25  ;;  %v9376_v39 = vld [vmem:[#allocation62_spill] sm:$0xff] }
 0x1e6   : > { %v1947_v27 = vsel %vm1940_vm7, %v1914_v12, %v1342_v58  ;;  %v1849_v58 = vsel %vm1841_vm4, %v1816_v60, %v9371_v22  ;;  %v1851_v12 = vsel %vm1841_vm4, %v1818_v52, %v9376_v39  ;;  %v9378_v60 = vld [vmem:[#allocation44_spill] sm:$0xff] }
 0x1e7   : > { %v1980_v6 = vsel %vm1973_vm8, %v1947_v27, %v1470_v44  ;;  %v1882_v3 = vsel %vm1874_vm6, %v1849_v58, %v6814_v23  ;;  %v1819_v22 = vsel %vm417_vm0, %v6668_v2, %v9378_v60  ;;  %v9379_v58 = vld [vmem:[#allocation72_spill] sm:$0xff] }
 0x1e8   : > { %1359 = vrot.lane.b32.xlu2 %v671_v33, %s9363_s16  ;;  %v1884_v33 = vsel %vm1874_vm6, %v1851_v12, %v6866_v62  ;;  %v773_v52 = vld [vmem:[#allocation2 + $0x122] sm:$0xff] }
 0x1e9   : > { %1487 = vrot.lane.b32.xlu0 %v9369_v63, %s9362_s13 }
 0x1ea   : > { %1231 = vrot.lane.b32.xlu1 %v734_v36, %s6078_s25  ;;  %v1602_v11 = vpop.permute.xlu2 %1601  ;;  %v1216_v21 = vpop.permute.xlu0 %1215  ;;  %v705_v36 = vld [vmem:[#allocation2 + $0xf0] sm:$0xff] }
 0x1eb   : > { %v1915_v61 = vsel %vm1907_vm5, %v1882_v3, %v1216_v21 }
 0x1ec   : > { %v1598_v8 = vpop.permute.xlu1 %1597 }
 0x1ed   : > { %v2013_v19 = vsel %vm2006_vm9, %v1980_v6, %v1598_v8  ;;  %v9377_v8 = vld [vmem:[#allocation69_spill] sm:$0xff] }
 0x1ee   : > { %v2046_v34 = vsel %vm2039_vm10, %v2013_v19, %v1726_v43  ;;  %v737_v43 = vld [vmem:[#allocation2 + $0xf1] sm:$0xff] }
 0x1ef   : > { %5191 = vmatmul.msk.f32.gmra.mxu0 %vm2080_vm11, %v2046_v34 }
 0x1f0   : > { %1743 = vrot.lane.b32.xlu2 %v768_v56, %s6080_s30 }
 0x1f1   : > { %1233 = vrot.lane.b32.xlu0 %v735_v29, %s6078_s25 }
 0x1f2   : > { %1615 = vrot.lane.b32.xlu1 %v736_v47, %s6081_s12  ;;  %v1348_v30 = vpop.permute.xlu2 %1347  ;;  %v1600_v42 = vpop.permute.xlu0 %1599 }
 0x1f4   : > { %v1344_v28 = vpop.permute.xlu1 %1343 }
 0x1f5   : > { %v1948_v24 = vsel %vm1940_vm7, %v1915_v61, %v1344_v28 }
 0x1f6   : > { %v1981_v7 = vsel %vm1973_vm8, %v1948_v24, %v1472_v57  ;;  %v1850_v57 = vsel %vm1841_vm4, %v1817_v50, %v9373_v13  ;;  %v9380_v50 = vld [vmem:[#allocation38_spill] sm:$0xff] }
 0x1f7   : > { %v2014_v51 = vsel %vm2006_vm9, %v1981_v7, %v1600_v42  ;;  %v1883_v20 = vsel %vm1874_vm6, %v1850_v57, %v6856_v41  ;;  %v770_v41 = vld [vmem:[#allocation2 + $0xfa] sm:$0xff]  ;;  %v1820_v13 = vsel %vm417_vm0, %v6680_v10, %v9380_v50 }
 0x1f8   : > { %1489 = vrot.lane.b32.xlu2 %v705_v36, %s9362_s13  ;;  %v1916_v9 = vsel %vm1907_vm5, %v1883_v20, %v1218_v55  ;;  %v9374_v55 = vld [vmem:[#allocation68_spill] sm:$0xff]  ;;  %v9381_v57 = vld [vmem:[#allocation74_spill] sm:$0xff] }
 0x1f9   : > { %1617 = vrot.lane.b32.xlu0 %v737_v43, %s6081_s12  ;;  %v1853_v20 = vsel %vm1841_vm4, %v1820_v13, %v9381_v57  ;;  %v775_v50 = vld [vmem:[#allocation2 + $0x13a] sm:$0xff] }
 0x1fa   : > { %1361 = vrot.lane.b32.xlu1 %v767_v49, %s9363_s16  ;;  %v1732_v18 = vpop.permute.xlu2 %1731  ;;  %v1346_v32 = vpop.permute.xlu0 %1345  ;;  %v738_v49 = vld [vmem:[#allocation2 + $0xf9] sm:$0xff] }
 0x1fb   : > { %v1949_v45 = vsel %vm1940_vm7, %v1916_v9, %v1346_v32  ;;  %v1886_v9 = vsel %vm1874_vm6, %v1853_v20, %v6868_v16  ;;  %v741_v16 = vld [vmem:[#allocation2 + $0x121] sm:$0xff]  ;;  %v9387_v20 = vld [vmem:[#allocation77_spill] sm:$0xff] }
 0x1fc   : > { %v1728_v23 = vpop.permute.xlu1 %1727  ;;  %v9386_v13 = vld [vmem:[#allocation39_spill] sm:$0xff] }
 0x1fd   : > { %v2047_v53 = vsel %vm2039_vm10, %v2014_v51, %v1728_v23  ;;  %v1823_v57 = vsel %vm417_vm0, %v6698_v0, %v9386_v13 }
 0x1fe   : > { %5192 = vmatmul.msk.f32.gmra.mxu0 %vm2080_vm11, %v2047_v53 }
 0x200   : > { %1235 = vrot.lane.b32.xlu2 %v736_v47, %s6078_s25  ;;  %v739_v47 = vld [vmem:[#allocation2 + $0x109] sm:$0xff] }
 0x201   : > { %1363 = vrot.lane.b32.xlu0 %v768_v56, %s9363_s16  ;;  %v771_v56 = vld [vmem:[#allocation2 + $0x10a] sm:$0xff] }
 0x202   : > { %1745 = vrot.lane.b32.xlu1 %v769_v48, %s6080_s30  ;;  %v1478_v46 = vpop.permute.xlu2 %1477  ;;  %v1730_v29 = vpop.permute.xlu0 %1729 }
 0x204   : > { %v1474_v4 = vpop.permute.xlu1 %1473 }
 0x205   : > { %v1982_v54 = vsel %vm1973_vm8, %v1949_v45, %v1474_v4 }
 0x206   : > { %v2015_v31 = vsel %vm2006_vm9, %v1982_v54, %v1602_v11 }
 0x207   : > { %v2048_v15 = vsel %vm2039_vm10, %v2015_v31, %v1730_v29 }
 0x208   : > { %5193 = vmatmul.msk.f32.gmra.mxu0 %vm2080_vm11, %v2048_v15  ;;  %1619 = vrot.lane.b32.xlu2 %v738_v49, %s6081_s12 }
 0x209   : > { %1747 = vrot.lane.b32.xlu0 %v770_v41, %s6080_s30 }
 0x20a   : > { %1491 = vrot.lane.b32.xlu1 %v9374_v55, %s9362_s13  ;;  %v1224_v25 = vpop.permute.xlu2 %1223  ;;  %v1476_v11 = vpop.permute.xlu0 %1475 }
 0x20c   : > { %v1220_v44 = vpop.permute.xlu1 %1219 }
 0x20d   : > { %v1917_v27 = vsel %vm1907_vm5, %v1884_v33, %v1220_v44  ;;  %v9383_v44 = vld [vmem:[#allocation64_spill] sm:$0xff] }
 0x20e   : > { %v1950_v6 = vsel %vm1940_vm7, %v1917_v27, %v1348_v30  ;;  %v1852_v30 = vsel %vm1841_vm4, %v1819_v22, %v9379_v58  ;;  %v774_v22 = vld [vmem:[#allocation2 + $0x12a] sm:$0xff] }
 0x20f   : > { %v1983_v63 = vsel %vm1973_vm8, %v1950_v6, %v1476_v11  ;;  %v1885_v28 = vsel %vm1874_vm6, %v1852_v30, %v6826_v37  ;;  %v740_v37 = vld [vmem:[#allocation2 + $0x111] sm:$0xff]  ;;  %v742_v58 = vld [vmem:[#allocation2 + $0x129] sm:$0xff]  ;;  %v9384_v30 = vld [vmem:[#allocation47_spill] sm:$0xff] }
 0x210   : > { %1365 = vrot.lane.b32.xlu2 %v769_v48, %s9363_s16 }
 0x211   : > { %1493 = vrot.lane.b32.xlu0 %v9377_v8, %s9362_s13 }
 0x212   : > { %1237 = vrot.lane.b32.xlu1 %v737_v43, %s6078_s25  ;;  %v1608_v1 = vpop.permute.xlu2 %1607  ;;  %v1222_v34 = vpop.permute.xlu0 %1221  ;;  %v708_v43 = vld [vmem:[#allocation2 + $0x110] sm:$0xff] }
 0x213   : > { %v1918_v42 = vsel %vm1907_vm5, %v1885_v28, %v1222_v34  ;;  %v9385_v28 = vld [vmem:[#allocation75_spill] sm:$0xff] }
 0x214   : > { %v1604_v19 = vpop.permute.xlu1 %1603 }
 0x215   : > { %v2016_v21 = vsel %vm2006_vm9, %v1983_v63, %v1604_v19 }
 0x216   : > { %v2049_v62 = vsel %vm2039_vm10, %v2016_v21, %v1732_v18 }
 0x217   : > { %5194 = vmatmul.msk.f32.gmra.mxu0 %vm2080_vm11, %v2049_v62 }
 0x218   : > { %1749 = vrot.lane.b32.xlu2 %v771_v56, %s6080_s30 }
 0x219   : > { %1239 = vrot.lane.b32.xlu0 %v738_v49, %s6078_s25 }
 0x21a   : > { %1621 = vrot.lane.b32.xlu1 %v739_v47, %s6081_s12  ;;  %v1354_v3 = vpop.permute.xlu2 %1353  ;;  %v1606_v2 = vpop.permute.xlu0 %1605 }
 0x21c   : > { %v2198_v61 = vpop.f32.mrf.mxu0  ;;  %v1350_v24 = vpop.permute.xlu1 %1349 }
 0x21d   : > { %v2199_v36 = vadd.f32 %v7150_v14, %v2198_v61  ;;  %v1951_v7 = vsel %vm1940_vm7, %v1918_v42, %v1350_v24 }
 0x21e   : > { %v1984_v51 = vsel %vm1973_vm8, %v1951_v7, %v1478_v46  ;;  %v1919_v46 = vsel %vm1907_vm5, %v1886_v9, %v1224_v25  ;;  %v9382_v25 = vld [vmem:[#allocation45_spill] sm:$0xff]  ;;  %v1856_v9 = vsel %vm1841_vm4, %v1823_v57, %v9387_v20 }
 0x21f   : > { %v2294_v18 = vmax.f32 %v2199_v36, 0.0  ;;  %v2017_v53 = vsel %vm2006_vm9, %v1984_v51, %v1606_v2  ;;  %v1821_v39 = vsel %vm417_vm0, %v6678_v5, %v9382_v25  ;;  %v710_v5 = vld [vmem:[#allocation2 + $0x128] sm:$0xff]  ;;  %v711_v51 = vld [vmem:[#allocation2 + $0x138] sm:$0xff] }
 0x220   : > { %1495 = vrot.lane.b32.xlu2 %v708_v43, %s9362_s13  ;;  %v1854_v33 = vsel %vm1841_vm4, %v1821_v39, %v9383_v44  ;;  %v776_v25 = vld [vmem:[#allocation2 + $0x142] sm:$0xff]  ;;  %v5964_v39 = vld [vmem:[#allocation2 + $0xb0] sm:$0xff] }
 0x221   : > { %5217 = vmatmul.msk.f32.vlgmr.msra.gmra.mxu1 %vm2331_vm12, %v2294_v18  ;;  %1623 = vrot.lane.b32.xlu0 %v740_v37, %s6081_s12  ;;  %v1887_v11 = vsel %vm1874_vm6, %v1854_v33, %v6878_v40 }
 0x222   : > { %1367 = vrot.lane.b32.xlu1 %v770_v41, %s9363_s16  ;;  %v1738_v23 = vpop.permute.xlu2 %1737  ;;  %v1352_v38 = vpop.permute.xlu0 %1351 }
 0x223   : > { %v1952_v54 = vsel %vm1940_vm7, %v1919_v46, %v1352_v38  ;;  %v9388_v46 = vld [vmem:[#allocation94_spill] sm:$0xff] }
 0x224   : > { %v1734_v32 = vpop.permute.xlu1 %1733 }
 0x225   : > { %v2050_v48 = vsel %vm2039_vm10, %v2017_v53, %v1734_v32 }
 0x226   : > { %5195 = vmatmul.msk.f32.gmra.mxu0 %vm2080_vm11, %v2050_v48 }
 0x228   : > { %1241 = vrot.lane.b32.xlu2 %v739_v47, %s6078_s25 }
 0x229   : > { %1369 = vrot.lane.b32.xlu0 %v771_v56, %s9363_s16 }
 0x22a   : > { %1751 = vrot.lane.b32.xlu1 %v772_v59, %s6080_s30  ;;  %v1484_v4 = vpop.permute.xlu2 %1483 }
 0x22b   : > { %v2201_v45 = vpop.f32.mrf.mxu0  ;;  %v1736_v15 = vpop.permute.xlu0 %1735 }
 0x22c   : > { %v2202_v29 = vadd.f32 %v7150_v14, %v2201_v45  ;;  %v1480_v10 = vpop.permute.xlu1 %1479  ;;  %v1889_v45 = vsel %vm1874_vm6, %v1856_v9, %v9388_v46 }
 0x22d   : > { %v1985_v31 = vsel %vm1973_vm8, %v1952_v54, %v1480_v10 }
 0x22e   : > { %v2295_v49 = vmax.f32 %v2202_v29, 0.0  ;;  %v2018_v41 = vsel %vm2006_vm9, %v1985_v31, %v1608_v1 }
 0x22f   : > { %v2051_v55 = vsel %vm2039_vm10, %v2018_v41, %v1736_v15 }
 0x230   : > { %5196 = vmatmul.msk.f32.gmra.mxu0 %vm2080_vm11, %v2051_v55  ;;  %5218 = vmatmul.msk.f32.gmra.mxu1 %vm2331_vm12, %v2295_v49  ;;  %v744_v55 = vld [vmem:[#allocation2 + $0x141] sm:$0xff] }
 0x231   : > { %1625 = vrot.lane.b32.xlu2 %v741_v16, %s6081_s12  ;;  %1753 = vrot.lane.b32.xlu0 %v773_v52, %s6080_s30 }
 0x232   : > { %1497 = vrot.lane.b32.xlu1 %v709_v17, %s9362_s13  ;;  %v1230_v12 = vpop.permute.xlu2 %1229 }
 0x233   : > { %v1482_v8 = vpop.permute.xlu0 %1481 }
 0x234   : > { %v1226_v27 = vpop.permute.xlu1 %1225 }
 0x235   : > { %v2204_v6 = vpop.f32.mrf.mxu0  ;;  %v1920_v1 = vsel %vm1907_vm5, %v1887_v11, %v1226_v27  ;;  %v9390_v27 = vld [vmem:[#allocation66_spill] sm:$0xff] }
 0x236   : > { %v2205_v63 = vadd.f32 %v7150_v14, %v2204_v6  ;;  %v1953_v21 = vsel %vm1940_vm7, %v1920_v1, %v1354_v3  ;;  %v1822_v3 = vsel %vm417_vm0, %v6686_v26, %v9384_v30  ;;  %v9391_v1 = vld [vmem:[#allocation96_spill] sm:$0xff] }
 0x237   : > { %v1986_v62 = vsel %vm1973_vm8, %v1953_v21, %v1482_v8  ;;  %v1855_v61 = vsel %vm1841_vm4, %v1822_v3, %v9385_v28  ;;  %v777_v3 = vld [vmem:[#allocation2 + $0x152] sm:$0xff] }
 0x238   : > { %v2296_v19 = vmax.f32 %v2205_v63, 0.0  ;;  %v1888_v42 = vsel %vm1874_vm6, %v1855_v61, %v6838_v35  ;;  %v743_v35 = vld [vmem:[#allocation2 + $0x139] sm:$0xff]  ;;  %v745_v28 = vld [vmem:[#allocation2 + $0x151] sm:$0xff] }
 0x239   : > { %1371 = vrot.lane.b32.xlu2 %v772_v59, %s9363_s16  ;;  %1499 = vrot.lane.b32.xlu0 %v710_v5, %s9362_s13  ;;  %v5965_v61 = vld [vmem:[#allocation2 + $0xc0] sm:$0xff] }
 0x23a   : > { %1243 = vrot.lane.b32.xlu1 %v740_v37, %s6078_s25  ;;  %5219 = vmatmul.msk.f32.gmra.mxu1 %vm2331_vm12, %v2296_v19  ;;  %v1614_v34 = vpop.permute.xlu2 %1613 }
 0x23b   : > { %v1228_v47 = vpop.permute.xlu0 %1227 }
 0x23c   : > { %v1610_v40 = vpop.permute.xlu1 %1609  ;;  %v1921_v2 = vsel %vm1907_vm5, %v1888_v42, %v1228_v47 }
 0x23d   : > { %v2019_v56 = vsel %vm2006_vm9, %v1986_v62, %v1610_v40  ;;  %v713_v40 = vld [vmem:[#allocation2 + $0x150] sm:$0xff] }
 0x23e   : > { %v2052_v60 = vsel %vm2039_vm10, %v2019_v56, %v1738_v23 }
 0x23f   : > { %5197 = vmatmul.msk.f32.gmra.mxu0 %vm2080_vm11, %v2052_v60 }
 0x241   : > { %1755 = vrot.lane.b32.xlu2 %v774_v22, %s6080_s30  ;;  %1245 = vrot.lane.b32.xlu0 %v741_v16, %s6078_s25 }
 0x242   : > { %1627 = vrot.lane.b32.xlu1 %v742_v58, %s6081_s12  ;;  %v1360_v24 = vpop.permute.xlu2 %1359 }
 0x243   : > { %v1612_v26 = vpop.permute.xlu0 %1611 }
 0x244   : > { %v1356_v36 = vpop.permute.xlu1 %1355  ;;  %v2207_v7 = vpop.f32.mrf.mxu0 }
 0x245   : > { %v2208_v43 = vadd.f32 %v7150_v14, %v2207_v7  ;;  %v1954_v18 = vsel %vm1940_vm7, %v1921_v2, %v1356_v36  ;;  %v9393_v36 = vld [vmem:[#allocation78_spill] sm:$0xff] }
 0x246   : > { %v1987_v23 = vsel %vm1973_vm8, %v1954_v18, %v1484_v4  ;;  %v1922_v4 = vsel %vm1907_vm5, %v1889_v45, %v1230_v12  ;;  %v9389_v12 = vld [vmem:[#allocation48_spill] sm:$0xff]  ;;  %v778_v45 = vld [vmem:[#allocation2 + $0x15a] sm:$0xff] }
 0x247   : > { %v2297_v37 = vmax.f32 %v2208_v43, 0.0  ;;  %v2020_v32 = vsel %vm2006_vm9, %v1987_v23, %v1612_v26  ;;  %v1824_v44 = vsel %vm417_vm0, %v5964_v39, %v9389_v12  ;;  %v9394_v43 = vld [vmem:[#allocation91_spill] sm:$0xff] }
 0x248   : > { %v1857_v11 = vsel %vm1841_vm4, %v1824_v44, %v9390_v27 }
 0x249   : > { %5220 = vmatmul.msk.f32.gmra.mxu1 %vm2331_vm12, %v2297_v37  ;;  %1501 = vrot.lane.b32.xlu2 %v711_v51, %s9362_s13  ;;  %v1890_v63 = vsel %vm1874_vm6, %v1857_v11, %v9391_v1  ;;  %v7326_v11 = vld [vmem:[#allocation2 + $0x169] sm:$0xff] }
 0x24a   : > { %1373 = vrot.lane.b32.xlu1 %v773_v52, %s9363_s16  ;;  %v1744_v53 = vpop.permute.xlu2 %1743  ;;  %1629 = vrot.lane.b32.xlu0 %v743_v35, %s6081_s12  ;;  %v712_v52 = vld [vmem:[#allocation2 + $0x140] sm:$0xff]  ;;  %v7333_v1 = vld [vmem:[#allocation2 + $0x16a] sm:$0xff] }
 0x24b   : > { %v1358_v59 = vpop.permute.xlu0 %1357 }
 0x24c   : > { %v1740_v48 = vpop.permute.xlu1 %1739  ;;  %v1955_v10 = vsel %vm1940_vm7, %v1922_v4, %v1358_v59  ;;  %v7289_v59 = vld [vmem:[#allocation2 + $0x159] sm:$0xff]  ;;  %v5966_v4 = vld [vmem:[#allocation2 + $0xc8] sm:$0xff] }
 0x24d   : > { %v2053_v38 = vsel %vm2039_vm10, %v2020_v32, %v1740_v48  ;;  %v714_v32 = vld [vmem:[#allocation2 + $0x158] sm:$0xff] }
 0x24e   : > { %5198 = vmatmul.msk.f32.gmra.mxu0 %vm2080_vm11, %v2053_v38 }
 0x251   : > { %1247 = vrot.lane.b32.xlu2 %v742_v58, %s6078_s25 }
 0x252   : > { %1757 = vrot.lane.b32.xlu1 %v775_v50, %s6080_s30  ;;  %v1490_v29 = vpop.permute.xlu2 %1489  ;;  %1375 = vrot.lane.b32.xlu0 %v774_v22, %s9363_s16 }
 0x253   : > { %v2210_v54 = vpop.f32.mrf.mxu0  ;;  %v1742_v41 = vpop.permute.xlu0 %1741 }
 0x254   : > { %v2211_v31 = vadd.f32 %v7150_v14, %v2210_v54  ;;  %v1486_v0 = vpop.permute.xlu1 %1485  ;;  %v9395_v54 = vld [vmem:[#allocation40_spill] sm:$0xff] }
 0x255   : > { %v1988_v49 = vsel %vm1973_vm8, %v1955_v10, %v1486_v0  ;;  %v9396_v10 = vld [vmem:[#allocation80_spill] sm:$0xff]  ;;  %v7310_v0 = vld [vmem:[%s6212_s14 + $0xf8] sm:$0xff] }
 0x256   : > { %v2298_v15 = vmax.f32 %v2211_v31, 0.0  ;;  %v2021_v16 = vsel %vm2006_vm9, %v1988_v49, %v1614_v34  ;;  %v9397_v49 = vld [vmem:[#allocation97_spill] sm:$0xff]  ;;  %495 = vst.msk [vmem:[#allocation2 + $0x189] sm:$0xff] %vm417_vm0, %v7310_v0 }
 0x257   : > { %v2054_v17 = vsel %vm2039_vm10, %v2021_v16, %v1742_v41 }
 0x258   : > { %5199 = vmatmul.msk.f32.gmra.mxu0 %vm2080_vm11, %v2054_v17  ;;  %5221 = vmatmul.msk.f32.gmra.mxu1 %vm2331_vm12, %v2298_v15 }
 0x259   : > { %1631 = vrot.lane.b32.xlu2 %v744_v55, %s6081_s12 }
 0x25a   : > { %1503 = vrot.lane.b32.xlu1 %v712_v52, %s9362_s13  ;;  %v7254_v33 = vpop.permute.xlu2 %1235  ;;  %1759 = vrot.lane.b32.xlu0 %v776_v25, %s6080_s30 }
 0x25b   : > { %v1488_v5 = vpop.permute.xlu0 %1487 }
 0x25c   : > { %v1232_v6 = vpop.permute.xlu1 %1231 }
 0x25d   : > { %v2213_v8 = vpop.f32.mrf.mxu0  ;;  %v1923_v19 = vsel %vm1907_vm5, %v1890_v63, %v1232_v6  ;;  %v715_v6 = vld [vmem:[#allocation2 + $0x168] sm:$0xff]  ;;  %v9398_v63 = vmov 0.0  }
 0x25e   : > { %v2214_v21 = vadd.f32 %v7150_v14, %v2213_v8  ;;  %v1956_v62 = vsel %vm1940_vm7, %v1923_v19, %v1360_v24  ;;  %v9392_v24 = vld [vmem:[#allocation50_spill] sm:$0xff]  ;;  %2574 = vst.msk [vmem:[#allocation3] sm:$0xff] %vm2573_vm13, %v9398_v63  ;;  %v9399_v19 = vld [vmem:[#allocation51_spill] sm:$0xff] }
 0x25f   : > { %v1989_v47 = vsel %vm1973_vm8, %v1956_v62, %v1488_v5  ;;  %v1825_v42 = vsel %vm417_vm0, %v5965_v61, %v9392_v24  ;;  %v5967_v8 = vld [vmem:[#allocation2 + $0xd8] sm:$0xff]  ;;  %2575 = vst.msk [vmem:[#allocation3 + $0x8] sm:$0xff] %vm2573_vm13, %v9398_v63  ;;  %v716_v61 = vld [vmem:[#allocation2 + $0x170] sm:$0xff] }
 0x260   : > { %v2299_v34 = vmax.f32 %v2214_v21, 0.0  ;;  %v1858_v7 = vsel %vm1841_vm4, %v1825_v42, %v9393_v36  ;;  %v1827_v21 = vsel %vm417_vm0, %v5967_v8, %v9399_v19  ;;  %2579 = vst.msk [vmem:[#allocation3 + $0x198] sm:$0xff] %vm2573_vm13, %v9398_v63 }
 0x261   : > { %1377 = vrot.lane.b32.xlu2 %v775_v50, %s9363_s16  ;;  %v1891_v18 = vsel %vm1874_vm6, %v1858_v7, %v9394_v43  ;;  %v7292_v50 = vld [vmem:[%s6212_s14 + $0xf0] sm:$0xff]  ;;  %2580 = vst.msk [vmem:[#allocation3 + $0x1a0] sm:$0xff] %vm2573_vm13, %v9398_v63  ;;  %s9444_s14 = smov 16  }
 0x262   : > { %1249 = vrot.lane.b32.xlu1 %v743_v35, %s6078_s25  ;;  %5222 = vmatmul.msk.f32.gmra.mxu1 %vm2331_vm12, %v2299_v34  ;;  %v1620_v56 = vpop.permute.xlu2 %1619  ;;  %494 = vst.msk [vmem:[#allocation2 + $0x181] sm:$0xff] %vm417_vm0, %v7292_v50  ;;  %v9400_v34 = vld [vmem:[#allocation70_spill] sm:$0xff] }
 0x263   : > { %1505 = vrot.lane.b32.xlu0 %v713_v40, %s9362_s13  ;;  %v1234_v58 = vpop.permute.xlu0 %1233  ;;  %v1860_v62 = vsel %vm1841_vm4, %v1827_v21, %v9400_v34  ;;  %2583 = vst.msk [vmem:[#allocation3] sm:$0x1] %vm2582_vm14, %v9398_v63 }
 0x264   : > { %v1616_v60 = vpop.permute.xlu1 %1615  ;;  %v1924_v37 = vsel %vm1907_vm5, %v1891_v18, %v1234_v58  ;;  %2584 = vst.msk [vmem:[#allocation3 + $0x18] sm:$0x1] %vm2582_vm14, %v9398_v63  ;;  %v7385_v18 = vld [vmem:[#allocation2 + $0x172] sm:$0xff] }
 0x265   : > { %v2022_v22 = vsel %vm2006_vm9, %v1989_v47, %v1616_v60  ;;  %2585 = vst.msk [vmem:[#allocation3 + $0x30] sm:$0x1] %vm2582_vm14, %v9398_v63 }
 0x266   : > { %v2055_v30 = vsel %vm2039_vm10, %v2022_v22, %v1744_v53  ;;  %2586 = vst.msk [vmem:[#allocation3 + $0x48] sm:$0x1] %vm2582_vm14, %v9398_v63 }
 0x267   : > { %5200 = vmatmul.msk.f32.gmra.mxu0 %vm2080_vm11, %v2055_v30  ;;  %2587 = vst.msk [vmem:[#allocation3 + $0x60] sm:$0x1] %vm2582_vm14, %v9398_v63 }
 0x268   : > { %2588 = vst.msk [vmem:[#allocation3 + $0x78] sm:$0x1] %vm2582_vm14, %v9398_v63 }
 0x269   : > { %1761 = vrot.lane.b32.xlu2 %v777_v3, %s6080_s30  ;;  %2589 = vst.msk [vmem:[#allocation3 + $0x90] sm:$0x1] %vm2582_vm14, %v9398_v63 }
 0x26a   : > { %1633 = vrot.lane.b32.xlu1 %v745_v28, %s6081_s12  ;;  %v7278_v2 = vpop.permute.xlu2 %1365  ;;  %2590 = vst.msk [vmem:[#allocation3 + $0xa8] sm:$0x1] %vm2582_vm14, %v9398_v63 }
 0x26b   : > { %1251 = vrot.lane.b32.xlu0 %v744_v55, %s6078_s25  ;;  %v1618_v53 = vpop.permute.xlu0 %1617  ;;  %2591 = vst.msk [vmem:[#allocation3 + $0xc0] sm:$0x1] %vm2582_vm14, %v9398_v63 }
 0x26c   : > { %v1362_v26 = vpop.permute.xlu1 %1361  ;;  %v2216_v51 = vpop.f32.mrf.mxu0  ;;  %2592 = vst.msk [vmem:[#allocation3 + $0xd8] sm:$0x1] %vm2582_vm14, %v9398_v63 }
 0x26d   : > { %v2217_v23 = vadd.f32 %v7150_v14, %v2216_v51  ;;  %v1957_v35 = vsel %vm1940_vm7, %v1924_v37, %v1362_v26  ;;  %v748_v26 = vld [vmem:[#allocation2 + $0x171] sm:$0xff]  ;;  %2593 = vst.msk [vmem:[#allocation3 + $0xf0] sm:$0x1] %vm2582_vm14, %v9398_v63  ;;  %v5968_v51 = vld [vmem:[#allocation2 + $0xe0] sm:$0xff] }
 0x26e   : > { %v1990_v38 = vsel %vm1973_vm8, %v1957_v35, %v1490_v29  ;;  %v1826_v29 = vsel %vm417_vm0, %v5966_v4, %v9395_v54  ;;  %2594 = vst.msk [vmem:[#allocation3 + $0x108] sm:$0x1] %vm2582_vm14, %v9398_v63  ;;  %v9402_v37 = vld [vmem:[#allocation53_spill] sm:$0xff] }
 0x26f   : > { %v2300_v48 = vmax.f32 %v2217_v23, 0.0  ;;  %v2023_v57 = vsel %vm2006_vm9, %v1990_v38, %v1618_v53  ;;  %v1859_v31 = vsel %vm1841_vm4, %v1826_v29, %v9396_v10  ;;  %v1828_v23 = vsel %vm417_vm0, %v5968_v51, %v9402_v37  ;;  %2595 = vst.msk [vmem:[#allocation3 + $0x120] sm:$0x1] %vm2582_vm14, %v9398_v63  ;;  %v9403_v35 = vld [vmem:[#allocation81_spill] sm:$0xff]  ;;  %v7433_v29 = vld [vmem:[#allocation2 + $0x181] sm:$0xff] }
 0x270   : > { %v1892_v15 = vsel %vm1874_vm6, %v1859_v31, %v9397_v49  ;;  %v1861_v53 = vsel %vm1841_vm4, %v1828_v23, %v9403_v35  ;;  %2596 = vst.msk [vmem:[#allocation3 + $0x138] sm:$0x1] %vm2582_vm14, %v9398_v63  ;;  %v7446_v31 = vld [vmem:[%s9197_s4] ss:$0 sm:$0xff] }
 0x271   : > { %5223 = vmatmul.msk.f32.gmra.mxu1 %vm2331_vm12, %v2300_v48  ;;  %1507 = vrot.lane.b32.xlu2 %v714_v32, %s9362_s13  ;;  %v1925_v41 = vsel %vm1907_vm5, %v1892_v15, %v7254_v33  ;;  %v9404_v48 = vld [vmem:[#allocation92_spill] sm:$0xff]  ;;  %2597 = vst.msk [vmem:[#allocation3 + $0x150] sm:$0x1] %vm2582_vm14, %v9398_v63 }
 0x272   : > { %1379 = vrot.lane.b32.xlu1 %v776_v25, %s9363_s16  ;;  %v7297_v13 = vpop.permute.xlu2 %1749  ;;  %v1894_v38 = vsel %vm1874_vm6, %v1861_v53, %v9404_v48  ;;  %2598 = vst.msk [vmem:[#allocation3 + $0x168] sm:$0x1] %vm2582_vm14, %v9398_v63 }
 0x273   : > { %1635 = vrot.lane.b32.xlu0 %v7289_v59, %s6081_s12  ;;  %v1364_v46 = vpop.permute.xlu0 %1363  ;;  %2599 = vst.msk [vmem:[#allocation3 + $0x180] sm:$0x1] %vm2582_vm14, %v9398_v63 }
 0x274   : > { %v1746_v20 = vpop.permute.xlu1 %1745  ;;  %v1958_v17 = vsel %vm1940_vm7, %v1925_v41, %v1364_v46  ;;  %2600 = vst.msk [vmem:[#allocation3 + $0x198] sm:$0x1] %vm2582_vm14, %v9398_v63 }
 0x275   : > { %v2056_v9 = vsel %vm2039_vm10, %v2023_v57, %v1746_v20  ;;  %2602 = vst.msk [vmem:[#allocation3 + $0x29] sm:$0x1] %vm2582_vm14, %v9398_v63 }
 0x276   : > { %5201 = vmatmul.msk.f32.gmra.mxu0 %vm2080_vm11, %v2056_v9  ;;  %2603 = vst.msk [vmem:[#allocation3 + $0x41] sm:$0x1] %vm2582_vm14, %v9398_v63 }
 0x277   : > { %2604 = vst.msk [vmem:[#allocation3 + $0x59] sm:$0x1] %vm2582_vm14, %v9398_v63 }
 0x278   : > { %2605 = vst.msk [vmem:[#allocation3 + $0x71] sm:$0x1] %vm2582_vm14, %v9398_v63 }
 0x279   : > { %1253 = vrot.lane.b32.xlu2 %v745_v28, %s6078_s25  ;;  %2606 = vst.msk [vmem:[#allocation3 + $0x89] sm:$0x1] %vm2582_vm14, %v9398_v63 }
 0x27a   : > { %1763 = vrot.lane.b32.xlu1 %v778_v45, %s6080_s30  ;;  %v7319_v55 = vpop.permute.xlu2 %1495  ;;  %2607 = vst.msk [vmem:[#allocation3 + $0xa1] sm:$0x1] %vm2582_vm14, %v9398_v63 }
 0x27b   : > { %v2219_v16 = vpop.f32.mrf.mxu0  ;;  %1381 = vrot.lane.b32.xlu0 %v777_v3, %s9363_s16  ;;  %v1748_v44 = vpop.permute.xlu0 %1747  ;;  %2608 = vst.msk [vmem:[#allocation3 + $0xb9] sm:$0x1] %vm2582_vm14, %v9398_v63 }
 0x27c   : > { %v2220_v52 = vadd.f32 %v7150_v14, %v2219_v16  ;;  %v1492_v25 = vpop.permute.xlu1 %1491  ;;  %2609 = vst.msk [vmem:[#allocation3 + $0xd1] sm:$0x1] %vm2582_vm14, %v9398_v63 }
 0x27d   : > { %v1991_v39 = vsel %vm1973_vm8, %v1958_v17, %v1492_v25  ;;  %v5969_v25 = vld [vmem:[#allocation2 + $0xf0] sm:$0xff]  ;;  %2610 = vst.msk [vmem:[#allocation3 + $0xe9] sm:$0x1] %vm2582_vm14, %v9398_v63 }
 0x27e   : > { %v2301_v12 = vmax.f32 %v2220_v52, 0.0  ;;  %v2024_v27 = vsel %vm2006_vm9, %v1991_v39, %v1620_v56  ;;  %v9401_v56 = vld [vmem:[#allocation99_spill] sm:$0xff]  ;;  %2611 = vst.msk [vmem:[#allocation3 + $0x101] sm:$0x1] %vm2582_vm14, %v9398_v63 }
 0x27f   : > { %v2057_v33 = vsel %vm2039_vm10, %v2024_v27, %v1748_v44  ;;  %v1893_v47 = vsel %vm1874_vm6, %v1860_v62, %v9401_v56  ;;  %v7462_v52 = vld [vmem:[#allocation2 + $0x182] sm:$0xff]  ;;  %2612 = vst.msk [vmem:[#allocation3 + $0x119] sm:$0x1] %vm2582_vm14, %v9398_v63 }
 0x280   : > { %5202 = vmatmul.msk.f32.gmra.mxu0 %vm2080_vm11, %v2057_v33  ;;  %5224 = vmatmul.msk.f32.gmra.mxu1 %vm2331_vm12, %v2301_v12  ;;  %v9405_v39 = vld [vmem:[#allocation43_spill] sm:$0xff]  ;;  %v9407_v33 = vld [vmem:[#allocation100_spill] sm:$0xff]  ;;  %2613 = vst.msk [vmem:[#allocation3 + $0x131] sm:$0x1] %vm2582_vm14, %v9398_v63 }
 0x281   : > { %1637 = vrot.lane.b32.xlu2 %v7326_v11, %s6081_s12  ;;  %v1829_v12 = vsel %vm417_vm0, %v5969_v25, %v9405_v39  ;;  %v9406_v44 = vld [vmem:[#allocation83_spill] sm:$0xff]  ;;  %2614 = vst.msk [vmem:[#allocation3 + $0x149] sm:$0x1] %vm2582_vm14, %v9398_v63 }
 0x282   : > { %1509 = vrot.lane.b32.xlu1 %v715_v6, %s9362_s13  ;;  %v7340_v5 = vpop.permute.xlu2 %1241  ;;  %v1862_v27 = vsel %vm1841_vm4, %v1829_v12, %v9406_v44  ;;  %2615 = vst.msk [vmem:[#allocation3 + $0x161] sm:$0x1] %vm2582_vm14, %v9398_v63 }
 0x283   : > { %1765 = vrot.lane.b32.xlu0 %v7333_v1, %s6080_s30  ;;  %v1494_v30 = vpop.permute.xlu0 %1493  ;;  %v1895_v6 = vsel %vm1874_vm6, %v1862_v27, %v9407_v33  ;;  %2577 = vst.msk [vmem:[#allocation3 + $0x10] sm:$0x3] %vm2576_vm15, %v9398_v63 }
 0x284   : > { %v1238_v40 = vpop.permute.xlu1 %1237  ;;  %2601 = vst.msk [vmem:[#allocation3 + $0x11] sm:$0x1] %vm2582_vm14, %v9398_v63 }
 0x285   : > { %v2222_v60 = vpop.f32.mrf.mxu0  ;;  %v1926_v22 = vsel %vm1907_vm5, %v1893_v47, %v1238_v40  ;;  %2581 = vst.msk [vmem:[#allocation3 + $0x1a8] sm:$0x3] %vm2576_vm15, %v9398_v63 }
 0x286   : > { %v2223_v58 = vadd.f32 %v7150_v14, %v2222_v60  ;;  %v1959_v28 = vsel %vm1940_vm7, %v1926_v22, %v7278_v2  ;;  %v7497_v60 = vld [vmem:[#allocation2 + $0x189] sm:$0xff]  ;;  %2616 = vst.msk [vmem:[#allocation3 + $0x179] sm:$0x1] %vm2582_vm14, %v9398_v63 }
 0x287   : > { %v1992_v42 = vsel %vm1973_vm8, %v1959_v28, %v1494_v30  ;;  %v782_v30 = vld [vmem:[#allocation2 + $0x18a] sm:$0xff]  ;;  %v9408_v28 = vld [vmem:[#allocation54_spill] sm:$0xff]  ;;  %2617 = vst.msk [vmem:[#allocation3 + $0x191] sm:$0x1] %vm2582_vm14, %v9398_v63 }
 0x288   : > { %v2302_v3 = vmax.f32 %v2223_v58, 0.0  ;;  %v7502_v58 = vld [vmem:[#allocation2 + $0x188] sm:$0xff]  ;;  %2618 = vst.msk [vmem:[#allocation3 + $0x1a9] sm:$0x1] %vm2582_vm14, %v9398_v63 }
 0x289   : > { %1383 = vrot.lane.b32.xlu2 %v778_v45, %s9363_s16  ;;  %v7420_v45 = vld [vmem:[#allocation2 + $0x180] sm:$0xff] }
 0x28a   : > { %1255 = vrot.lane.b32.xlu1 %v7289_v59, %s6078_s25  ;;  %5225 = vmatmul.msk.f32.gmra.mxu1 %vm2331_vm12, %v2302_v3  ;;  %v5970_v3 = vld [vmem:[#allocation2 + $0xf8] sm:$0xff] }
 0x28b   : > { %v7372_v24 = vpop.permute.xlu2 %1625  ;;  %1511 = vrot.lane.b32.xlu0 %v716_v61, %s9362_s13  ;;  %v1240_v2 = vpop.permute.xlu0 %1239  ;;  %v1830_v61 = vsel %vm417_vm0, %v5970_v3, %v9408_v28  ;;  %v784_v28 = vld [vmem:[#allocation2 + $0x1a2] sm:$0xff] }
 0x28c   : > { %v1622_v36 = vpop.permute.xlu1 %1621  ;;  %v1927_v57 = vsel %vm1907_vm5, %v1894_v38, %v1240_v2  ;;  %v9410_v2 = vld [vmem:[#allocation101_spill] sm:$0xff] }
 0x28d   : > { %v2025_v7 = vsel %vm2006_vm9, %v1992_v42, %v1622_v36  ;;  %v9409_v42 = vld [vmem:[#allocation73_spill] sm:$0xff] }
 0x28e   : > { %v2058_v43 = vsel %vm2039_vm10, %v2025_v7, %v7297_v13  ;;  %v1863_v36 = vsel %vm1841_vm4, %v1830_v61, %v9409_v42  ;;  %v9417_v61 = vld [vmem:[#allocation102_spill] sm:$0xff] }
 0x28f   : > { %5203 = vmatmul.msk.f32.gmra.mxu0 %vm2080_vm11, %v2058_v43  ;;  %v1896_v43 = vsel %vm1874_vm6, %v1863_v36, %v9410_v2  ;;  %v2716_v36 = vld [vmem:[#allocation3 + $0x2] sm:$0xff] }
 0x291   : > { %1767 = vrot.lane.b32.xlu2 %v7385_v18, %s6080_s30 }
 0x292   : > { %1639 = vrot.lane.b32.xlu1 %v748_v26, %s6081_s12 }
 0x293   : > { %v7405_v32 = vpop.permute.xlu2 %1371  ;;  %1257 = vrot.lane.b32.xlu0 %v7326_v11, %s6078_s25  ;;  %v1624_v46 = vpop.permute.xlu0 %1623 }
 0x294   : > { %v1368_v59 = vpop.permute.xlu1 %1367  ;;  %v2225_v13 = vpop.f32.mrf.mxu0 }
 0x295   : > { %v2226_v20 = vadd.f32 %v7150_v14, %v2225_v13  ;;  %v1960_v9 = vsel %vm1940_vm7, %v1927_v57, %v1368_v59 }
 0x296   : > { %v1993_v54 = vsel %vm1973_vm8, %v1960_v9, %v7319_v55  ;;  %v751_v9 = vld [vmem:[#allocation2 + $0x199] sm:$0xff] }
 0x297   : > { %v2303_v4 = vmax.f32 %v2226_v20, 0.0  ;;  %v2026_v49 = vsel %vm2006_vm9, %v1993_v54, %v1624_v46  ;;  %v783_v54 = vld [vmem:[#allocation2 + $0x19a] sm:$0xff] }
 0x299   : > { %5226 = vmatmul.msk.f32.gmra.mxu1 %vm2331_vm12, %v2303_v4  ;;  %1513 = vrot.lane.b32.xlu2 %v7420_v45, %s9362_s13 }
 0x29a   : > { %1385 = vrot.lane.b32.xlu1 %v7333_v1, %s9363_s16  ;;  %v1928_v1 = vsel %vm1907_vm5, %v1895_v6, %v7340_v5 }
 0x29b   : > { %v7441_v10 = vpop.permute.xlu2 %1755  ;;  %1641 = vrot.lane.b32.xlu0 %v7433_v29, %s6081_s12  ;;  %v1370_v16 = vpop.permute.xlu0 %1369 }
 0x29c   : > { %v1752_v15 = vpop.permute.xlu1 %1751  ;;  %v1961_v21 = vsel %vm1940_vm7, %v1928_v1, %v1370_v16  ;;  %v9413_v16 = vld [vmem:[#allocation84_spill] sm:$0xff] }
 0x29d   : > { %v2059_v41 = vsel %vm2039_vm10, %v2026_v49, %v1752_v15  ;;  %v9412_v49 = vld [vmem:[#allocation55_spill] sm:$0xff] }
 0x29e   : > { %5204 = vmatmul.msk.f32.gmra.mxu0 %vm2080_vm11, %v2059_v41  ;;  %v2445_v55 = vpop.f32.mrf.mxu1 }
 0x29f   : > { %v2446_v17 = vadd.f32 %v7446_v31, %v2445_v55 }
 0x2a1   : > { %v2541_v11 = vmax.f32 %v2446_v17, 0.0  ;;  %1259 = vrot.lane.b32.xlu2 %v748_v26, %s6078_s25  ;;  %v9414_v17 = vld [vmem:[#allocation93_spill] sm:$0xff] }
 0x2a2   : > { %1769 = vrot.lane.b32.xlu1 %v7462_v52, %s6080_s30 }
 0x2a3   : > { %2620 = vst.msk [vmem:[#allocation3 + $0x19] sm:$0xff] %vm2573_vm13, %v2541_v11  ;;  %v2228_v8 = vpop.f32.mrf.mxu0  ;;  %v7484_v19 = vpop.permute.xlu2 %1501  ;;  %1387 = vrot.lane.b32.xlu0 %v7385_v18, %s9363_s16 }
 0x2a4   : > { %v2229_v34 = vadd.f32 %v7150_v14, %v2228_v8  ;;  %v1498_v62 = vpop.permute.xlu1 %1497  ;;  %v1754_v56 = vpop.permute.xlu0 %1753 }
 0x2a5   : > { %v1994_v40 = vsel %vm1973_vm8, %v1961_v21, %v1498_v62 }
 0x2a6   : > { %v2304_v5 = vmax.f32 %v2229_v34, 0.0  ;;  %v2027_v47 = vsel %vm2006_vm9, %v1994_v40, %v7372_v24  ;;  %v752_v40 = vld [vmem:[#allocation2 + $0x1a1] sm:$0xff] }
 0x2a7   : > { %v2060_v22 = vsel %vm2039_vm10, %v2027_v47, %v1754_v56  ;;  %v720_v56 = vld [vmem:[#allocation2 + $0x1a0] sm:$0xff]  ;;  %v5972_v47 = vld [vmem:[#allocation2 + $0x110] sm:$0xff] }
 0x2a8   : > { %5205 = vmatmul.msk.f32.gmra.mxu0 %vm2080_vm11, %v2060_v22  ;;  %5227 = vmatmul.msk.f32.gmra.mxu1 %vm2331_vm12, %v2304_v5 }
 0x2a9   : > { %1643 = vrot.lane.b32.xlu2 %v7497_v60, %s6081_s12 }
 0x2aa   : > { %1515 = vrot.lane.b32.xlu1 %v7502_v58, %s9362_s13 }
 0x2ab   : > { %v7518_v24 = vpop.permute.xlu2 %1247  ;;  %1771 = vrot.lane.b32.xlu0 %v782_v30, %s6080_s30 }
 0x2ac   : > { %v1244_v7 = vpop.permute.xlu1 %1243  ;;  %v1500_v35 = vpop.permute.xlu0 %1499 }
 0x2ad   : > { %v2231_v18 = vpop.f32.mrf.mxu0  ;;  %v2448_v26 = vpop.f32.mrf.mxu1  ;;  %v1929_v51 = vsel %vm1907_vm5, %v1896_v43, %v1244_v7  ;;  %v2717_v7 = vld [vmem:[#allocation3 + $0xa] sm:$0xff] }
 0x2ae   : > { %v2232_v37 = vadd.f32 %v7150_v14, %v2231_v18  ;;  %v2449_v23 = vadd.f32 %v7446_v31, %v2448_v26  ;;  %v1962_v38 = vsel %vm1940_vm7, %v1929_v51, %v7405_v32  ;;  %v2684_v18 = vld [vmem:[#allocation3 + $0x1] sm:$0xff]  ;;  %v2685_v26 = vld [vmem:[#allocation3 + $0x9] sm:$0xff] }
 0x2af   : > { %v1995_v59 = vsel %vm1973_vm8, %v1962_v38, %v1500_v35 }
 0x2b0   : > { %v2305_v53 = vmax.f32 %v2232_v37, 0.0  ;;  %v2542_v48 = vmax.f32 %v2449_v23, 0.0 }
 0x2b1   : > { %1261 = vrot.lane.b32.xlu2 %v7433_v29, %s6078_s25  ;;  %v5971_v29 = vld [vmem:[#allocation2 + $0x108] sm:$0xff] }
 0x2b2   : > { %2621 = vst.msk [vmem:[#allocation3 + $0x21] sm:$0xff] %vm2573_vm13, %v2542_v48  ;;  %1133 = vrot.lane.b32.xlu1 %v7420_v45, %s9411_s29  ;;  %5228 = vmatmul.msk.f32.gmra.mxu1 %vm2331_vm12, %v2305_v53  ;;  %v719_v45 = vld [vmem:[#allocation2 + $0x198] sm:$0xff]  ;;  %v1831_v15 = vsel %vm417_vm0, %v5971_v29, %v9412_v49  ;;  %v5419_v53 = vpack.i.bf16 %v2717_v7, %v2716_v36 }
 0x2b3   : > { %v7540_v63 = vpop.permute.xlu2 %1631  ;;  %1389 = vrot.lane.b32.xlu0 %v7462_v52, %s9363_s16 }
 0x2b4   : > { %v1628_v13 = vpop.permute.xlu1 %1627  ;;  %v1246_v57 = vpop.permute.xlu0 %1245 }
 0x2b5   : > { %v2028_v32 = vsel %vm2006_vm9, %v1995_v59, %v1628_v13  ;;  %v5414_v59 = vpack.i.bf16 %v2685_v26, %v2684_v18  ;;  %v9423_v18 = vld [vmem:[#allocation95_spill] sm:$0xff] }
 0x2b6   : > { %v2061_v20 = vsel %vm2039_vm10, %v2028_v32, %v7441_v10  ;;  %v1864_v10 = vsel %vm1841_vm4, %v1831_v15, %v9413_v16 }
 0x2b7   : > { %5206 = vmatmul.msk.f32.gmra.mxu0 %vm2080_vm11, %v2061_v20  ;;  %v2451_v46 = vpop.f32.mrf.mxu1  ;;  %v1897_v52 = vsel %vm1874_vm6, %v1864_v10, %v9414_v17  ;;  %v2748_v20 = vld [vmem:[#allocation3 + $0x18] sm:$0xff] }
 0x2b8   : > { %v2452_v4 = vadd.f32 %v7446_v31, %v2451_v46  ;;  %v1930_v12 = vsel %vm1907_vm5, %v1897_v52, %v1246_v57  ;;  %v5973_v46 = vld [vmem:[#allocation2 + $0x120] sm:$0xff] }
 0x2b9   : > { %1645 = vrot.lane.b32.xlu2 %v751_v9, %s6081_s12  ;;  %v2749_v57 = vld [vmem:[#allocation3 + $0x20] sm:$0xff] }
 0x2ba   : > { %v2543_v41 = vmax.f32 %v2452_v4, 0.0  ;;  %1517 = vrot.lane.b32.xlu1 %v719_v45, %s9362_s13  ;;  %v5424_v9 = vpack.i.bf16 %v2749_v57, %v2748_v20  ;;  %v9419_v4 = vld [vmem:[#allocation76_spill] sm:$0xff]  ;;  %v2813_v15 = vld [vmem:[#allocation3 + $0x22] sm:$0xff] }
 0x2bb   : > { %v7556_v55 = vpop.permute.xlu2 %1377  ;;  %1773 = vrot.lane.b32.xlu0 %v783_v54, %s6080_s30  ;;  %v2812_v49 = vld [vmem:[#allocation3 + $0x1a] sm:$0xff] }
 0x2bc   : > { %2622 = vst.msk [vmem:[#allocation3 + $0x31] sm:$0xff] %vm2573_vm13, %v2543_v41  ;;  %v1374_v25 = vpop.permute.xlu1 %1373  ;;  %v2234_v39 = vpop.f32.mrf.mxu0  ;;  %v9420_v41 = vld [vmem:[#allocation103_spill] sm:$0xff]  ;;  %v2781_v52 = vld [vmem:[#allocation3 + $0x21] sm:$0xff] }
 0x2bd   : > { %v2235_v44 = vadd.f32 %v7150_v14, %v2234_v39  ;;  %v1963_v27 = vsel %vm1940_vm7, %v1930_v12, %v1374_v25  ;;  %v1630_v11 = vpop.permute.xlu0 %1629 }
 0x2be   : > { %v1996_v6 = vsel %vm1973_vm8, %v1963_v27, %v7484_v19  ;;  %v5434_v27 = vpack.i.bf16 %v2813_v15, %v2812_v49 }
 0x2bf   : > { %v2306_v33 = vmax.f32 %v2235_v44, 0.0  ;;  %v2029_v1 = vsel %vm2006_vm9, %v1996_v6, %v1630_v11  ;;  %v2780_v11 = vld [vmem:[#allocation3 + $0x19] sm:$0xff] }
 0x2c1   : > { %5229 = vmatmul.msk.f32.gmra.mxu1 %vm2331_vm12, %v2306_v33  ;;  %1263 = vrot.lane.b32.xlu2 %v7497_v60, %s6078_s25  ;;  %v9415_v60 = vld [vmem:[#allocation46_spill] sm:$0xff]  ;;  %s9252_s25 = smov 32  }
 0x2c2   : > { %1135 = vrot.lane.b32.xlu1 %v7502_v58, %s9411_s29  ;;  %v1832_v22 = vsel %vm417_vm0, %v5972_v47, %v9415_v60  ;;  %v9416_v58 = vld [vmem:[#allocation85_spill] sm:$0xff]  ;;  %s9445_s29 = smov 96  }
 0x2c3   : > { %1391 = vrot.lane.b32.xlu0 %v782_v30, %s9363_s16  ;;  %v7574_v21 = vpop.permute.xlu2 %1761  ;;  %v1865_v30 = vsel %vm1841_vm4, %v1832_v22, %v9416_v58  ;;  %s9256_s16 = smov 64  }
 0x2c4   : > { %v1758_v8 = vpop.permute.xlu1 %1757  ;;  %v1898_v42 = vsel %vm1874_vm6, %v1865_v30, %v9417_v61  ;;  %v2877_v30 = vld [vmem:[#allocation3 + $0x31] sm:$0xff] }
 0x2c5   : > { %v2062_v34 = vsel %vm2039_vm10, %v2029_v1, %v1758_v8  ;;  %v1376_v62 = vpop.permute.xlu0 %1375  ;;  %v1931_v2 = vsel %vm1907_vm5, %v1898_v42, %v7518_v24  ;;  %v5429_v8 = vpack.i.bf16 %v2781_v52, %v2780_v11  ;;  %v5974_v61 = vld [vmem:[#allocation2 + $0x128] sm:$0xff]  ;;  %v9421_v42 = vld [vmem:[#allocation57_spill] sm:$0xff]  ;;  %v9425_v52 = vld [vmem:[#allocation87_spill] sm:$0xff] }
 0x2c6   : > { %5207 = vmatmul.msk.f32.gmra.mxu0 %vm2080_vm11, %v2062_v34  ;;  %v2454_v19 = vpop.f32.mrf.mxu1  ;;  %v1964_v51 = vsel %vm1940_vm7, %v1931_v2, %v1376_v62  ;;  %v1834_v36 = vsel %vm417_vm0, %v5974_v61, %v9421_v42  ;;  %v9422_v2 = vld [vmem:[#allocation86_spill] sm:$0xff] }
 0x2c7   : > { %v2455_v5 = vadd.f32 %v7446_v31, %v2454_v19  ;;  %v2845_v19 = vld [vmem:[#allocation3 + $0x30] sm:$0xff] }
 0x2c9   : > { %v2544_v3 = vmax.f32 %v2455_v5, 0.0  ;;  %1647 = vrot.lane.b32.xlu2 %v752_v40, %s6081_s12  ;;  %s9254_s12 = smov 48  }
 0x2ca   : > { %1519 = vrot.lane.b32.xlu1 %v720_v56, %s9362_s13  ;;  %s9250_s13 = smov 80  }
 0x2cb   : > { %2623 = vst.msk [vmem:[#allocation3 + $0x39] sm:$0xff] %vm2573_vm13, %v2544_v3  ;;  %v2237_v43 = vpop.f32.mrf.mxu0  ;;  %1775 = vrot.lane.b32.xlu0 %v784_v28, %s6080_s30  ;;  %v7596_v13 = vpop.permute.xlu2 %1507  ;;  %s9260_s30 = smov 16  }
 0x2cc   : > { %v2238_v37 = vadd.f32 %v7150_v14, %v2237_v43  ;;  %v1504_v23 = vpop.permute.xlu1 %1503 }
 0x2cd   : > { %v1997_v35 = vsel %vm1973_vm8, %v1964_v51, %v1504_v23  ;;  %v1760_v38 = vpop.permute.xlu0 %1759 }
 0x2ce   : > { %v2307_v48 = vmax.f32 %v2238_v37, 0.0  ;;  %v2030_v24 = vsel %vm2006_vm9, %v1997_v35, %v7540_v63  ;;  %v9418_v63 = vld [vmem:[#allocation56_spill] sm:$0xff] }
 0x2cf   : > { %v2063_v32 = vsel %vm2039_vm10, %v2030_v24, %v1760_v38  ;;  %v1833_v45 = vsel %vm417_vm0, %v5973_v46, %v9418_v63 }
 0x2d0   : > { %5208 = vmatmul.msk.f32.gmra.mxu0 %vm2080_vm11, %v2063_v32  ;;  %5230 = vmatmul.msk.f32.gmra.mxu1 %vm2331_vm12, %v2307_v48  ;;  %v1866_v54 = vsel %vm1841_vm4, %v1833_v45, %v9419_v4 }
 0x2d1   : > { %5420 = vrot.lane.b32.xlu2 %v5419_v53, %s9252_s25  ;;  %v1899_v16 = vsel %vm1874_vm6, %v1866_v54, %v9420_v41  ;;  %v5975_v41 = vld [vmem:[#allocation2 + $0x138] sm:$0xff] }
 0x2d2   : > { %5415 = vrot.lane.b32.xlu1 %v5414_v59, %s9260_s30  ;;  %v2846_v33 = vld [vmem:[#allocation3 + $0x38] sm:$0xff] }
 0x2d3   : > { %5425 = vrot.lane.b32.xlu0 %v5424_v9, %s9254_s12  ;;  %v7613_v34 = vpop.permute.xlu2 %1253  ;;  %v5439_v40 = vpack.i.bf16 %v2846_v33, %v2845_v19  ;;  %v2878_v47 = vld [vmem:[#allocation3 + $0x39] sm:$0xff] }
 0x2d4   : > { %v1250_v29 = vpop.permute.xlu1 %1249  ;;  %v5444_v28 = vpack.i.bf16 %v2878_v47, %v2877_v30  ;;  %v7641_v24 = vld [vmem:[#allocation3 + $0x32] sm:$0xff]  ;;  %v7643_v59 = vld [vmem:[#allocation3 + $0x3a] sm:$0xff]  ;;  %v9427_v47 = vld [vmem:[#allocation58_spill] sm:$0xff] }
 0x2d5   : > { %v2240_v10 = vpop.f32.mrf.mxu0  ;;  %v2457_v17 = vpop.f32.mrf.mxu1  ;;  %v1932_v25 = vsel %vm1907_vm5, %v1899_v16, %v1250_v29  ;;  %v9424_v16 = vld [vmem:[#allocation49_spill] sm:$0xff] }
 0x2d6   : > { %v2241_v39 = vadd.f32 %v7150_v14, %v2240_v10  ;;  %v2458_v12 = vadd.f32 %v7446_v31, %v2457_v17  ;;  %v1506_v44 = vpop.permute.xlu0 %1505  ;;  %v1965_v62 = vsel %vm1940_vm7, %v1932_v25, %v7556_v55  ;;  %v1835_v10 = vsel %vm417_vm0, %v5975_v41, %v9424_v16  ;;  %v9431_v16 = vld [vmem:[#allocation88_spill] sm:$0xff] }
 0x2d7   : > { %v1998_v5 = vsel %vm1973_vm8, %v1965_v62, %v1506_v44  ;;  %v1868_v25 = vsel %vm1841_vm4, %v1835_v10, %v9425_v52  ;;  %v9432_v52 = vld [vmem:[#allocation98_spill] sm:$0xff] }
 0x2d8   : > { %v2308_v6 = vmax.f32 %v2241_v39, 0.0  ;;  %v2545_v1 = vmax.f32 %v2458_v12, 0.0  ;;  %v9426_v12 = vld [vmem:[#allocation104_spill] sm:$0xff] }
 0x2d9   : > { %5435 = vrot.lane.b32.xlu2 %v5434_v27, %s9250_s13  ;;  %v1901_v44 = vsel %vm1874_vm6, %v1868_v25, %v9426_v12 }
 0x2da   : > { %2624 = vst.msk [vmem:[#allocation3 + $0x49] sm:$0xff] %vm2573_vm13, %v2545_v1  ;;  %5430 = vrot.lane.b32.xlu1 %v5429_v8, %s9256_s16  ;;  %5231 = vmatmul.msk.f32.gmra.mxu1 %vm2331_vm12, %v2308_v6  ;;  %v7675_v6 = vld [vmem:[%s9195_s2] ss:$0 sm:$0xff] }
 0x2db   : > { %5440 = vrot.lane.b32.xlu0 %v5439_v40, %s9258_s15  ;;  %v1638_v43 = vpop.permute.xlu2 %1637 }
 0x2dc   : > { %v1634_v56 = vpop.permute.xlu1 %1633 }
 0x2dd   : > { %v2031_v55 = vsel %vm2006_vm9, %v1998_v5, %v1634_v56 }
 0x2de   : > { %v1252_v60 = vpop.permute.xlu0 %1251  ;;  %v2064_v22 = vsel %vm2039_vm10, %v2031_v55, %v7574_v21  ;;  %v1867_v21 = vsel %vm1841_vm4, %v1834_v36, %v9422_v2  ;;  %v5977_v55 = vld [vmem:[#allocation2 + $0x140] sm:$0xff] }
 0x2df   : > { %5209 = vmatmul.msk.f32.gmra.mxu0 %vm2080_vm11, %v2064_v22  ;;  %v2460_v58 = vpop.f32.mrf.mxu1  ;;  %v1900_v26 = vsel %vm1874_vm6, %v1867_v21, %v9423_v18  ;;  %v9428_v22 = vld [vmem:[#allocation79_spill] sm:$0xff] }
 0x2e0   : > { %v2461_v3 = vadd.f32 %v7446_v31, %v2460_v58  ;;  %v1933_v23 = vsel %vm1907_vm5, %v1900_v26, %v1252_v60  ;;  %v1836_v60 = vsel %vm417_vm0, %v5977_v55, %v9427_v47 }
 0x2e1   : > { %5450 = vrot.lane.b32.xlu2 %v5429_v8, %s9260_s30  ;;  %v2879_v54 = vld [vmem:[#allocation3 + $0x49] sm:$0xff]  ;;  %v1869_v58 = vsel %vm1841_vm4, %v1836_v60, %v9428_v22  ;;  %v9433_v22 = vld [vmem:[#allocation52_spill] sm:$0xff] }
 0x2e2   : > { %v2546_v7 = vmax.f32 %v2461_v3, 0.0  ;;  %5445 = vrot.lane.b32.xlu1 %v5444_v28, %s9248_s22  ;;  %v2847_v15 = vld [vmem:[#allocation3 + $0x48] sm:$0xff]  ;;  %v9429_v3 = vld [vmem:[#allocation105_spill] sm:$0xff] }
 0x2e3   : > { %5455 = vrot.lane.b32.xlu0 %v5434_v27, %s9252_s25  ;;  %v1384_v46 = vpop.permute.xlu2 %1383  ;;  %v1934_v27 = vsel %vm1907_vm5, %v1901_v44, %v7613_v34  ;;  %v5979_v60 = vld [vmem:[#allocation2 + $0x158] sm:$0xff] }
 0x2e4   : > { %2625 = vst.msk [vmem:[#allocation3 + $0x51] sm:$0xff] %vm2573_vm13, %v2546_v7  ;;  %v1380_v51 = vpop.permute.xlu1 %1379  ;;  %v2243_v37 = vpop.f32.mrf.mxu0 }
 0x2e5   : > { %v2244_v35 = vadd.f32 %v7150_v14, %v2243_v37  ;;  %v1966_v53 = vsel %vm1940_vm7, %v1933_v23, %v1380_v51  ;;  %v5469_v14 = vpack.i.bf16 %v7643_v59, %v7641_v24 }
 0x2e6   : > { %v1636_v48 = vpop.permute.xlu0 %1635  ;;  %v1999_v32 = vsel %vm1973_vm8, %v1966_v53, %v7596_v13 }
 0x2e7   : > { %v2309_v38 = vmax.f32 %v2244_v35, 0.0  ;;  %v2032_v57 = vsel %vm2006_vm9, %v1999_v32, %v1636_v48 }
 0x2e9   : > { %5232 = vmatmul.msk.f32.gmra.mxu1 %vm2331_vm12, %v2309_v38  ;;  %5465 = vrot.lane.b32.xlu2 %v5444_v28, %s9256_s16 }
 0x2ea   : > { %5460 = vrot.lane.b32.xlu1 %v5439_v40, %s9254_s12 }
 0x2eb   : > { %5470 = vrot.lane.b32.xlu0 %v5469_v14, %s9250_s13  ;;  %v2880_v9 = vld [vmem:[#allocation3 + $0x51] sm:$0xff]  ;;  %v1768_v5 = vpop.permute.xlu2 %1767 }
 0x2ec   : > { %v1764_v20 = vpop.permute.xlu1 %1763  ;;  %v2848_v45 = vld [vmem:[#allocation3 + $0x50] sm:$0xff]  ;;  %v7657_v49 = vpack.i.bf16 %v2880_v9, %v2879_v54 }
 0x2ed   : > { %v2065_v63 = vsel %vm2039_vm10, %v2032_v57, %v1764_v20  ;;  %v5474_v17 = vpack.i.bf16 %v2848_v45, %v2847_v15  ;;  %v7694_v36 = vld [vmem:[#allocation3 + $0x4a] sm:$0xff]  ;;  %v7696_v7 = vld [vmem:[#allocation3 + $0x52] sm:$0xff] }
 0x2ee   : > { %v1382_v13 = vpop.permute.xlu0 %1381  ;;  %5210 = vmatmul.msk.f32.gmra.mxu0 %vm2080_vm11, %v2065_v63  ;;  %v2463_v4 = vpop.f32.mrf.mxu1  ;;  %v5504_v37 = vpack.i.bf16 %v7696_v7, %v7694_v36 }
 0x2ef   : > { %v2464_v29 = vadd.f32 %v7446_v31, %v2463_v4  ;;  %v1967_v33 = vsel %vm1940_vm7, %v1934_v27, %v1382_v13  ;;  %v5978_v13 = vld [vmem:[#allocation2 + $0x150] sm:$0xff]  ;;  %v9430_v4 = vld [vmem:[#allocation60_spill] sm:$0xff] }
 0x2f0   : > { %v1837_v54 = vsel %vm417_vm0, %v5978_v13, %v9430_v4 }
 0x2f1   : > { %v2547_v39 = vmax.f32 %v2464_v29, 0.0  ;;  %5480 = vrot.lane.b32.xlu2 %v7657_v49, %s9248_s22  ;;  %v1870_v10 = vsel %vm1841_vm4, %v1837_v54, %v9431_v16  ;;  %v9437_v54 = vld [vmem:[#allocation82_spill] sm:$0xff] }
 0x2f2   : > { %5475 = vrot.lane.b32.xlu1 %v5474_v17, %s9258_s15  ;;  %v1903_v25 = vsel %vm1874_vm6, %v1870_v10, %v9432_v52  ;;  %v7770_v10 = vld [vmem:[%s9198_s5 + $0x88] sm:$0xff] }
 0x2f3   : > { %2626 = vst.msk [vmem:[#allocation3 + $0x61] sm:$0xff] %vm2573_vm13, %v2547_v39  ;;  %v2246_v11 = vpop.f32.mrf.mxu0  ;;  %5485 = vrot.lane.b32.xlu0 %v5444_v28, %s9260_s30  ;;  %v1902_v28 = vsel %vm1874_vm6, %v1869_v58, %v9429_v3  ;;  %v1514_v23 = vpop.permute.xlu2 %1513  ;;  %v1838_v58 = vsel %vm417_vm0, %v5979_v60, %v9433_v22  ;;  %4312 = vmatpush.msrb.mxu0 %v7770_v10 }
 0x2f4   : > { %v2247_v1 = vadd.f32 %v7675_v6, %v2246_v11  ;;  %v1510_v8 = vpop.permute.xlu1 %1509  ;;  %5354 = vmatpush.msra.mxu3 %v7770_v10 }
 0x2f5   : > { %v2000_v62 = vsel %vm1973_vm8, %v1967_v33, %v1510_v8 }
 0x2f6   : > { %v2310_v19 = vmax.f32 %v2247_v1, 0.0  ;;  %v1766_v40 = vpop.permute.xlu0 %1765  ;;  %v2033_v34 = vsel %vm2006_vm9, %v2000_v62, %v1638_v43 }
 0x2f7   : > { %v2066_v56 = vsel %vm2039_vm10, %v2033_v34, %v1766_v40 }
 0x2f8   : > { %5211 = vmatmul.msk.f32.gmra.mxu0 %vm2080_vm11, %v2066_v56  ;;  %5233 = vmatmul.msk.f32.gmra.mxu1 %vm2331_vm12, %v2310_v19 }
 0x2f9   : > { %5495 = vrot.lane.b32.xlu2 %v5474_v17, %s9254_s12 }
 0x2fa   : > { %5490 = vrot.lane.b32.xlu1 %v5469_v14, %s9252_s25  ;;  %v2849_v9 = vld [vmem:[#allocation3 + $0x60] sm:$0xff] }
 0x2fb   : > { %5500 = vrot.lane.b32.xlu0 %v7657_v49, %s9256_s16  ;;  %v2881_v63 = vld [vmem:[#allocation3 + $0x61] sm:$0xff]  ;;  %v1260_v17 = vpop.permute.xlu2 %1259 }
 0x2fc   : > { %v1256_v30 = vpop.permute.xlu1 %1255 }
 0x2fd   : > { %v2249_v61 = vpop.f32.mrf.mxu0  ;;  %v2466_v42 = vpop.f32.mrf.mxu1  ;;  %v1935_v2 = vsel %vm1907_vm5, %v1902_v28, %v1256_v30  ;;  %v9434_v30 = vld [vmem:[#allocation89_spill] sm:$0xff] }
 0x2fe   : > { %v2250_v21 = vadd.f32 %v7675_v6, %v2249_v61  ;;  %v2467_v43 = vadd.f32 %v7446_v31, %v2466_v42  ;;  %v1512_v18 = vpop.permute.xlu0 %1511  ;;  %v1968_v35 = vsel %vm1940_vm7, %v1935_v2, %v1384_v46  ;;  %v1871_v3 = vsel %vm1841_vm4, %v1838_v58, %v9434_v30  ;;  %v9435_v61 = vld [vmem:[#allocation106_spill] sm:$0xff]  ;;  %v5981_v30 = vld [vmem:[#allocation2 + $0x170] sm:$0xff] }
 0x2ff   : > { %v2001_v53 = vsel %vm1973_vm8, %v1968_v35, %v1512_v18  ;;  %v1904_v42 = vsel %vm1874_vm6, %v1871_v3, %v9435_v61  ;;  %v9438_v3 = vld [vmem:[#allocation63_spill] sm:$0xff] }
 0x300   : > { %v2311_v26 = vmax.f32 %v2250_v21, 0.0  ;;  %v2548_v51 = vmax.f32 %v2467_v43, 0.0  ;;  %v1937_v21 = vsel %vm1907_vm5, %v1904_v42, %v1260_v17 }
 0x302   : > { %2627 = vst.msk [vmem:[#allocation3 + $0x69] sm:$0xff] %vm2573_vm13, %v2548_v51  ;;  %5234 = vmatmul.msk.f32.vlgmr.msra.gmra.mxu2 %vm2331_vm12, %v2311_v26  ;;  %5505 = vrot.lane.b32.xlu1 %v5504_v37, %s9250_s13 }
 0x303   : > { %v1644_v19 = vpop.permute.xlu2 %1643 }
 0x304   : > { %v1640_v48 = vpop.permute.xlu1 %1639 }
 0x305   : > { %v2034_v38 = vsel %vm2006_vm9, %v2001_v53, %v1640_v48 }
 0x306   : > { %v1258_v32 = vpop.permute.xlu0 %1257  ;;  %v2067_v14 = vsel %vm2039_vm10, %v2034_v38, %v1768_v5 }
 0x307   : > { %5212 = vmatmul.msk.f32.gmra.mxu0 %vm2080_vm11, %v2067_v14  ;;  %v2469_v57 = vpop.f32.mrf.mxu1  ;;  %v1936_v44 = vsel %vm1907_vm5, %v1903_v25, %v1258_v32 }
 0x308   : > { %v2470_v20 = vadd.f32 %v7446_v31, %v2469_v57 }
 0x309   : > { %v2850_v46 = vld [vmem:[#allocation3 + $0x68] sm:$0xff] }
 0x30a   : > { %v2882_v45 = vld [vmem:[#allocation3 + $0x69] sm:$0xff]  ;;  %v2549_v29 = vmax.f32 %v2470_v20, 0.0  ;;  %5520 = vrot.lane.b32.xlu1 %v7657_v49, %s9260_s30  ;;  %v5509_v15 = vpack.i.bf16 %v2850_v46, %v2849_v9 }
 0x30b   : > { %v5514_v41 = vpack.i.bf16 %v2882_v45, %v2881_v63  ;;  %v7735_v55 = vld [vmem:[#allocation3 + $0x62] sm:$0xff]  ;;  %v7737_v47 = vld [vmem:[#allocation3 + $0x6a] sm:$0xff]  ;;  %v1262_v48 = vpop.permute.xlu2 %1261  ;;  %v5980_v63 = vld [vmem:[#allocation2 + $0x168] sm:$0xff] }
 0x30c   : > { %2628 = vst.msk [vmem:[#allocation3 + $0x79] sm:$0xff] %vm2573_vm13, %v2549_v29  ;;  %v1386_v39 = vpop.permute.xlu1 %1385  ;;  %v2252_v12 = vpop.f32.mrf.mxu0  ;;  %5510 = vrot.lane.b32.xlu2 %v5509_v15, %s9258_s15  ;;  %v5539_v2 = vpack.i.bf16 %v7737_v47, %v7735_v55  ;;  %v9436_v45 = vld [vmem:[#allocation61_spill] sm:$0xff] }
 0x30d   : > { %5515 = vrot.lane.b32.xlu0 %v5514_v41, %s9248_s22  ;;  %v2253_v49 = vadd.f32 %v7675_v6, %v2252_v12  ;;  %v1969_v27 = vsel %vm1940_vm7, %v1936_v44, %v1386_v39  ;;  %v1839_v13 = vsel %vm417_vm0, %v5980_v63, %v9436_v45  ;;  %v7780_v39 = vld [vmem:[%s9198_s5 + $0x80] sm:$0xff] }
 0x30e   : > { %v1642_v11 = vpop.permute.xlu0 %1641  ;;  %v2002_v1 = vsel %vm1973_vm8, %v1969_v27, %v1514_v23  ;;  %v1872_v29 = vsel %vm1841_vm4, %v1839_v13, %v9437_v54  ;;  %4313 = vmatpush.msrb.mxu0 %v7780_v39  ;;  %5356 = vmatpush.msra.mxu3 %v7780_v39 }
 0x30f   : > { %v2312_v33 = vmax.f32 %v2253_v49, 0.0  ;;  %v2035_v8 = vsel %vm2006_vm9, %v2002_v1, %v1642_v11 }
 0x311   : > { %5235 = vmatmul.msk.f32.gmra.mxu2 %vm2331_vm12, %v2312_v33 }
 0x312   : > { %5535 = vrot.lane.b32.xlu1 %v5514_v41, %s9256_s16 }
 0x313   : > { %v2883_v32 = vld [vmem:[#allocation3 + $0x79] sm:$0xff]  ;;  %v1646_v49 = vpop.permute.xlu2 %1645 }
 0x314   : > { %v1770_v62 = vpop.permute.xlu1 %1769  ;;  %5525 = vrot.lane.b32.xlu2 %v5504_v37, %s9252_s25  ;;  %v2851_v57 = vld [vmem:[#allocation3 + $0x78] sm:$0xff] }
 0x315   : > { %5530 = vrot.lane.b32.xlu0 %v5509_v15, %s9254_s12  ;;  %v2068_v40 = vsel %vm2039_vm10, %v2035_v8, %v1770_v62 }
 0x316   : > { %v1388_v34 = vpop.permute.xlu0 %1387  ;;  %5213 = vmatmul.msk.f32.gmra.mxu0 %vm2080_vm11, %v2068_v40  ;;  %v2472_v5 = vpop.f32.mrf.mxu1 }
 0x317   : > { %v2473_v56 = vadd.f32 %v7446_v31, %v2472_v5  ;;  %v1970_v18 = vsel %vm1940_vm7, %v1937_v21, %v1388_v34 }
 0x319   : > { %v2550_v28 = vmax.f32 %v2473_v56, 0.0 }
 0x31b   : > { %2629 = vst.msk [vmem:[#allocation3 + $0x81] sm:$0xff] %vm2573_vm13, %v2550_v28  ;;  %v2255_v43 = vpop.f32.mrf.mxu0  ;;  %v1264_v22 = vpop.permute.xlu2 %1263  ;;  %v1840_v28 = vsel %vm417_vm0, %v5981_v30, %v9438_v3  ;;  %v4080_v3 = vld [vmem:[%s9198_s5 + $0x68] sm:$0xff] }
 0x31c   : > { %v2256_v26 = vadd.f32 %v7675_v6, %v2255_v43  ;;  %v1516_v51 = vpop.permute.xlu1 %1515  ;;  %5540 = vrot.lane.b32.xlu2 %v5539_v2, %s9250_s13 }
 0x31d   : > { %v2003_v37 = vsel %vm1973_vm8, %v1970_v18, %v1516_v51 }
 0x31e   : > { %v2313_v23 = vmax.f32 %v2256_v26, 0.0  ;;  %v1772_v35 = vpop.permute.xlu0 %1771  ;;  %v2036_v53 = vsel %vm2006_vm9, %v2003_v37, %v1644_v19 }
 0x31f   : > { %v2069_v38 = vsel %vm2039_vm10, %v2036_v53, %v1772_v35 }
 0x320   : > { %5214 = vmatmul.msk.f32.gmra.mxu0 %vm2080_vm11, %v2069_v38  ;;  %5236 = vmatmul.msk.f32.gmra.mxu2 %vm2331_vm12, %v2313_v23 }
 0x322   : > { %v2884_v14 = vld [vmem:[#allocation3 + $0x81] sm:$0xff] }
 0x323   : > { %v2852_v20 = vld [vmem:[#allocation3 + $0x80] sm:$0xff]  ;;  %v7757_v9 = vpack.i.bf16 %v2884_v14, %v2883_v32 }
 0x324   : > { %v5544_v46 = vpack.i.bf16 %v2852_v20, %v2851_v57  ;;  %v1134_v4 = vpop.permute.xlu1 %1133  ;;  %5555 = vrot.lane.b32.xlu2 %v5514_v41, %s9260_s30  ;;  %v7797_v5 = vld [vmem:[#allocation3 + $0x7a] sm:$0xff]  ;;  %v7799_v56 = vld [vmem:[#allocation3 + $0x82] sm:$0xff]  ;;  %v1648_v20 = vpop.permute.xlu2 %1647 }
 0x325   : > { %v2258_v15 = vpop.f32.mrf.mxu0  ;;  %v2475_v16 = vpop.f32.mrf.mxu1  ;;  %5550 = vrot.lane.b32.xlu1 %v7757_v9, %s9248_s22  ;;  %v1905_v17 = vsel %vm1874_vm6, %v1872_v29, %v1134_v4  ;;  %v5574_v58 = vpack.i.bf16 %v7799_v56, %v7797_v5  ;;  %s9440_s22 = smov 112  }
 0x326   : > { %5545 = vrot.lane.b32.xlu0 %v5544_v46, %s9258_s15  ;;  %v2259_v52 = vadd.f32 %v7675_v6, %v2258_v15  ;;  %v2476_v41 = vadd.f32 %v7446_v31, %v2475_v16  ;;  %v1390_v25 = vpop.permute.xlu0 %1389  ;;  %v1938_v27 = vsel %vm1907_vm5, %v1905_v17, %v1262_v48 }
 0x327   : > { %v1971_v11 = vsel %vm1940_vm7, %v1938_v27, %v1390_v25 }
 0x328   : > { %v2314_v12 = vmax.f32 %v2259_v52, 0.0  ;;  %v2551_v44 = vmax.f32 %v2476_v41, 0.0 }
 0x32a   : > { %2630 = vst.msk [vmem:[#allocation3 + $0x91] sm:$0xff] %vm2573_vm13, %v2551_v44  ;;  %5237 = vmatmul.msk.f32.gmra.mxu2 %vm2331_vm12, %v2314_v12 }
 0x32c   : > { %v1518_v33 = vpop.permute.xlu1 %1517  ;;  %5570 = vrot.lane.b32.xlu2 %v7757_v9, %s9256_s16 }
 0x32d   : > { %v2004_v1 = vsel %vm1973_vm8, %v1971_v11, %v1518_v33  ;;  %5565 = vrot.lane.b32.xlu1 %v5544_v46, %s9254_s12 }
 0x32e   : > { %5560 = vrot.lane.b32.xlu0 %v5539_v2, %s9252_s25  ;;  %v1774_v8 = vpop.permute.xlu0 %1773  ;;  %v2037_v62 = vsel %vm2006_vm9, %v2004_v1, %v1646_v49  ;;  %v9439_v2 = vld [vmem:[#allocation90_spill] sm:$0xff] }
 0x32f   : > { %v2070_v19 = vsel %vm2039_vm10, %v2037_v62, %v1774_v8  ;;  %v2478_v40 = vpop.f32.mrf.mxu1  ;;  %v1873_v21 = vsel %vm1841_vm4, %v1840_v28, %v9439_v2  ;;  %vm3968_vm4 = vcmask 654336  }
 0x330   : > { %v2479_v34 = vadd.f32 %v7446_v31, %v2478_v40  ;;  %5215 = vmatmul.msk.f32.gmra.mxu0 %vm2080_vm11, %v2070_v19 }
 0x331   : > { %v2885_v23 = vld [vmem:[#allocation3 + $0x91] sm:$0xff] }
 0x332   : > { %v2552_v60 = vmax.f32 %v2479_v34, 0.0  ;;  %v2853_v53 = vld [vmem:[#allocation3 + $0x90] sm:$0xff] }
 0x334   : > { %2631 = vst.msk [vmem:[#allocation3 + $0x99] sm:$0xff] %vm2573_vm13, %v2552_v60  ;;  %v1136_v61 = vpop.permute.xlu1 %1135  ;;  %v2261_v42 = vpop.f32.mrf.mxu0 }
 0x335   : > { %v2262_v43 = vadd.f32 %v7675_v6, %v2261_v42  ;;  %v1906_v18 = vsel %vm1874_vm6, %v1873_v21, %v1136_v61  ;;  %vm4034_vm6 = vcmask 916480  }
 0x336   : > { %5575 = vrot.lane.b32.xlu0 %v5574_v58, %s9250_s13  ;;  %v1392_v26 = vpop.permute.xlu0 %1391  ;;  %v1939_v37 = vsel %vm1907_vm5, %v1906_v18, %v1264_v22  ;;  %v4081_v22 = vld [vmem:[%s9198_s5 + $0x70] sm:$0xff]  ;;  %vm4001_vm5 = vcmask 785408  }
 0x337   : > { %v2315_v51 = vmax.f32 %v2262_v43, 0.0  ;;  %v1972_v38 = vsel %vm1940_vm7, %v1939_v37, %v1392_v26  ;;  %v4079_v43 = vld [vmem:[%s9198_s5 + $0x60] sm:$0xff] }
 0x339   : > { %5238 = vmatmul.msk.f32.gmra.mxu2 %vm2331_vm12, %v2315_v51 }
 0x33b   : > { %v2886_v35 = vld [vmem:[#allocation3 + $0x99] sm:$0xff] }
 0x33c   : > { %v2854_v48 = vld [vmem:[#allocation3 + $0x98] sm:$0xff]  ;;  %v1520_v32 = vpop.permute.xlu1 %1519  ;;  %v5584_v14 = vpack.i.bf16 %v2886_v35, %v2885_v23  ;;  %v7890_v35 = vpop.permute.xlu2 %5420 }
 0x33d   : > { %v5579_v57 = vpack.i.bf16 %v2854_v48, %v2853_v53  ;;  %v2005_v46 = vsel %vm1973_vm8, %v1972_v38, %v1520_v32  ;;  %v7831_v17 = vld [vmem:[#allocation3 + $0x92] sm:$0xff]  ;;  %v7833_v52 = vld [vmem:[#allocation3 + $0x9a] sm:$0xff] }
 0x33e   : > { %5590 = vrot.lane.b32.xlu0 %v7757_v9, %s9260_s30  ;;  %v1776_v63 = vpop.permute.xlu0 %1775  ;;  %v2038_v45 = vsel %vm2006_vm9, %v2005_v46, %v1648_v20  ;;  %v2481_v13 = vpop.f32.mrf.mxu1  ;;  %5585 = vrot.lane.b32.xlu2 %v5584_v14, %s9440_s22  ;;  %v5609_v41 = vpack.i.bf16 %v7833_v52, %v7831_v17 }
 0x33f   : > { %5580 = vrot.lane.b32.xlu1 %v5579_v57, %s9258_s15  ;;  %v2071_v4 = vsel %vm2039_vm10, %v2038_v45, %v1776_v63  ;;  %v2482_v54 = vadd.f32 %v7446_v31, %v2481_v13 }
 0x340   : > { %5216 = vmatmul.msk.f32.gmra.mxu0 %vm2080_vm11, %v2071_v4 }
 0x341   : > { %v2553_v29 = vmax.f32 %v2482_v54, 0.0  ;;  %v4077_v54 = vld [vmem:[%s9198_s5 + $0x50] sm:$0xff] }
 0x343   : > { %2632 = vst.msk [vmem:[#allocation3 + $0xa9] sm:$0xff] %vm2573_vm13, %v2553_v29  ;;  %v2264_v15 = vpop.f32.mrf.mxu0 }
 0x344   : > { %v2265_v9 = vadd.f32 %v7675_v6, %v2264_v15  ;;  %v7880_v26 = vpop.permute.xlu1 %5415  ;;  %v7908_v29 = vpop.permute.xlu2 %5435 }
 0x346   : > { %5605 = vrot.lane.b32.xlu0 %v5584_v14, %s9256_s16  ;;  %v2316_v16 = vmax.f32 %v2265_v9, 0.0  ;;  %5600 = vrot.lane.b32.xlu2 %v5579_v57, %s9254_s12  ;;  %v7892_v57 = vpop.permute.xlu0 %5425 }
 0x347   : > { %5595 = vrot.lane.b32.xlu1 %v5574_v58, %s9252_s25 }
 0x348   : > { %5239 = vmatmul.msk.f32.gmra.mxu2 %vm2331_vm12, %v2316_v16  ;;  %5249 = vmatmul.msk.f32.vlgmr.msrb.gmra.mxu0 %vm2573_vm13, %v7641_v24  ;;  %v4082_v24 = vld [vmem:[%s9198_s5 + $0x78] sm:$0xff]  ;;  %v4076_v16 = vld [vmem:[%s9198_s5 + $0x48] sm:$0xff] }
 0x349   : > { %4185 = vmatpush.msrb.mxu2 %v4082_v24 }
 0x34a   : > { %v2855_v8 = vld [vmem:[#allocation3 + $0xa8] sm:$0xff] }
 0x34b   : > { %4186 = vmatpush.msrb.mxu2 %v4081_v22  ;;  %v4074_v22 = vld [vmem:[%s9198_s5 + $0x38] sm:$0xff] }
 0x34c   : > { %v7897_v63 = vpop.permute.xlu1 %5430 }
 0x34d   : > { %v2267_v25 = vpop.f32.mrf.mxu0  ;;  %v2484_v12 = vpop.f32.mrf.mxu1  ;;  %4187 = vmatpush.msrb.mxu2 %v4080_v3 }
 0x34e   : > { %v2268_v44 = vadd.f32 %v7675_v6, %v2267_v25  ;;  %v2485_v49 = vadd.f32 %v7446_v31, %v2484_v12 }
 0x34f   : > { %5610 = vrot.lane.b32.xlu1 %v5609_v41, %s9250_s13  ;;  %4188 = vmatpush.msrb.mxu2 %v4079_v43  ;;  %s9441_s13 = smov 80  }
 0x350   : > { %v2317_v27 = vmax.f32 %v2268_v44, 0.0  ;;  %v2554_v11 = vmax.f32 %v2485_v49, 0.0  ;;  %5250 = vmatmul.msk.f32.gmra.mxu0 %vm2573_vm13, %v7643_v59  ;;  %v2887_v59 = vld [vmem:[#allocation3 + $0xa9] sm:$0xff]  ;;  %v7930_v49 = vpop.permute.xlu2 %5450 }
 0x352   : > { %2633 = vst.msk [vmem:[#allocation3 + $0xb1] sm:$0xff] %vm2573_vm13, %v2554_v11  ;;  %5240 = vmatmul.msk.f32.gmra.mxu2 %vm2331_vm12, %v2317_v27 }
 0x357   : > { %5625 = vrot.lane.b32.xlu1 %v5584_v14, %s9260_s30  ;;  %v2487_v33 = vpop.f32.mrf.mxu1 }
 0x358   : > { %v2488_v1 = vadd.f32 %v7446_v31, %v2487_v33  ;;  %5251 = vmatmul.msk.f32.gmra.mxu0 %vm2573_vm13, %v7694_v36  ;;  %v4075_v33 = vld [vmem:[%s9198_s5 + $0x40] sm:$0xff] }
 0x359   : > { %v2856_v62 = vld [vmem:[#allocation3 + $0xb0] sm:$0xff] }
 0x35a   : > { %v2888_v19 = vld [vmem:[#allocation3 + $0xb1] sm:$0xff]  ;;  %v2555_v40 = vmax.f32 %v2488_v1, 0.0  ;;  %v5614_v34 = vpack.i.bf16 %v2856_v62, %v2855_v8  ;;  %v7950_v62 = vpop.permute.xlu2 %5465 }
 0x35b   : > { %v5619_v60 = vpack.i.bf16 %v2888_v19, %v2887_v59  ;;  %v7868_v42 = vld [vmem:[#allocation3 + $0xaa] sm:$0xff]  ;;  %v7870_v2 = vld [vmem:[#allocation3 + $0xb2] sm:$0xff] }
 0x35c   : > { %2634 = vst.msk [vmem:[#allocation3 + $0xc1] sm:$0xff] %vm2573_vm13, %v2555_v40  ;;  %v2270_v58 = vpop.f32.mrf.mxu0  ;;  %5615 = vrot.lane.b32.xlu2 %v5614_v34, %s9258_s15  ;;  %v5644_v21 = vpack.i.bf16 %v7870_v2, %v7868_v42 }
 0x35d   : > { %5620 = vrot.lane.b32.xlu0 %v5619_v60, %s9440_s22  ;;  %v2271_v36 = vadd.f32 %v7675_v6, %v2270_v58 }
 0x35f   : > { %5640 = vrot.lane.b32.xlu1 %v5619_v60, %s9256_s16  ;;  %v2318_v30 = vmax.f32 %v2271_v36, 0.0 }
 0x360   : > { %5252 = vmatmul.msk.f32.gmra.mxu0 %vm2573_vm13, %v7696_v7 }
 0x361   : > { %5241 = vmatmul.msk.f32.gmra.mxu2 %vm2331_vm12, %v2318_v30 }
 0x362   : > { %v7973_v43 = vpop.permute.xlu2 %5480 }
 0x363   : > { %v2889_v23 = vld [vmem:[#allocation3 + $0xc1] sm:$0xff] }
 0x364   : > { %5630 = vrot.lane.b32.xlu2 %v5609_v41, %s9252_s25  ;;  %v2857_v48 = vld [vmem:[#allocation3 + $0xc0] sm:$0xff]  ;;  %s6029_s25 = scalar_lea.hbm %s9204_s11, 512 }
 0x365   : > { %5635 = vrot.lane.b32.xlu0 %v5614_v34, %s9254_s12 }
 0x366   : > { %v2490_v28 = vpop.f32.mrf.mxu1 }
 0x367   : > { %v2491_v61 = vadd.f32 %v7446_v31, %v2490_v28 }
 0x368   : > { %5253 = vmatmul.msk.f32.gmra.mxu0 %vm2573_vm13, %v7735_v55  ;;  %v4078_v55 = vld [vmem:[%s9198_s5 + $0x58] sm:$0xff] }
 0x369   : > { %v2556_v7 = vmax.f32 %v2491_v61, 0.0  ;;  %4189 = vmatpush.msrb.mxu2 %v4078_v55 }
 0x36b   : > { %2635 = vst.msk [vmem:[#allocation3 + $0xc9] sm:$0xff] %vm2573_vm13, %v2556_v7  ;;  %v2273_v18 = vpop.f32.mrf.mxu0  ;;  %4190 = vmatpush.msrb.mxu2 %v4077_v54 }
 0x36c   : > { %v2274_v51 = vadd.f32 %v7675_v6, %v2273_v18  ;;  %5645 = vrot.lane.b32.xlu2 %v5644_v21, %s9441_s13 }
 0x36d   : > { %4191 = vmatpush.msrb.mxu2 %v4076_v16  ;;  %v4067_v16 = vld [vmem:[%s9198_s5] sm:$0xff] }
 0x36e   : > { %v2319_v37 = vmax.f32 %v2274_v51, 0.0 }
 0x36f   : > { %4192 = vmatpush.msrb.mxu2 %v4075_v33 }
 0x370   : > { %5242 = vmatmul.msk.f32.gmra.mxu2 %vm2331_vm12, %v2319_v37  ;;  %5254 = vmatmul.msk.f32.gmra.mxu0 %vm2573_vm13, %v7737_v47 }
 0x371   : > { %4193 = vmatpush.msrb.mxu2 %v4074_v22 }
 0x372   : > { %v2890_v53 = vld [vmem:[#allocation3 + $0xc9] sm:$0xff] }
 0x373   : > { %v2858_v38 = vld [vmem:[#allocation3 + $0xc8] sm:$0xff]  ;;  %v5654_v32 = vpack.i.bf16 %v2890_v53, %v2889_v23 }
 0x374   : > { %v5649_v14 = vpack.i.bf16 %v2858_v38, %v2857_v48  ;;  %5660 = vrot.lane.b32.xlu2 %v5619_v60, %s9260_s30  ;;  %v7919_v15 = vld [vmem:[#allocation3 + $0xc2] sm:$0xff]  ;;  %v7921_v9 = vld [vmem:[#allocation3 + $0xca] sm:$0xff] }
 0x375   : > { %v2276_v20 = vpop.f32.mrf.mxu0  ;;  %v2493_v46 = vpop.f32.mrf.mxu1  ;;  %5655 = vrot.lane.b32.xlu1 %v5654_v32, %s9440_s22  ;;  %v5679_v41 = vpack.i.bf16 %v7921_v9, %v7919_v15  ;;  %v4071_v38 = vld [vmem:[%s9198_s5 + $0x20] sm:$0xff] }
 0x376   : > { %5650 = vrot.lane.b32.xlu0 %v5649_v14, %s9258_s15  ;;  %v2277_v47 = vadd.f32 %v7675_v6, %v2276_v20  ;;  %v2494_v45 = vadd.f32 %v7446_v31, %v2493_v46  ;;  %v7913_v31 = vpop.permute.xlu0 %5440  ;;  %v4070_v20 = vld [vmem:[%s9198_s5 + $0x18] sm:$0xff]  ;;  %v7994_v46 = vpop.permute.xlu2 %5495 }
 0x378   : > { %v2320_v13 = vmax.f32 %v2277_v47, 0.0  ;;  %v2557_v4 = vmax.f32 %v2494_v45, 0.0  ;;  %5255 = vmatmul.msk.f32.gmra.mxu0 %vm2573_vm13, %v7797_v5  ;;  %v7915_v5 = vpop.permute.xlu1 %5445 }
 0x37a   : > { %2636 = vst.msk [vmem:[#allocation3 + $0xd9] sm:$0xff] %vm2573_vm13, %v2557_v4  ;;  %5243 = vmatmul.msk.f32.gmra.mxu2 %vm2331_vm12, %v2320_v13  ;;  %v4068_v4 = vld [vmem:[%s9198_s5 + $0x8] sm:$0xff] }
 0x37c   : > { %5675 = vrot.lane.b32.xlu2 %v5654_v32, %s9256_s16 }
 0x37d   : > { %5670 = vrot.lane.b32.xlu1 %v5649_v14, %s9254_s12  ;;  %s9443_s12 = smov 48  }
 0x37e   : > { %5665 = vrot.lane.b32.xlu0 %v5644_v21, %s9442_s24  ;;  %v7943_v1 = vpop.permute.xlu0 %5455 }
 0x380   : > { %5256 = vmatmul.msk.f32.gmra.mxu0 %vm2573_vm13, %v7799_v56  ;;  %v7935_v56 = vld [vmem:[%s9197_s4] ss:$0 sm:$0xff]  ;;  %v7946_v8 = vpop.permute.xlu1 %5460 }
 0x381   : > { %v2859_v19 = vld [vmem:[#allocation3 + $0xd8] sm:$0xff] }
 0x384   : > { %v2279_v25 = vpop.f32.mrf.mxu0 }
 0x385   : > { %v2280_v12 = vadd.f32 %v7675_v6, %v2279_v25  ;;  %v2496_v44 = vpop.f32.mrf.mxu2 }
 0x386   : > { %5680 = vrot.lane.b32.xlu0 %v5679_v41, %s9441_s13  ;;  %v2497_v27 = vadd.f32 %v7935_v56, %v2496_v44  ;;  %v7957_v58 = vpop.permute.xlu0 %5470 }
 0x387   : > { %v2321_v11 = vmax.f32 %v2280_v12, 0.0 }
 0x388   : > { %v2558_v24 = vmax.f32 %v2497_v27, 0.0  ;;  %5257 = vmatmul.msk.f32.gmra.mxu0 %vm2573_vm13, %v7831_v17  ;;  %v2891_v17 = vld [vmem:[#allocation3 + $0xd9] sm:$0xff]  ;;  %v7959_v30 = vpop.permute.xlu1 %5475 }
 0x389   : > { %5244 = vmatmul.msk.f32.gmra.mxu2 %vm2331_vm12, %v2321_v11 }
 0x38a   : > { %2637 = vst.msk [vmem:[#allocation3 + $0xe1] sm:$0xff] %vm2573_vm13, %v2558_v24 }
 0x38e   : > { %5695 = vrot.lane.b32.xlu0 %v5654_v32, %s9260_s30  ;;  %v7977_v18 = vpop.permute.xlu0 %5485 }
 0x390   : > { %5258 = vmatmul.msk.f32.gmra.mxu0 %vm2573_vm13, %v7833_v52  ;;  %v4073_v52 = vld [vmem:[%s9198_s5 + $0x30] sm:$0xff]  ;;  %v7979_v55 = vpop.permute.xlu1 %5490 }
 0x391   : > { %v2892_v59 = vld [vmem:[#allocation3 + $0xe1] sm:$0xff]  ;;  %4194 = vmatpush.msrb.mxu2 %v4073_v52 }
 0x392   : > { %v2860_v40 = vld [vmem:[#allocation3 + $0xe0] sm:$0xff]  ;;  %v5689_v34 = vpack.i.bf16 %v2892_v59, %v2891_v17 }
 0x393   : > { %v5684_v60 = vpack.i.bf16 %v2860_v40, %v2859_v19  ;;  %v2282_v36 = vpop.f32.mrf.mxu0  ;;  %v2828_v23 = vld [vmem:[#allocation3 + $0xda] sm:$0xff]  ;;  %v2829_v53 = vld [vmem:[#allocation3 + $0xe2] sm:$0xff] }
 0x394   : > { %v2283_v3 = vadd.f32 %v7675_v6, %v2282_v36  ;;  %v2499_v28 = vpop.f32.mrf.mxu2  ;;  %5690 = vrot.lane.b32.xlu2 %v5689_v34, %s9440_s22  ;;  %v5714_v32 = vpack.i.bf16 %v2829_v53, %v2828_v23  ;;  %v2652_v36 = vld [vmem:[#allocation3] sm:$0xff]  ;;  %v5432_v53 = vunpack.i.l.bf16 %v7897_v63 }
 0x395   : > { %5685 = vrot.lane.b32.xlu1 %v5684_v60, %s9258_s15  ;;  %v2500_v61 = vadd.f32 %v7935_v56, %v2499_v28  ;;  %v5422_v28 = vunpack.i.l.bf16 %v7890_v35 }
 0x396   : > { %5710 = vrot.lane.b32.xlu0 %v5689_v34, %s9256_s16  ;;  %v2322_v7 = vmax.f32 %v2283_v3, 0.0  ;;  %v8001_v13 = vpop.permute.xlu0 %5500  ;;  %s9446_s16 = smov 64  }
 0x397   : > { %v2559_v21 = vmax.f32 %v2500_v61, 0.0 }
 0x398   : > { %5245 = vmatmul.msk.f32.gmra.mxu2 %vm2331_vm12, %v2322_v7  ;;  %5259 = vmatmul.msk.f32.gmra.mxu0 %vm2573_vm13, %v7868_v42  ;;  %v4072_v42 = vld [vmem:[%s9198_s5 + $0x28] sm:$0xff]  ;;  %v8006_v54 = vpop.permute.xlu1 %5505 }
 0x399   : > { %2638 = vst.msk [vmem:[#allocation3 + $0xf1] sm:$0xff] %vm2573_vm13, %v2559_v21  ;;  %4195 = vmatpush.msrb.mxu2 %v4072_v42  ;;  %v5427_v21 = vunpack.i.l.bf16 %v7892_v57 }
 0x39b   : > { %4196 = vmatpush.msrb.mxu2 %v4071_v38 }
 0x39c   : > { %5705 = vrot.lane.b32.xlu2 %v5684_v60, %s9443_s12 }
 0x39d   : > { %5700 = vrot.lane.b32.xlu1 %v5679_v41, %s9442_s24  ;;  %v2285_v51 = vpop.f32.mrf.mxu0  ;;  %4197 = vmatpush.msrb.mxu2 %v4070_v20  ;;  %v8014_v41 = vpop.permute.xlu2 %5510 }
 0x39e   : > { %v2286_v37 = vadd.f32 %v7675_v6, %v2285_v51 }
 0x3a0   : > { %v2323_v48 = vmax.f32 %v2286_v37, 0.0  ;;  %5260 = vmatmul.msk.f32.gmra.mxu0 %vm2573_vm13, %v7870_v2  ;;  %v4069_v2 = vld [vmem:[%s9198_s5 + $0x10] sm:$0xff]  ;;  %v2893_v19 = vld [vmem:[#allocation3 + $0xf1] sm:$0xff]  ;;  %v8028_v60 = vpop.permute.xlu1 %5520 }
 0x3a1   : > { %4198 = vmatpush.msrb.mxu2 %v4069_v2 }
 0x3a2   : > { %5246 = vmatmul.msk.f32.gmra.mxu2 %vm2331_vm12, %v2323_v48  ;;  %v5418_v48 = vunpack.i.h.bf16 %v7880_v26 }
 0x3a3   : > { %v2502_v14 = vpop.f32.mrf.mxu2  ;;  %4199 = vmatpush.msrb.mxu2 %v4068_v4  ;;  %v5423_v4 = vunpack.i.h.bf16 %v7890_v35  ;;  %v5447_v35 = vunpack.i.l.bf16 %v7915_v5 }
 0x3a4   : > { %v2503_v47 = vadd.f32 %v7935_v56, %v2502_v14 }
 0x3a5   : > { %5715 = vrot.lane.b32.xlu1 %v5714_v32, %s9441_s13  ;;  %4200 = vmatpush.msrb.mxu2 %v4067_v16 }
 0x3a6   : > { %v2560_v45 = vmax.f32 %v2503_v47, 0.0 }
 0x3a7   : > { %5353 = vmatpush.msra.mxu2 %v7770_v10  ;;  %v2861_v10 = vld [vmem:[#allocation3 + $0xf0] sm:$0xff] }
 0x3a8   : > { %2639 = vst.msk [vmem:[#allocation3 + $0xf9] sm:$0xff] %vm2573_vm13, %v2560_v45  ;;  %5261 = vmatmul.msk.f32.gmra.mxu0 %vm2573_vm13, %v7919_v15  ;;  %v8021_v15 = vpop.permute.xlu0 %5515  ;;  %v8048_v61 = vpop.permute.xlu1 %5535 }
 0x3a9   : > { %5355 = vmatpush.msra.mxu2 %v7780_v39  ;;  %v8037_v39 = vpop.permute.xlu2 %5525 }
 0x3ad   : > { %5730 = vrot.lane.b32.xlu1 %v5689_v34, %s9444_s14  ;;  %v2288_v25 = vpop.f32.mrf.mxu0  ;;  %v2505_v12 = vpop.f32.mrf.mxu2 }
 0x3ae   : > { %v2289_v44 = vadd.f32 %v7675_v6, %v2288_v25  ;;  %v2506_v27 = vadd.f32 %v7935_v56, %v2505_v12  ;;  %v5442_v25 = vunpack.i.l.bf16 %v7913_v31 }
 0x3af   : > { %v2925_v11 = vld [vmem:[#allocation3 + $0xf2] sm:$0xff]  ;;  %v2926_v22 = vld [vmem:[#allocation3 + $0xfa] sm:$0xff] }
 0x3b0   : > { %v2862_v24 = vld [vmem:[#allocation3 + $0xf8] sm:$0xff]  ;;  %v2324_v17 = vmax.f32 %v2289_v44, 0.0  ;;  %v2561_v59 = vmax.f32 %v2506_v27, 0.0  ;;  %5262 = vmatmul.msk.f32.gmra.mxu0 %vm2573_vm13, %v7921_v9  ;;  %5265 = vmatmul.msk.f32.vlgmr.msra.gmra.mxu3 %vm2573_vm13, %v2925_v11  ;;  %v5417_v9 = vunpack.i.l.bf16 %v7880_v26  ;;  %v8042_v3 = vpop.permute.xlu0 %5530  ;;  %v8062_v45 = vpack.i.bf16 %v2926_v22, %v2925_v11  ;;  %v8072_v12 = vpop.permute.xlu1 %5550 }
 0x3b1   : > { %v2894_v33 = vld [vmem:[#allocation3 + $0xf9] sm:$0xff]  ;;  %v5719_v40 = vpack.i.bf16 %v2862_v24, %v2861_v10  ;;  %v8056_v14 = vpop.permute.xlu2 %5540  ;;  %v5437_v26 = vunpack.i.l.bf16 %v7908_v29  ;;  %v5428_v44 = vunpack.i.h.bf16 %v7892_v57  ;;  %v5433_v24 = vunpack.i.h.bf16 %v7897_v63 }
 0x3b2   : > { %v8026_v34 = vpack.i.bf16 %v2894_v33, %v2893_v19  ;;  %2640 = vst.msk [vmem:[#allocation3 + $0x109] sm:$0xff] %vm2573_vm13, %v2561_v59  ;;  %5247 = vmatmul.msk.f32.gmra.mxu2 %vm2331_vm12, %v2324_v17  ;;  %v3837_v52 = vsel %vm2573_vm13, %v2652_v36, %v5417_v9  ;;  %v5452_v59 = vunpack.i.l.bf16 %v7930_v49 }
 0x3b3   : > { %5720 = vrot.lane.b32.xlu2 %v5719_v40, %s9445_s29 }
 0x3b4   : > { %5725 = vrot.lane.b32.xlu0 %v8026_v34, %s9440_s22 }
 0x3b5   : > { %5745 = vrot.lane.b32.xlu1 %v8026_v34, %s9446_s16 }
 0x3b8   : > { %5263 = vmatmul.msk.f32.gmra.mxu0 %vm2573_vm13, %v2828_v23  ;;  %5266 = vmatmul.msk.f32.gmra.mxu3 %vm2573_vm13, %v2926_v22  ;;  %v3870_v23 = vsel %vm3869_vm1, %v3837_v52, %v5422_v28  ;;  %v8059_v2 = vpop.permute.xlu0 %5545  ;;  %v5457_v52 = vunpack.i.l.bf16 %v7943_v1 }
 0x3b9   : > { %v3903_v47 = vsel %vm3902_vm2, %v3870_v23, %v5427_v21  ;;  %v2895_v33 = vld [vmem:[#allocation3 + $0x109] sm:$0xff]  ;;  %v5438_v21 = vunpack.i.h.bf16 %v7908_v29 }
 0x3ba   : > { %v2863_v17 = vld [vmem:[#allocation3 + $0x108] sm:$0xff] }
 0x3bb   : > { %5735 = vrot.lane.b32.xlu2 %v5714_v32, %s9442_s24  ;;  %v2653_v32 = vld [vmem:[#allocation3 + $0x8] sm:$0xff] }
 0x3bc   : > { %5740 = vrot.lane.b32.xlu0 %v5719_v40, %s9443_s12  ;;  %v2508_v7 = vpop.f32.mrf.mxu2  ;;  %v3838_v16 = vsel %vm2573_vm13, %v2653_v32, %v5418_v48  ;;  %v5983_v48 = vld [vmem:[#allocation3 + $0x18] sm:$0xff] }
 0x3bd   : > { %v2509_v51 = vadd.f32 %v7935_v56, %v2508_v7  ;;  %v2291_v37 = vpop.f32.mrf.mxu0  ;;  %v3871_v11 = vsel %vm3869_vm1, %v3838_v16, %v5423_v4  ;;  %v8091_v7 = vpop.permute.xlu2 %5555  ;;  %v3839_v29 = vsel %vm2573_vm13, %v5983_v48, %v5452_v59  ;;  %v5453_v16 = vunpack.i.h.bf16 %v7930_v49 }
 0x3be   : > { %v2292_v42 = vadd.f32 %v7675_v6, %v2291_v37  ;;  %v3936_v6 = vsel %vm3935_vm3, %v3903_v47, %v5432_v53  ;;  %v3904_v9 = vsel %vm3902_vm2, %v3871_v11, %v5428_v44  ;;  %v5443_v53 = vunpack.i.h.bf16 %v7913_v31 }
 0x3bf   : > { %v2562_v38 = vmax.f32 %v2509_v51, 0.0  ;;  %v3969_v27 = vsel %vm3968_vm4, %v3936_v6, %v5437_v26  ;;  %v3937_v28 = vsel %vm3935_vm3, %v3904_v9, %v5433_v24  ;;  %v5462_v51 = vunpack.i.l.bf16 %v7946_v8  ;;  %v5984_v24 = vld [vmem:[#allocation3 + $0x20] sm:$0xff] }
 0x3c0   : > { %v2325_v20 = vmax.f32 %v2292_v42, 0.0  ;;  %v4002_v19 = vsel %vm4001_vm5, %v3969_v27, %v5442_v25  ;;  %v8095_v37 = vpop.permute.xlu0 %5560  ;;  %v3970_v32 = vsel %vm3968_vm4, %v3937_v28, %v5438_v21  ;;  %v5467_v31 = vunpack.i.l.bf16 %v7950_v62 }
 0x3c1   : > { %2641 = vst.msk [vmem:[#allocation3 + $0x111] sm:$0xff] %vm2573_vm13, %v2562_v38  ;;  %v4035_v22 = vsel %vm4034_vm6, %v4002_v19, %v5447_v35  ;;  %v5448_v38 = vunpack.i.h.bf16 %v7915_v5  ;;  %v4003_v26 = vsel %vm4001_vm5, %v3970_v32, %v5443_v53  ;;  %v5472_v5 = vunpack.i.l.bf16 %v7957_v58 }
 0x3c2   : > { %5248 = vmatmul.msk.f32.gmra.mxu2 %vm2331_vm12, %v2325_v20  ;;  %v3872_v20 = vsel %vm3869_vm1, %v3839_v29, %v5457_v52  ;;  %v5458_v44 = vunpack.i.h.bf16 %v7943_v1  ;;  %v5477_v35 = vunpack.i.l.bf16 %v7959_v30  ;;  %v5463_v11 = vunpack.i.h.bf16 %v7946_v8 }
 0x3c3   : > { %5750 = vrot.lane.b32.xlu2 %v8062_v45, %s9441_s13  ;;  %v3905_v4 = vsel %vm3902_vm2, %v3872_v20, %v5462_v51  ;;  %v4036_v25 = vsel %vm4034_vm6, %v4003_v26, %v5448_v38  ;;  %v3840_v1 = vsel %vm2573_vm13, %v5984_v24, %v5453_v16  ;;  %v5482_v9 = vunpack.i.l.bf16 %v7973_v43 }
 0x3c4   : > { %v3938_v27 = vsel %vm3935_vm3, %v3905_v4, %v5467_v31  ;;  %v3873_v8 = vsel %vm3869_vm1, %v3840_v1, %v5458_v44  ;;  %v5473_v28 = vunpack.i.h.bf16 %v7957_v58  ;;  %v5487_v52 = vunpack.i.l.bf16 %v7977_v18 }
 0x3c5   : > { %v8125_v49 = vpop.permute.xlu2 %5570  ;;  %v3971_v59 = vsel %vm3968_vm4, %v3938_v27, %v5472_v5  ;;  %v5478_v51 = vunpack.i.h.bf16 %v7959_v30  ;;  %v5483_v32 = vunpack.i.h.bf16 %v7973_v43  ;;  %v5497_v20 = vunpack.i.l.bf16 %v7994_v46 }
 0x3c6   : > { %v5488_v26 = vunpack.i.h.bf16 %v7977_v18  ;;  %v5507_v5 = vunpack.i.l.bf16 %v8006_v54  ;;  %v5493_v27 = vunpack.i.h.bf16 %v7979_v55 }
 0x3c8   : > { %v8080_v10 = vld [vmem:[#allocation3 + $0x10a] sm:$0xff]  ;;  %v2928_v6 = vld [vmem:[#allocation3 + $0x112] sm:$0xff] }
 0x3c9   : > { %v2896_v40 = vld [vmem:[#allocation3 + $0x111] sm:$0xff]  ;;  %5267 = vmatmul.msk.f32.gmra.mxu3 %vm2573_vm13, %v8080_v10  ;;  %v5784_v53 = vpack.i.bf16 %v2928_v6, %v8080_v10 }
 0x3ca   : > { %v2864_v57 = vld [vmem:[#allocation3 + $0x110] sm:$0xff]  ;;  %v8087_v36 = vpack.i.bf16 %v2896_v40, %v2895_v33  ;;  %4201 = vmatmul.f32.vlgmr.msrb.gmra.mxu2 %v4035_v22  ;;  %v8130_v33 = vpop.permute.xlu0 %5575  ;;  %v5468_v22 = vunpack.i.h.bf16 %v7950_v62 }
 0x3cb   : > { %v5754_v63 = vpack.i.bf16 %v2864_v57, %v2863_v17  ;;  %5765 = vrot.lane.b32.xlu2 %v8026_v34, %s9444_s14  ;;  %v2511_v23 = vpop.f32.mrf.mxu2  ;;  %v8108_v34 = vpop.permute.xlu1 %5565  ;;  %v4004_v57 = vsel %vm4001_vm5, %v3971_v59, %v5477_v35  ;;  %v5985_v62 = vld [vmem:[#allocation3 + $0x30] sm:$0xff] }
 0x3cc   : > { %5760 = vrot.lane.b32.xlu1 %v8087_v36, %s9440_s22  ;;  %v2512_v42 = vadd.f32 %v7935_v56, %v2511_v23  ;;  %v4037_v21 = vsel %vm4034_vm6, %v4004_v57, %v5482_v9  ;;  %v5492_v23 = vunpack.i.l.bf16 %v7979_v55  ;;  %v3841_v58 = vsel %vm2573_vm13, %v5985_v62, %v5487_v52 }
 0x3cd   : > { %5755 = vrot.lane.b32.xlu0 %v5754_v63, %s9445_s29  ;;  %v8149_v48 = vpop.permute.xlu2 %5585  ;;  %v5517_v55 = vunpack.i.l.bf16 %v8021_v15  ;;  %v5512_v57 = vunpack.i.l.bf16 %v8014_v41 }
 0x3ce   : > { %v2563_v47 = vmax.f32 %v2512_v42, 0.0  ;;  %v3874_v30 = vsel %vm3869_vm1, %v3841_v58, %v5492_v23 }
 0x3cf   : > { %v3907_v16 = vsel %vm3902_vm2, %v3874_v30, %v5497_v20  ;;  %v5527_v30 = vunpack.i.l.bf16 %v8037_v39  ;;  %v5513_v20 = vunpack.i.h.bf16 %v8014_v41 }
 0x3d0   : > { %2642 = vst.msk [vmem:[#allocation3 + $0x121] sm:$0xff] %vm2573_vm13, %v2563_v47  ;;  %v5502_v47 = vunpack.i.l.bf16 %v8001_v13 }
 0x3d1   : > { %5268 = vmatmul.msk.f32.gmra.mxu3 %vm2573_vm13, %v2928_v6 }
 0x3d2   : > { %4204 = vmatmul.f32.gmra.mxu2 %v4036_v25  ;;  %v8158_v10 = vpop.permute.xlu0 %5590  ;;  %v3940_v1 = vsel %vm3935_vm3, %v3907_v16, %v5502_v47  ;;  %v5537_v16 = vunpack.i.l.bf16 %v8048_v61 }
 0x3d3   : > { %5780 = vrot.lane.b32.xlu2 %v8087_v36, %s9446_s16  ;;  %v8134_v19 = vpop.permute.xlu1 %5580 }
 0x3d4   : > { %5775 = vrot.lane.b32.xlu1 %v5754_v63, %s9443_s12 }
 0x3d5   : > { %5770 = vrot.lane.b32.xlu0 %v8062_v45, %s9442_s24  ;;  %v2514_v17 = vpop.f32.mrf.mxu2  ;;  %v3906_v45 = vsel %vm3902_vm2, %v3873_v8, %v5463_v11 }
 0x3d6   : > { %v2515_v40 = vadd.f32 %v7935_v56, %v2514_v17  ;;  %v3939_v42 = vsel %vm3935_vm3, %v3906_v45, %v5468_v22  ;;  %v5986_v17 = vld [vmem:[#allocation3 + $0x38] sm:$0xff]  ;;  %v5498_v45 = vunpack.i.h.bf16 %v7994_v46  ;;  %v5522_v22 = vunpack.i.l.bf16 %v8028_v60  ;;  %v5987_v46 = vld [vmem:[#allocation3 + $0x48] sm:$0xff] }
 0x3d7   : > { %v3972_v29 = vsel %vm3968_vm4, %v3939_v42, %v5473_v28  ;;  %v2897_v31 = vld [vmem:[#allocation3 + $0x121] sm:$0xff]  ;;  %v3842_v59 = vsel %vm2573_vm13, %v5986_v17, %v5488_v26  ;;  %v5503_v28 = vunpack.i.h.bf16 %v8001_v13 }
 0x3d8   : > { %v2564_v63 = vmax.f32 %v2515_v40, 0.0  ;;  %v4005_v38 = vsel %vm4001_vm5, %v3972_v29, %v5478_v51  ;;  %v2865_v6 = vld [vmem:[#allocation3 + $0x120] sm:$0xff]  ;;  %v3973_v40 = vsel %vm3968_vm4, %v3940_v1, %v5507_v5  ;;  %v3875_v9 = vsel %vm3869_vm1, %v3842_v59, %v5493_v27 }
 0x3d9   : > { %v4038_v25 = vsel %vm4034_vm6, %v4005_v38, %v5483_v32  ;;  %v4006_v52 = vsel %vm4001_vm5, %v3973_v40, %v5512_v57  ;;  %v5508_v51 = vunpack.i.h.bf16 %v8006_v54  ;;  %v3843_v13 = vsel %vm2573_vm13, %v5987_v46, %v5522_v22 }
 0x3da   : > { %2643 = vst.msk [vmem:[#allocation3 + $0x129] sm:$0xff] %vm2573_vm13, %v2564_v63  ;;  %4207 = vmatmul.f32.gmra.mxu2 %v4037_v21  ;;  %v3908_v21 = vsel %vm3902_vm2, %v3875_v9, %v5498_v45  ;;  %v8191_v23 = vpop.permute.xlu0 %5605  ;;  %v4039_v42 = vsel %vm4034_vm6, %v4006_v52, %v5517_v55  ;;  %v5532_v29 = vunpack.i.l.bf16 %v8042_v3  ;;  %v5518_v38 = vunpack.i.h.bf16 %v8021_v15 }
 0x3db   : > { %v8161_v4 = vpop.permute.xlu1 %5595  ;;  %v3941_v54 = vsel %vm3935_vm3, %v3908_v21, %v5503_v28  ;;  %v3876_v47 = vsel %vm3869_vm1, %v3843_v13, %v5527_v30  ;;  %v5533_v27 = vunpack.i.h.bf16 %v8042_v3  ;;  %v5552_v55 = vunpack.i.l.bf16 %v8072_v12 }
 0x3dc   : > { %v3974_v32 = vsel %vm3968_vm4, %v3941_v54, %v5508_v51  ;;  %v3909_v26 = vsel %vm3902_vm2, %v3876_v47, %v5532_v29  ;;  %v5557_v45 = vunpack.i.l.bf16 %v8091_v7  ;;  %v5562_v28 = vunpack.i.l.bf16 %v8095_v37 }
 0x3dd   : > { %5785 = vrot.lane.b32.xlu0 %v5784_v53, %s9441_s13  ;;  %v4007_v5 = vsel %vm4001_vm5, %v3974_v32, %v5513_v20  ;;  %v3942_v41 = vsel %vm3935_vm3, %v3909_v26, %v5537_v16  ;;  %v5543_v21 = vunpack.i.h.bf16 %v8056_v14  ;;  %v5567_v46 = vunpack.i.l.bf16 %v8108_v34 }
 0x3de   : > { %v4040_v15 = vsel %vm4034_vm6, %v4007_v5, %v5518_v38  ;;  %v5558_v47 = vunpack.i.h.bf16 %v8091_v7  ;;  %v5577_v5 = vunpack.i.l.bf16 %v8130_v33  ;;  %v5582_v7 = vunpack.i.l.bf16 %v8134_v19 }
 0x3e1   : > { %v2929_v44 = vld [vmem:[#allocation3 + $0x122] sm:$0xff]  ;;  %v2930_v62 = vld [vmem:[#allocation3 + $0x12a] sm:$0xff] }
 0x3e2   : > { %v2898_v43 = vld [vmem:[#allocation3 + $0x129] sm:$0xff]  ;;  %4210 = vmatmul.f32.gmra.mxu2 %v4038_v25  ;;  %5269 = vmatmul.msk.f32.gmra.mxu3 %vm2573_vm13, %v2929_v44  ;;  %v8216_v25 = vpop.permute.xlu0 %5620  ;;  %v8224_v1 = vpack.i.bf16 %v2930_v62, %v2929_v44 }
 0x3e3   : > { %v2866_v35 = vld [vmem:[#allocation3 + $0x128] sm:$0xff]  ;;  %v8169_v11 = vpack.i.bf16 %v2898_v43, %v2897_v31  ;;  %v8195_v58 = vpop.permute.xlu1 %5610  ;;  %v5542_v43 = vunpack.i.l.bf16 %v8056_v14 }
 0x3e4   : > { %v5789_v24 = vpack.i.bf16 %v2866_v35, %v2865_v6  ;;  %v2517_v18 = vpop.f32.mrf.mxu2  ;;  %v5523_v6 = vunpack.i.h.bf16 %v8028_v60  ;;  %v5988_v35 = vld [vmem:[#allocation3 + $0x50] sm:$0xff] }
 0x3e5   : > { %5800 = vrot.lane.b32.xlu0 %v8087_v36, %s9444_s14  ;;  %5795 = vrot.lane.b32.xlu2 %v8169_v11, %s9440_s22  ;;  %v2518_v8 = vadd.f32 %v7935_v56, %v2517_v18  ;;  %v8183_v36 = vpop.permute.xlu2 %5600  ;;  %v5528_v18 = vunpack.i.h.bf16 %v8037_v39  ;;  %v5538_v39 = vunpack.i.h.bf16 %v8048_v61  ;;  %v5989_v61 = vld [vmem:[#allocation3 + $0x60] sm:$0xff] }
 0x3e6   : > { %5790 = vrot.lane.b32.xlu1 %v5789_v24, %s9445_s29  ;;  %v3844_v60 = vsel %vm2573_vm13, %v5988_v35, %v5523_v6 }
 0x3e7   : > { %v2565_v63 = vmax.f32 %v2518_v8, 0.0  ;;  %v3975_v8 = vsel %vm3968_vm4, %v3942_v41, %v5542_v43  ;;  %v3877_v40 = vsel %vm3869_vm1, %v3844_v60, %v5528_v18  ;;  %v5572_v41 = vunpack.i.l.bf16 %v8125_v49 }
 0x3e8   : > { %v3910_v44 = vsel %vm3902_vm2, %v3877_v40, %v5533_v27  ;;  %v5563_v43 = vunpack.i.h.bf16 %v8095_v37  ;;  %v5568_v37 = vunpack.i.h.bf16 %v8108_v34  ;;  %v5578_v34 = vunpack.i.h.bf16 %v8130_v33 }
 0x3e9   : > { %2644 = vst.msk [vmem:[#allocation3 + $0x139] sm:$0xff] %vm2573_vm13, %v2565_v63  ;;  %v5548_v63 = vunpack.i.h.bf16 %v8059_v2  ;;  %v3943_v52 = vsel %vm3935_vm3, %v3910_v44, %v5538_v39  ;;  %v5592_v39 = vunpack.i.l.bf16 %v8158_v10 }
 0x3ea   : > { %4213 = vmatmul.f32.gmra.mxu2 %v4039_v42  ;;  %5270 = vmatmul.msk.f32.gmra.mxu3 %vm2573_vm13, %v2930_v62  ;;  %v8247_v51 = vpop.permute.xlu0 %5635  ;;  %v3845_v42 = vsel %vm2573_vm13, %v5989_v61, %v5557_v45  ;;  %v5553_v62 = vunpack.i.h.bf16 %v8072_v12  ;;  %v3976_v13 = vsel %vm3968_vm4, %v3943_v52, %v5543_v21  ;;  %v5991_v61 = vld [vmem:[#allocation3 + $0x78] sm:$0xff] }
 0x3eb   : > { %v8227_v17 = vpop.permute.xlu1 %5625  ;;  %v3878_v29 = vsel %vm3869_vm1, %v3845_v42, %v5562_v28  ;;  %v4009_v38 = vsel %vm4001_vm5, %v3976_v13, %v5548_v63  ;;  %v5583_v63 = vunpack.i.h.bf16 %v8134_v19  ;;  %v5597_v28 = vunpack.i.l.bf16 %v8161_v4 }
 0x3ec   : > { %v3911_v16 = vsel %vm3902_vm2, %v3878_v29, %v5567_v46  ;;  %v3847_v42 = vsel %vm2573_vm13, %v5991_v61, %v5592_v39  ;;  %v5602_v13 = vunpack.i.l.bf16 %v8183_v36 }
 0x3ed   : > { %5815 = vrot.lane.b32.xlu0 %v8169_v11, %s9446_s16  ;;  %5810 = vrot.lane.b32.xlu2 %v5789_v24, %s9443_s12  ;;  %v8210_v31 = vpop.permute.xlu2 %5615  ;;  %v3944_v27 = vsel %vm3935_vm3, %v3911_v16, %v5572_v41  ;;  %v3880_v46 = vsel %vm3869_vm1, %v3847_v42, %v5597_v28  ;;  %v5603_v41 = vunpack.i.h.bf16 %v8183_v36 }
 0x3ee   : > { %5805 = vrot.lane.b32.xlu1 %v5784_v53, %s9442_s24  ;;  %v5547_v53 = vunpack.i.l.bf16 %v8059_v2 }
 0x3f0   : > { %v4008_v3 = vsel %vm4001_vm5, %v3975_v8, %v5547_v53  ;;  %v8259_v54 = vld [vmem:[#allocation3 + $0x138] sm:$0xff]  ;;  %v4042_v53 = vsel %vm4034_vm6, %v4009_v38, %v5553_v62 }
 0x3f1   : > { %v4041_v22 = vsel %vm4034_vm6, %v4008_v3, %v5552_v55  ;;  %v2899_v26 = vld [vmem:[#allocation3 + $0x139] sm:$0xff] }
 0x3f2   : > { %4216 = vmatmul.f32.gmra.mxu2 %v4040_v15  ;;  %v8280_v60 = vpop.permute.xlu0 %5650 }
 0x3f3   : > { %v2520_v24 = vpop.f32.mrf.mxu2  ;;  %v8256_v30 = vpop.permute.xlu1 %5640 }
 0x3f4   : > { %v2521_v59 = vadd.f32 %v7935_v56, %v2520_v24  ;;  %v5990_v24 = vld [vmem:[#allocation3 + $0x68] sm:$0xff] }
 0x3f5   : > { %v8238_v9 = vpop.permute.xlu2 %5630  ;;  %v3846_v18 = vsel %vm2573_vm13, %v5990_v24, %v5558_v47  ;;  %v5598_v47 = vunpack.i.h.bf16 %v8161_v4 }
 0x3f6   : > { %5820 = vrot.lane.b32.xlu1 %v8224_v1, %s9441_s13  ;;  %v2566_v57 = vmax.f32 %v2521_v59, 0.0  ;;  %v3977_v59 = vsel %vm3968_vm4, %v3944_v27, %v5577_v5  ;;  %v3879_v55 = vsel %vm3869_vm1, %v3846_v18, %v5563_v43  ;;  %v5622_v5 = vunpack.i.l.bf16 %v8216_v25 }
 0x3f7   : > { %v4010_v40 = vsel %vm4001_vm5, %v3977_v59, %v5582_v7  ;;  %v3912_v44 = vsel %vm3902_vm2, %v3879_v55, %v5568_v37  ;;  %v5617_v43 = vunpack.i.l.bf16 %v8210_v31  ;;  %v5627_v27 = vunpack.i.l.bf16 %v8227_v17 }
 0x3f8   : > { %2645 = vst.msk [vmem:[#allocation3 + $0x141] sm:$0xff] %vm2573_vm13, %v2566_v57  ;;  %v5587_v57 = vunpack.i.l.bf16 %v8149_v48 }
 0x3fa   : > { %4219 = vmatmul.f32.gmra.mxu2 %v4041_v22  ;;  %v4043_v45 = vsel %vm4034_vm6, %v4010_v40, %v5587_v57  ;;  %v5573_v22 = vunpack.i.h.bf16 %v8125_v49  ;;  %v8310_v62 = vpop.permute.xlu0 %5665 }
 0x3fb   : > { %v8291_v8 = vpop.permute.xlu1 %5655 }
 0x3fc   : > { %v3945_v33 = vsel %vm3935_vm3, %v3912_v44, %v5573_v22  ;;  %v5613_v44 = vunpack.i.h.bf16 %v8195_v58  ;;  %v5608_v22 = vunpack.i.h.bf16 %v8191_v23 }
 0x3fd   : > { %v2523_v2 = vpop.f32.mrf.mxu2  ;;  %v8276_v35 = vpop.permute.xlu2 %5645  ;;  %v3978_v19 = vsel %vm3968_vm4, %v3945_v33, %v5578_v34  ;;  %v5632_v33 = vunpack.i.l.bf16 %v8238_v9 }
 0x3fe   : > { %5835 = vrot.lane.b32.xlu1 %v8169_v11, %s9444_s14  ;;  %v2524_v14 = vadd.f32 %v7935_v56, %v2523_v2  ;;  %v5588_v2 = vunpack.i.h.bf16 %v8149_v48  ;;  %v5607_v48 = vunpack.i.l.bf16 %v8191_v23 }
 0x3ff   : > { %v2931_v32 = vld [vmem:[#allocation3 + $0x13a] sm:$0xff]  ;;  %v2932_v3 = vld [vmem:[#allocation3 + $0x142] sm:$0xff] }
 0x400   : > { %v8262_v12 = vld [vmem:[#allocation3 + $0x140] sm:$0xff]  ;;  %v2567_v11 = vmax.f32 %v2524_v14, 0.0  ;;  %5271 = vmatmul.msk.f32.gmra.mxu3 %vm2573_vm13, %v2931_v32  ;;  %v5593_v14 = vunpack.i.h.bf16 %v8158_v10 }
 0x401   : > { %v2900_v20 = vld [vmem:[#allocation3 + $0x141] sm:$0xff]  ;;  %v5824_v6 = vpack.i.bf16 %v8262_v12, %v8259_v54 }
 0x402   : > { %v8270_v15 = vpack.i.bf16 %v2900_v20, %v2899_v26  ;;  %2646 = vst.msk [vmem:[#allocation3 + $0x151] sm:$0xff] %vm2573_vm13, %v2567_v11  ;;  %4222 = vmatmul.f32.gmra.mxu2 %v4042_v53  ;;  %v8321_v20 = vpack.i.bf16 %v2932_v3, %v2931_v32  ;;  %v3913_v11 = vsel %vm3902_vm2, %v3880_v46, %v5602_v13  ;;  %v5992_v10 = vld [vmem:[#allocation3 + $0x80] sm:$0xff]  ;;  %v8341_v24 = vpop.permute.xlu0 %5680 }
 0x403   : > { %5825 = vrot.lane.b32.xlu2 %v5824_v6, %s9445_s29  ;;  %v8319_v38 = vpop.permute.xlu1 %5670  ;;  %v3848_v32 = vsel %vm2573_vm13, %v5992_v10, %v5593_v14  ;;  %v3946_v16 = vsel %vm3935_vm3, %v3913_v11, %v5607_v48  ;;  %v5652_v11 = vunpack.i.l.bf16 %v8280_v60  ;;  %v5994_v48 = vld [vmem:[#allocation3 + $0x98] sm:$0xff] }
 0x404   : > { %5830 = vrot.lane.b32.xlu0 %v8270_v15, %s9440_s22  ;;  %v3881_v4 = vsel %vm3869_vm1, %v3848_v32, %v5598_v47  ;;  %v5638_v32 = vunpack.i.h.bf16 %v8247_v51 }
 0x405   : > { %v8306_v52 = vpop.permute.xlu2 %5660  ;;  %v3914_v59 = vsel %vm3902_vm2, %v3881_v4, %v5603_v41  ;;  %v5657_v4 = vunpack.i.l.bf16 %v8291_v8 }
 0x406   : > { %5850 = vrot.lane.b32.xlu1 %v8270_v15, %s9446_s16  ;;  %v3947_v23 = vsel %vm3935_vm3, %v3914_v59, %v5608_v22  ;;  %v5648_v22 = vunpack.i.h.bf16 %v8276_v35 }
 0x407   : > { %v3980_v42 = vsel %vm3968_vm4, %v3947_v23, %v5613_v44  ;;  %v5653_v44 = vunpack.i.h.bf16 %v8280_v60  ;;  %v5658_v60 = vunpack.i.h.bf16 %v8291_v8  ;;  %v5663_v23 = vunpack.i.h.bf16 %v8306_v52 }
 0x408   : > { %5272 = vmatmul.msk.f32.gmra.mxu3 %vm2573_vm13, %v2932_v3 }
 0x409   : > { %v2901_v18 = vld [vmem:[#allocation3 + $0x151] sm:$0xff] }
 0x40a   : > { %4225 = vmatmul.f32.gmra.mxu2 %v4043_v45  ;;  %v8343_v37 = vld [vmem:[#allocation3 + $0x150] sm:$0xff]  ;;  %v8380_v47 = vpop.permute.xlu0 %5695 }
 0x40b   : > { %5840 = vrot.lane.b32.xlu2 %v8224_v1, %s9442_s24  ;;  %v4011_v1 = vsel %vm4001_vm5, %v3978_v19, %v5583_v63  ;;  %v8346_v55 = vpop.permute.xlu1 %5685  ;;  %v5993_v63 = vld [vmem:[#allocation3 + $0x90] sm:$0xff] }
 0x40c   : > { %5845 = vrot.lane.b32.xlu0 %v5824_v6, %s9443_s12  ;;  %v2526_v21 = vpop.f32.mrf.mxu2  ;;  %v5612_v6 = vunpack.i.l.bf16 %v8195_v58  ;;  %v4044_v26 = vsel %vm4034_vm6, %v4011_v1, %v5588_v2  ;;  %v3849_v28 = vsel %vm2573_vm13, %v5993_v63, %v5627_v27  ;;  %v5637_v58 = vunpack.i.l.bf16 %v8247_v51 }
 0x40d   : > { %v2527_v49 = vadd.f32 %v7935_v56, %v2526_v21  ;;  %v8338_v7 = vpop.permute.xlu2 %5675  ;;  %v3882_v19 = vsel %vm3869_vm1, %v3849_v28, %v5632_v33  ;;  %v5628_v2 = vunpack.i.h.bf16 %v8227_v17 }
 0x40e   : > { %v3979_v53 = vsel %vm3968_vm4, %v3946_v16, %v5612_v6  ;;  %v3915_v13 = vsel %vm3902_vm2, %v3882_v19, %v5637_v58  ;;  %v5633_v16 = vunpack.i.h.bf16 %v8238_v9  ;;  %v5672_v58 = vunpack.i.l.bf16 %v8319_v38 }
 0x40f   : > { %v2568_v29 = vmax.f32 %v2527_v49, 0.0  ;;  %v4012_v57 = vsel %vm4001_vm5, %v3979_v53, %v5617_v43  ;;  %v5618_v49 = vunpack.i.h.bf16 %v8210_v31  ;;  %v3850_v10 = vsel %vm2573_vm13, %v5994_v48, %v5628_v2 }
 0x410   : > { %v4045_v34 = vsel %vm4034_vm6, %v4012_v57, %v5622_v5  ;;  %v3883_v53 = vsel %vm3869_vm1, %v3850_v10, %v5633_v16  ;;  %v5677_v2 = vunpack.i.l.bf16 %v8338_v7  ;;  %v5996_v10 = vld [vmem:[#allocation3 + $0xb0] sm:$0xff] }
 0x411   : > { %2647 = vst.msk [vmem:[#allocation3 + $0x159] sm:$0xff] %vm2573_vm13, %v2568_v29  ;;  %v5642_v29 = vunpack.i.l.bf16 %v8256_v30  ;;  %v3916_v27 = vsel %vm3902_vm2, %v3883_v53, %v5638_v32  ;;  %v3852_v32 = vsel %vm2573_vm13, %v5996_v10, %v5663_v23  ;;  %v5698_v23 = vunpack.i.h.bf16 %v8380_v47 }
 0x412   : > { %4228 = vmatmul.f32.gmra.mxu2 %v4044_v26  ;;  %v5647_v26 = vunpack.i.l.bf16 %v8276_v35  ;;  %v8414_v63 = vpop.permute.xlu0 %5710 }
 0x413   : > { %5855 = vrot.lane.b32.xlu2 %v8321_v20, %s9441_s13  ;;  %v8385_v6 = vpop.permute.xlu1 %5700  ;;  %v3948_v17 = vsel %vm3935_vm3, %v3915_v13, %v5642_v29  ;;  %v5668_v13 = vunpack.i.h.bf16 %v8310_v62  ;;  %v5687_v29 = vunpack.i.l.bf16 %v8346_v55 }
 0x414   : > { %v3981_v5 = vsel %vm3968_vm4, %v3948_v17, %v5647_v26  ;;  %v4443_v26 = vld [vmem:[%s9200_s7] sm:$0xff] }
 0x415   : > { %v8373_v46 = vpop.permute.xlu2 %5690  ;;  %v4014_v43 = vsel %vm4001_vm5, %v3981_v5, %v5652_v11  ;;  %v3885_v5 = vsel %vm3869_vm1, %v3852_v32, %v5668_v13  ;;  %v5999_v32 = vld [vmem:[%s9197_s4] ss:$0 sm:$0xff] }
 0x416   : > { %v4047_v57 = vsel %vm4034_vm6, %v4014_v43, %v5657_v4 }
 0x418   : > { %v2933_v40 = vld [vmem:[#allocation3 + $0x152] sm:$0xff]  ;;  %v2934_v14 = vld [vmem:[#allocation3 + $0x15a] sm:$0xff] }
 0x419   : > { %v2902_v3 = vld [vmem:[#allocation3 + $0x159] sm:$0xff]  ;;  %5273 = vmatmul.msk.f32.gmra.mxu3 %vm2573_vm13, %v2933_v40 }
 0x41a   : > { %v8349_v36 = vld [vmem:[#allocation3 + $0x158] sm:$0xff]  ;;  %v8354_v39 = vpack.i.bf16 %v2902_v3, %v2901_v18  ;;  %4231 = vmatmul.f32.gmra.mxu2 %v4045_v34  ;;  %v5643_v18 = vunpack.i.h.bf16 %v8256_v30  ;;  %v8408_v3 = vpack.i.bf16 %v2934_v14, %v2933_v40  ;;  %v5667_v34 = vunpack.i.l.bf16 %v8310_v62  ;;  %v5995_v40 = vld [vmem:[#allocation3 + $0xa8] sm:$0xff] }
 0x41b   : > { %v5859_v45 = vpack.i.bf16 %v8349_v36, %v8343_v37  ;;  %5870 = vrot.lane.b32.xlu2 %v8270_v15, %s9444_s14  ;;  %v2529_v21 = vpop.f32.mrf.mxu2  ;;  %v5623_v15 = vunpack.i.h.bf16 %v8216_v25  ;;  %v4013_v25 = vsel %vm4001_vm5, %v3980_v42, %v5618_v49  ;;  %v8419_v30 = vpop.permute.xlu1 %5715  ;;  %v5682_v42 = vunpack.i.l.bf16 %v8341_v24  ;;  %v4444_v62 = vld [vmem:[%s9200_s7 + $0x8] sm:$0xff] }
 0x41c   : > { %5865 = vrot.lane.b32.xlu1 %v8354_v39, %s9440_s22  ;;  %v2530_v61 = vadd.f32 %v7935_v56, %v2529_v21  ;;  %4559 = vmatpush.msrb.mxu1 %v4444_v62 }
 0x41d   : > { %5860 = vrot.lane.b32.xlu0 %v5859_v45, %s9445_s29  ;;  %v4046_v31 = vsel %vm4034_vm6, %v4013_v25, %v5623_v15  ;;  %v8404_v59 = vpop.permute.xlu2 %5705 }
 0x41e   : > { %v2569_v1 = vmax.f32 %v2530_v61, 0.0  ;;  %4560 = vmatpush.msrb.mxu1 %v4443_v26 }
 0x420   : > { %2648 = vst.msk [vmem:[#allocation3 + $0x169] sm:$0xff] %vm2573_vm13, %v2569_v1  ;;  %v8435_v1 = vpop.f32.mrf.mxu0 }
 0x421   : > { %5274 = vmatmul.msk.f32.gmra.mxu3 %vm2573_vm13, %v2934_v14 }
 0x422   : > { %4234 = vmatmul.f32.gmra.mxu2 %v4046_v31 }
 0x423   : > { %5885 = vrot.lane.b32.xlu2 %v8354_v39, %s9446_s16  ;;  %v8465_v53 = vpop.permute.xlu1 %5730 }
 0x424   : > { %5880 = vrot.lane.b32.xlu1 %v5859_v45, %s9443_s12  ;;  %v3949_v45 = vsel %vm3935_vm3, %v3916_v27, %v5643_v18  ;;  %v5692_v27 = vunpack.i.l.bf16 %v8373_v46  ;;  %v5683_v18 = vunpack.i.h.bf16 %v8341_v24  ;;  %v5732_v10 = vunpack.i.l.bf16 %v8465_v53 }
 0x425   : > { %5875 = vrot.lane.b32.xlu0 %v8321_v20, %s9442_s24  ;;  %v2532_v41 = vpop.f32.mrf.mxu2  ;;  %v5662_v20 = vunpack.i.l.bf16 %v8306_v52  ;;  %v3982_v21 = vsel %vm3968_vm4, %v3949_v45, %v5648_v22  ;;  %v8427_v61 = vpop.permute.xlu2 %5720 }
 0x426   : > { %v2533_v51 = vadd.f32 %v7935_v56, %v2532_v41  ;;  %v4015_v33 = vsel %vm4001_vm5, %v3982_v21, %v5653_v44  ;;  %v8442_v31 = vpop.permute.xlu0 %5725  ;;  %v5688_v44 = vunpack.i.h.bf16 %v8346_v55  ;;  %v5693_v21 = vunpack.i.h.bf16 %v8373_v46 }
 0x427   : > { %v3851_v28 = vsel %vm2573_vm13, %v5995_v40, %v5662_v20  ;;  %v4048_v49 = vsel %vm4034_vm6, %v4015_v33, %v5658_v60  ;;  %v2903_v19 = vld [vmem:[#allocation3 + $0x169] sm:$0xff]  ;;  %v5697_v20 = vunpack.i.l.bf16 %v8380_v47 }
 0x428   : > { %v2570_v9 = vmax.f32 %v2533_v51, 0.0  ;;  %v3884_v35 = vsel %vm3869_vm1, %v3851_v28, %v5667_v34  ;;  %v8433_v8 = vld [vmem:[#allocation3 + $0x168] sm:$0xff]  ;;  %v8483_v24 = vpop.f32.mrf.mxu0 }
 0x429   : > { %v3917_v15 = vsel %vm3902_vm2, %v3884_v35, %v5672_v58  ;;  %v5707_v35 = vunpack.i.l.bf16 %v8404_v59 }
 0x42a   : > { %4237 = vmatmul.f32.gmra.mxu2 %v4047_v57  ;;  %2649 = vst.msk [vmem:[#allocation3 + $0x171] sm:$0xff] %vm2573_vm13, %v2570_v9  ;;  %v3950_v48 = vsel %vm3935_vm3, %v3917_v15, %v5677_v2  ;;  %v5678_v57 = vunpack.i.h.bf16 %v8338_v7  ;;  %v5997_v7 = vld [vmem:[#allocation3 + $0xc0] sm:$0xff] }
 0x42b   : > { %v3983_v4 = vsel %vm3968_vm4, %v3950_v48, %v5682_v42  ;;  %v3853_v55 = vsel %vm2573_vm13, %v5997_v7, %v5697_v20  ;;  %v8497_v33 = vpop.permute.xlu1 %5745  ;;  %v5717_v42 = vunpack.i.l.bf16 %v8419_v30 }
 0x42c   : > { %v4016_v43 = vsel %vm4001_vm5, %v3983_v4, %v5687_v29  ;;  %v5998_v29 = vld [vmem:[#allocation3 + $0xc8] sm:$0xff] }
 0x42d   : > { %5890 = vrot.lane.b32.xlu0 %v8408_v3, %s9441_s13  ;;  %v4049_v9 = vsel %vm4034_vm6, %v4016_v43, %v5692_v27  ;;  %v8477_v34 = vpop.permute.xlu2 %5735  ;;  %v3854_v47 = vsel %vm2573_vm13, %v5998_v29, %v5698_v23  ;;  %v5718_v27 = vunpack.i.h.bf16 %v8419_v30 }
 0x42e   : > { %v8487_v40 = vpop.permute.xlu0 %5740 }
 0x430   : > { %v8517_v26 = vpop.f32.mrf.mxu0 }
 0x431   : > { %v2935_v14 = vld [vmem:[#allocation3 + $0x16a] sm:$0xff]  ;;  %v2936_v45 = vld [vmem:[#allocation3 + $0x172] sm:$0xff] }
 0x432   : > { %4240 = vmatmul.f32.gmra.mxu2 %v4048_v49  ;;  %v2904_v52 = vld [vmem:[#allocation3 + $0x171] sm:$0xff]  ;;  %5275 = vmatmul.msk.f32.gmra.mxu3 %vm2573_vm13, %v2935_v14  ;;  %v5712_v49 = vunpack.i.l.bf16 %v8414_v63  ;;  %v8505_v2 = vpack.i.bf16 %v2936_v45, %v2935_v14  ;;  %v5722_v14 = vunpack.i.l.bf16 %v8427_v61 }
 0x433   : > { %v8440_v25 = vld [vmem:[#allocation3 + $0x170] sm:$0xff]  ;;  %v8447_v11 = vpack.i.bf16 %v2904_v52, %v2903_v19  ;;  %v5703_v19 = vunpack.i.h.bf16 %v8385_v6  ;;  %v5727_v52 = vunpack.i.l.bf16 %v8442_v31 }
 0x434   : > { %v5894_v17 = vpack.i.bf16 %v8440_v25, %v8433_v8 }
 0x435   : > { %5905 = vrot.lane.b32.xlu0 %v8354_v39, %s9444_s14  ;;  %v5673_v39 = vunpack.i.h.bf16 %v8319_v38  ;;  %5900 = vrot.lane.b32.xlu2 %v8447_v11, %s9440_s22  ;;  %v2535_v16 = vpop.f32.mrf.mxu2  ;;  %v8507_v46 = vpop.permute.xlu2 %5750  ;;  %v3887_v48 = vsel %vm3869_vm1, %v3854_v47, %v5703_v19 }
 0x436   : > { %5895 = vrot.lane.b32.xlu1 %v5894_v17, %s9445_s29  ;;  %v2536_v41 = vadd.f32 %v7935_v56, %v2535_v16  ;;  %v5702_v56 = vunpack.i.l.bf16 %v8385_v6  ;;  %v5708_v16 = vunpack.i.h.bf16 %v8404_v59  ;;  %v8539_v59 = vld [vmem:[%s9199_s6] ss:$0 sm:$0xff] }
 0x437   : > { %v3918_v51 = vsel %vm3902_vm2, %v3885_v5, %v5673_v39 }
 0x438   : > { %v2571_v38 = vmax.f32 %v2536_v41, 0.0  ;;  %v3951_v22 = vsel %vm3935_vm3, %v3918_v51, %v5678_v57  ;;  %v3886_v60 = vsel %vm3869_vm1, %v3853_v55, %v5702_v56  ;;  %v3920_v43 = vsel %vm3902_vm2, %v3887_v48, %v5708_v16 }
 0x439   : > { %v3984_v28 = vsel %vm3968_vm4, %v3951_v22, %v5683_v18  ;;  %v3919_v15 = vsel %vm3902_vm2, %v3886_v60, %v5707_v35  ;;  %v5713_v51 = vunpack.i.h.bf16 %v8414_v63  ;;  %v6000_v18 = vld [vmem:[#allocation3 + $0xd8] sm:$0xff]  ;;  %v5737_v57 = vunpack.i.l.bf16 %v8477_v34 }
 0x43a   : > { %2650 = vst.msk [vmem:[#allocation3 + $0x181] sm:$0xff] %vm2573_vm13, %v2571_v38  ;;  %4243 = vmatmul.f32.gmra.mxu2 %v4049_v9  ;;  %5276 = vmatmul.msk.f32.gmra.mxu3 %vm2573_vm13, %v2936_v45  ;;  %v4017_v58 = vsel %vm4001_vm5, %v3984_v28, %v5688_v44  ;;  %v3952_v13 = vsel %vm3935_vm3, %v3919_v15, %v5712_v49  ;;  %v5742_v9 = vunpack.i.l.bf16 %v8487_v40  ;;  %v5728_v44 = vunpack.i.h.bf16 %v8442_v31 }
 0x43b   : > { %v3985_v6 = vsel %vm3968_vm4, %v3952_v13, %v5717_v42  ;;  %v3855_v20 = vsel %vm2573_vm13, %v6000_v18, %v5732_v10  ;;  %v3953_v30 = vsel %vm3935_vm3, %v3920_v43, %v5713_v51  ;;  %v5723_v22 = vunpack.i.h.bf16 %v8427_v61 }
 0x43c   : > { %v4018_v41 = vsel %vm4001_vm5, %v3985_v6, %v5722_v14  ;;  %v3888_v63 = vsel %vm3869_vm1, %v3855_v20, %v5737_v57  ;;  %v3986_v45 = vsel %vm3968_vm4, %v3953_v30, %v5718_v27  ;;  %v5733_v28 = vunpack.i.h.bf16 %v8465_v53 }
 0x43d   : > { %5920 = vrot.lane.b32.xlu0 %v8447_v11, %s9446_s16  ;;  %5915 = vrot.lane.b32.xlu2 %v5894_v17, %s9443_s12  ;;  %v4051_v38 = vsel %vm4034_vm6, %v4018_v41, %v5727_v52  ;;  %v3921_v7 = vsel %vm3902_vm2, %v3888_v63, %v5742_v9  ;;  %v8552_v60 = vpop.permute.xlu2 %5765  ;;  %v5747_v31 = vunpack.i.l.bf16 %v8497_v33  ;;  %v4019_v35 = vsel %vm4001_vm5, %v3986_v45, %v5723_v22  ;;  %v2907_v63 = vld [vmem:[#allocation3 + $0x199] sm:$0xff] }
 0x43e   : > { %5910 = vrot.lane.b32.xlu1 %v8408_v3, %s9442_s24  ;;  %v4050_v3 = vsel %vm4034_vm6, %v4017_v58, %v5693_v21  ;;  %v8526_v4 = vpop.permute.xlu1 %5760  ;;  %v8557_v21 = vpop.f32.mrf.mxu0  ;;  %v4052_v15 = vsel %vm4034_vm6, %v4019_v35, %v5728_v44  ;;  %v5752_v52 = vunpack.i.l.bf16 %v8507_v46  ;;  %v5743_v14 = vunpack.i.h.bf16 %v8487_v40 }
 0x43f   : > { %v8512_v17 = vpop.permute.xlu0 %5755  ;;  %v3954_v49 = vsel %vm3935_vm3, %v3921_v7, %v5747_v31  ;;  %v5738_v48 = vunpack.i.h.bf16 %v8477_v34  ;;  %v5762_v10 = vunpack.i.l.bf16 %v8526_v4  ;;  %v5748_v41 = vunpack.i.h.bf16 %v8497_v33 }
 0x440   : > { %v5757_v19 = vunpack.i.l.bf16 %v8512_v17  ;;  %v5767_v27 = vunpack.i.l.bf16 %v8552_v60  ;;  %v5758_v57 = vunpack.i.h.bf16 %v8512_v17  ;;  %v6002_v17 = vld [vmem:[#allocation3 + $0xf0] sm:$0xff]  ;;  %v5763_v22 = vunpack.i.h.bf16 %v8526_v4 }
 0x441   : > { %v2873_v23 = vld [vmem:[#allocation3 + $0x180] sm:$0xff]  ;;  %v5768_v35 = vunpack.i.h.bf16 %v8552_v60 }
 0x442   : > { %4246 = vmatmul.f32.gmra.mxu2 %v4050_v3  ;;  %v2810_v61 = vld [vmem:[#allocation3 + $0x181] sm:$0xff]  ;;  %v3857_v45 = vsel %vm2573_vm13, %v6002_v17, %v5767_v27 }
 0x445   : > { %v2538_v62 = vpop.f32.mrf.mxu2 }
 0x446   : > { %5925 = vrot.lane.b32.xlu1 %v8505_v2, %s9441_s13  ;;  %v2539_v39 = vadd.f32 %v5999_v32, %v2538_v62  ;;  %v8566_v13 = vpop.permute.xlu1 %5775  ;;  %v6001_v62 = vld [vmem:[#allocation3 + $0xe0] sm:$0xff]  ;;  %v8594_v9 = vpop.f32.mrf.mxu0 }
 0x447   : > { %v8555_v58 = vpop.permute.xlu0 %5770  ;;  %v3856_v6 = vsel %vm2573_vm13, %v6001_v62, %v5733_v28  ;;  %v5777_v7 = vunpack.i.l.bf16 %v8566_v13  ;;  %v6003_v62 = vld [vmem:[#allocation3 + $0xf8] sm:$0xff] }
 0x448   : > { %v2572_v5 = vmax.f32 %v2539_v39, 0.0  ;;  %v3987_v39 = vsel %vm3968_vm4, %v3954_v49, %v5752_v52  ;;  %v3889_v16 = vsel %vm3869_vm1, %v3856_v6, %v5738_v48  ;;  %v5772_v30 = vunpack.i.l.bf16 %v8555_v58 }
 0x449   : > { %v4020_v40 = vsel %vm4001_vm5, %v3987_v39, %v5757_v19  ;;  %v3922_v34 = vsel %vm3902_vm2, %v3889_v16, %v5743_v14  ;;  %v5778_v6 = vunpack.i.h.bf16 %v8566_v13 }
 0x44a   : > { %2651 = vst.msk [vmem:[#allocation3 + $0x189] sm:$0xff] %vm2573_vm13, %v2572_v5  ;;  %4249 = vmatmul.f32.gmra.mxu2 %v4051_v38  ;;  %v8587_v38 = vpop.permute.xlu2 %5780  ;;  %v4053_v18 = vsel %vm4034_vm6, %v4020_v40, %v5762_v10  ;;  %v3955_v33 = vsel %vm3935_vm3, %v3922_v34, %v5748_v41 }
 0x44b   : > { %v5783_v41 = vunpack.i.h.bf16 %v8587_v38 }
 0x44d   : > { %v4202_v56 = vpop.f32.mrf.mxu2 }
 0x44e   : > { %5940 = vrot.lane.b32.xlu1 %v8447_v11, %s9444_s14  ;;  %v4203_v55 = vadd.f32 %v8539_v59, %v4202_v56  ;;  %v5753_v56 = vunpack.i.h.bf16 %v8507_v46  ;;  %v3890_v46 = vsel %vm3869_vm1, %v3857_v45, %v5772_v30 }
 0x44f   : > { %v8589_v51 = vpop.permute.xlu0 %5785 }
 0x450   : > { %v4316_v11 = vadd.f32 %v8435_v1, %v4203_v55  ;;  %v3988_v28 = vsel %vm3968_vm4, %v3955_v33, %v5753_v56  ;;  %v5788_v13 = vunpack.i.h.bf16 %v8589_v51 }
 0x451   : > { %v8562_v42 = vld [vmem:[#allocation3 + $0x182] sm:$0xff]  ;;  %v8592_v20 = vld [vmem:[#allocation3 + $0x18a] sm:$0xff] }
 0x452   : > { %v2874_v3 = vld [vmem:[#allocation3 + $0x188] sm:$0xff]  ;;  %v4411_v29 = vmax.f32 %v4316_v11, 0.0  ;;  %4252 = vmatmul.f32.gmra.mxu2 %v4052_v15  ;;  %5277 = vmatmul.msk.f32.gmra.mxu3 %vm2573_vm13, %v8562_v42  ;;  %v5796_v4 = vpop.permute.xlu2 %5795 }
 0x453   : > { %v2811_v53 = vld [vmem:[#allocation3 + $0x189] sm:$0xff]  ;;  %v5929_v1 = vpack.i.bf16 %v2874_v3, %v2873_v23  ;;  %v3923_v23 = vsel %vm3902_vm2, %v3890_v46, %v5777_v7  ;;  %v5782_v3 = vunpack.i.l.bf16 %v8587_v38  ;;  %v5797_v39 = vunpack.i.l.bf16 %v5796_v4 }
 0x454   : > { %v5954_v47 = vpack.i.bf16 %v2811_v53, %v2810_v61  ;;  %5281 = vmatmul.msk.f32.vlgmr.msrb.gmra.mxu1 %vm2573_vm13, %v4411_v29  ;;  %v5787_v61 = vunpack.i.l.bf16 %v8589_v51  ;;  %v5773_v53 = vunpack.i.h.bf16 %v8555_v58  ;;  %v2875_v29 = vld [vmem:[#allocation3 + $0x198] sm:$0xff]  ;;  %v3858_v58 = vsel %vm2573_vm13, %v6003_v62, %v5768_v35  ;;  %v6004_v51 = vld [vmem:[#allocation3 + $0x108] sm:$0xff] }
 0x455   : > { %5930 = vrot.lane.b32.xlu2 %v5929_v1, %s9445_s29  ;;  %v4205_v32 = vpop.f32.mrf.mxu2  ;;  %v3956_v52 = vsel %vm3935_vm3, %v3923_v23, %v5782_v3 }
 0x456   : > { %5955 = vrot.lane.b32.xlu1 %v5954_v47, %s9446_s16  ;;  %5935 = vrot.lane.b32.xlu0 %v5954_v47, %s9440_s22  ;;  %v4206_v5 = vadd.f32 %v8539_v59, %v4205_v32  ;;  %v8624_v47 = vpop.f32.mrf.mxu0  ;;  %v3989_v48 = vsel %vm3968_vm4, %v3956_v52, %v5787_v61  ;;  %v3891_v10 = vsel %vm3869_vm1, %v3858_v58, %v5773_v53 }
 0x458   : > { %v4319_v43 = vadd.f32 %v8483_v24, %v4206_v5  ;;  %v8598_v44 = vpop.permute.xlu1 %5790  ;;  %v3924_v5 = vsel %vm3902_vm2, %v3891_v10, %v5778_v6 }
 0x459   : > { %v5792_v49 = vunpack.i.l.bf16 %v8598_v44 }
 0x45a   : > { %4255 = vmatmul.f32.gmra.mxu2 %v4053_v18  ;;  %5278 = vmatmul.msk.f32.gmra.mxu3 %vm2573_vm13, %v8592_v20  ;;  %v4412_v24 = vmax.f32 %v4319_v43, 0.0  ;;  %v5793_v43 = vunpack.i.h.bf16 %v8598_v44  ;;  %v5811_v30 = vpop.permute.xlu2 %5810 }
 0x45b   : > { %v4022_v32 = vsel %vm4001_vm5, %v3989_v48, %v5792_v49  ;;  %v5812_v7 = vunpack.i.l.bf16 %v5811_v30 }
 0x45c   : > { %5282 = vmatmul.msk.f32.gmra.mxu1 %vm2573_vm13, %v4412_v24  ;;  %v4055_v34 = vsel %vm4034_vm6, %v4022_v32, %v5797_v39 }
 0x45d   : > { %5945 = vrot.lane.b32.xlu2 %v8505_v2, %s9442_s24  ;;  %v4208_v55 = vpop.f32.mrf.mxu2  ;;  %v4021_v2 = vsel %vm4001_vm5, %v3988_v28, %v5758_v57  ;;  %v2876_v57 = vld [vmem:[#allocation3 + $0x1a0] sm:$0xff]  ;;  %s9447_s24 = smov 3  }
 0x45e   : > { %5950 = vrot.lane.b32.xlu0 %v5929_v1, %s9443_s12  ;;  %3801 = vrot.lane.b32.xlu1 %v2907_v63, %s9440_s22  ;;  %v4209_v31 = vadd.f32 %v8539_v59, %v4208_v55  ;;  %v4054_v15 = vsel %vm4034_vm6, %v4021_v2, %v5763_v22  ;;  %v2908_v1 = vld [vmem:[#allocation3 + $0x1a1] sm:$0xff]  ;;  %v4333_v63 = vpop.f32.mrf.mxu0  ;;  %v5798_v22 = vunpack.i.h.bf16 %v5796_v4  ;;  %v6005_v4 = vld [vmem:[#allocation3 + $0x110] sm:$0xff]  ;;  %s377_s12 = sand.u32 1, %s6063_s18  }
 0x45f   : > { %s5181_s14 = sshll.u32 %s377_s12, 8 }
 0x460   : > { %v4322_v11 = vadd.f32 %v8517_v26, %v4209_v31  ;;  %v5801_v26 = vpop.permute.xlu0 %5800  ;;  %v8626_v60 = vpop.permute.xlu1 %5805  ;;  %s8948_s0 = scalar_lea.vmem [#allocation4], %s5181_s14 }
 0x461   : > { %v5802_v40 = vunpack.i.l.bf16 %v5801_v26  ;;  %v5807_v27 = vunpack.i.l.bf16 %v8626_v60  ;;  %v5803_v28 = vunpack.i.h.bf16 %v5801_v26  ;;  %v5808_v35 = vunpack.i.h.bf16 %v8626_v60 }
 0x462   : > { %4258 = vmatmul.f32.gmra.mxu2 %v4054_v15  ;;  %v4413_v19 = vmax.f32 %v4322_v11, 0.0  ;;  %v5826_v61 = vpop.permute.xlu2 %5825  ;;  %v5813_v60 = vunpack.i.h.bf16 %v5811_v30 }
 0x463   : > { %v3859_v24 = vsel %vm2573_vm13, %v6004_v51, %v5802_v40  ;;  %v3860_v3 = vsel %vm2573_vm13, %v6005_v4, %v5803_v28  ;;  %v6006_v51 = vld [vmem:[#allocation3 + $0x120] sm:$0xff] }
 0x464   : > { %5283 = vmatmul.msk.f32.gmra.mxu1 %vm2573_vm13, %v4413_v19  ;;  %v3892_v56 = vsel %vm3869_vm1, %v3859_v24, %v5807_v27  ;;  %v5827_v19 = vunpack.i.l.bf16 %v5826_v61 }
 0x465   : > { %3545 = vrot.lane.b32.xlu2 %v8562_v42, %s9441_s13  ;;  %v4211_v14 = vpop.f32.mrf.mxu2  ;;  %v3925_v46 = vsel %vm3902_vm2, %v3892_v56, %v5812_v7 }
 0x466   : > { %3673 = vrot.lane.b32.xlu0 %v2875_v29, %s9445_s29  ;;  %3803 = vrot.lane.b32.xlu1 %v2908_v1, %s9440_s22  ;;  %v4212_v42 = vadd.f32 %v8539_v59, %v4211_v14  ;;  %v3893_v29 = vsel %vm3869_vm1, %v3860_v3, %v5808_v35  ;;  %v4336_v52 = vpop.f32.mrf.mxu0  ;;  %s5112_s22 = sshll.u32 %s8948_s0, 4  ;;  %s5113_s22 = int_to_ptr.vmem [resolvable:$true] %s5112_s22 }
 0x467   : > { %v3926_v6 = vsel %vm3902_vm2, %v3893_v29, %v5813_v60 }
 0x468   : > { %v4325_v16 = vadd.f32 %v8557_v21, %v4212_v42  ;;  %v3957_v21 = vsel %vm3935_vm3, %v3924_v5, %v5783_v41  ;;  %v5816_v33 = vpop.permute.xlu0 %5815  ;;  %v5821_v17 = vpop.permute.xlu1 %5820 }
 0x469   : > { %v3990_v44 = vsel %vm3968_vm4, %v3957_v21, %v5788_v13  ;;  %v5822_v31 = vunpack.i.l.bf16 %v5821_v17  ;;  %v5817_v11 = vunpack.i.l.bf16 %v5816_v33  ;;  %v5823_v14 = vunpack.i.h.bf16 %v5821_v17 }
 0x46a   : > { %4261 = vmatmul.f32.gmra.mxu2 %v4055_v34  ;;  %v4414_v18 = vmax.f32 %v4325_v16, 0.0  ;;  %v5818_v10 = vunpack.i.h.bf16 %v5816_v33  ;;  %v5841_v34 = vpop.permute.xlu2 %5840 }
 0x46b   : > { %v3958_v15 = vsel %vm3935_vm3, %v3925_v46, %v5817_v11  ;;  %v5842_v56 = vunpack.i.l.bf16 %v5841_v34  ;;  %v6007_v46 = vld [vmem:[#allocation3 + $0x128] sm:$0xff]  ;;  %v5843_v35 = vunpack.i.h.bf16 %v5841_v34 }
 0x46c   : > { %5284 = vmatmul.msk.f32.gmra.mxu1 %vm2573_vm13, %v4414_v18  ;;  %v3991_v49 = vsel %vm3968_vm4, %v3958_v15, %v5822_v31  ;;  %v3959_v39 = vsel %vm3935_vm3, %v3926_v6, %v5818_v10 }
 0x46d   : > { %3547 = vrot.lane.b32.xlu2 %v8592_v20, %s9441_s13  ;;  %v4214_v38 = vpop.f32.mrf.mxu2  ;;  %v4023_v20 = vsel %vm4001_vm5, %v3990_v44, %v5793_v43  ;;  %v4024_v58 = vsel %vm4001_vm5, %v3991_v49, %v5827_v19  ;;  %v3992_v13 = vsel %vm3968_vm4, %v3959_v39, %v5823_v14 }
 0x46e   : > { %3675 = vrot.lane.b32.xlu0 %v2876_v57, %s9445_s29  ;;  %v4215_v45 = vadd.f32 %v8539_v59, %v4214_v38  ;;  %v4056_v2 = vsel %vm4034_vm6, %v4023_v20, %v5798_v22  ;;  %v4339_v57 = vpop.f32.mrf.mxu0 }
 0x470   : > { %v4328_v55 = vadd.f32 %v8594_v9, %v4215_v45  ;;  %v5836_v32 = vpop.permute.xlu1 %5835 }
 0x471   : > { %v5837_v27 = vunpack.i.l.bf16 %v5836_v32  ;;  %v5838_v17 = vunpack.i.h.bf16 %v5836_v32 }
 0x472   : > { %4264 = vmatmul.f32.gmra.mxu2 %v4056_v2  ;;  %v4415_v23 = vmax.f32 %v4328_v55, 0.0  ;;  %v5856_v22 = vpop.permute.xlu2 %5855 }
 0x473   : > { %v3861_v24 = vsel %vm2573_vm13, %v6006_v51, %v5837_v27  ;;  %v3862_v31 = vsel %vm2573_vm13, %v6007_v46, %v5838_v17  ;;  %v5858_v14 = vunpack.i.h.bf16 %v5856_v22 }
 0x474   : > { %5285 = vmatmul.msk.f32.gmra.mxu1 %vm2573_vm13, %v4415_v23  ;;  %v3894_v45 = vsel %vm3869_vm1, %v3861_v24, %v5842_v56  ;;  %v3895_v3 = vsel %vm3869_vm1, %v3862_v31, %v5843_v35 }
 0x475   : > { %v4217_v53 = vpop.f32.mrf.mxu2 }
 0x476   : > { %v5831_v9 = vpop.permute.xlu0 %5830  ;;  %v4218_v26 = vadd.f32 %v8539_v59, %v4217_v53  ;;  %v4342_v11 = vpop.f32.mrf.mxu0 }
 0x477   : > { %v5832_v1 = vunpack.i.l.bf16 %v5831_v9  ;;  %v5833_v16 = vunpack.i.h.bf16 %v5831_v9 }
 0x478   : > { %v4331_v62 = vadd.f32 %v8624_v47, %v4218_v26  ;;  %v5828_v47 = vunpack.i.h.bf16 %v5826_v61  ;;  %v5851_v33 = vpop.permute.xlu1 %5850  ;;  %v5857_v61 = vunpack.i.l.bf16 %v5856_v22 }
 0x479   : > { %v4057_v48 = vsel %vm4034_vm6, %v4024_v58, %v5832_v1  ;;  %v5852_v55 = vunpack.i.l.bf16 %v5851_v33  ;;  %v5853_v26 = vunpack.i.h.bf16 %v5851_v33 }
 0x47a   : > { %4267 = vmatmul.f32.gmra.mxu2 %v4057_v48  ;;  %v4416_v42 = vmax.f32 %v4331_v62, 0.0  ;;  %v4025_v43 = vsel %vm4001_vm5, %v3992_v13, %v5828_v47  ;;  %v5871_v48 = vpop.permute.xlu2 %5870 }
 0x47b   : > { %v4058_v18 = vsel %vm4034_vm6, %v4025_v43, %v5833_v16  ;;  %v5872_v43 = vunpack.i.l.bf16 %v5871_v48 }
 0x47c   : > { %5286 = vmatmul.msk.f32.gmra.mxu1 %vm2573_vm13, %v4416_v42 }
 0x47d   : > { %v4220_v5 = vpop.f32.mrf.mxu2  ;;  %v3863_v24 = vsel %vm2573_vm13, %v8259_v54, %v5872_v43 }
 0x47e   : > { %v4221_v40 = vadd.f32 %v8539_v59, %v4220_v5  ;;  %v5846_v30 = vpop.permute.xlu0 %5845  ;;  %v4345_v5 = vpop.f32.mrf.mxu0 }
 0x47f   : > { %v5847_v38 = vunpack.i.l.bf16 %v5846_v30  ;;  %v5848_v2 = vunpack.i.h.bf16 %v5846_v30 }
 0x480   : > { %v4334_v41 = vadd.f32 %v4333_v63, %v4221_v40 }
 0x481   : > { %v3927_v7 = vsel %vm3902_vm2, %v3894_v45, %v5847_v38  ;;  %v3928_v19 = vsel %vm3902_vm2, %v3895_v3, %v5848_v2 }
 0x482   : > { %4270 = vmatmul.f32.gmra.mxu2 %v4058_v18  ;;  %v4417_v21 = vmax.f32 %v4334_v41, 0.0  ;;  %v3960_v23 = vsel %vm3935_vm3, %v3927_v7, %v5852_v55  ;;  %v3961_v6 = vsel %vm3935_vm3, %v3928_v19, %v5853_v26  ;;  %v5886_v27 = vpop.permute.xlu2 %5885 }
 0x483   : > { %v3993_v1 = vsel %vm3968_vm4, %v3960_v23, %v5857_v61  ;;  %v3994_v32 = vsel %vm3968_vm4, %v3961_v6, %v5858_v14  ;;  %v5887_v7 = vunpack.i.l.bf16 %v5886_v27 }
 0x484   : > { %5287 = vmatmul.msk.f32.gmra.mxu1 %vm2573_vm13, %v4417_v21 }
 0x485   : > { %v4223_v44 = vpop.f32.mrf.mxu2 }
 0x486   : > { %v4224_v63 = vadd.f32 %v8539_v59, %v4223_v44  ;;  %v4348_v51 = vpop.f32.mrf.mxu0 }
 0x488   : > { %v4337_v20 = vadd.f32 %v4336_v52, %v4224_v63  ;;  %v5873_v63 = vunpack.i.h.bf16 %v5871_v48 }
 0x48a   : > { %v4418_v28 = vmax.f32 %v4337_v20, 0.0  ;;  %v3864_v46 = vsel %vm2573_vm13, %v8262_v12, %v5873_v63 }
 0x48c   : > { %5288 = vmatmul.msk.f32.gmra.mxu1 %vm2573_vm13, %v4418_v28 }
 0x48d   : > { %v4226_v49 = vpop.f32.mrf.mxu2 }
 0x48e   : > { %v5866_v15 = vpop.permute.xlu1 %5865  ;;  %v4227_v29 = vadd.f32 %v8539_v59, %v4226_v49 }
 0x48f   : > { %v5861_v4 = vpop.permute.xlu0 %5860  ;;  %v5867_v9 = vunpack.i.l.bf16 %v5866_v15  ;;  %v5868_v42 = vunpack.i.h.bf16 %v5866_v15  ;;  %v5901_v55 = vpop.permute.xlu2 %5900 }
 0x490   : > { %v5862_v53 = vunpack.i.l.bf16 %v5861_v4  ;;  %v4340_v52 = vadd.f32 %v4339_v57, %v4227_v29  ;;  %v5863_v58 = vunpack.i.h.bf16 %v5861_v4  ;;  %v5902_v61 = vunpack.i.l.bf16 %v5901_v55 }
 0x491   : > { %v5888_v29 = vunpack.i.h.bf16 %v5886_v27  ;;  %v5903_v14 = vunpack.i.h.bf16 %v5901_v55  ;;  %v2939_v27 = vld [vmem:[#allocation3 + $0x19a] sm:$0xff]  ;;  %v2940_v55 = vld [vmem:[#allocation3 + $0x1a2] sm:$0xff] }
 0x492   : > { %v4026_v60 = vsel %vm4001_vm5, %v3993_v1, %v5862_v53  ;;  %v4419_v10 = vmax.f32 %v4340_v52, 0.0  ;;  %v4027_v16 = vsel %vm4001_vm5, %v3994_v32, %v5863_v58  ;;  %5279 = vmatmul.msk.f32.gmra.mxu3 %vm2573_vm13, %v2939_v27 }
 0x493   : > { %v4059_v62 = vsel %vm4034_vm6, %v4026_v60, %v5867_v9  ;;  %v4060_v34 = vsel %vm4034_vm6, %v4027_v16, %v5868_v42  ;;  %v4351_v9 = vpop.f32.mrf.mxu0 }
 0x494   : > { %4273 = vmatmul.f32.gmra.mxu2 %v4059_v62  ;;  %5289 = vmatmul.msk.f32.gmra.mxu1 %vm2573_vm13, %v4419_v10 }
 0x495   : > { %v4229_v39 = vpop.f32.mrf.mxu2 }
 0x496   : > { %v4230_v13 = vadd.f32 %v8539_v59, %v4229_v39  ;;  %v5881_v18 = vpop.permute.xlu1 %5880 }
 0x497   : > { %v5876_v47 = vpop.permute.xlu0 %5875  ;;  %v5882_v33 = vunpack.i.l.bf16 %v5881_v18  ;;  %v5883_v54 = vunpack.i.h.bf16 %v5881_v18 }
 0x498   : > { %v4343_v40 = vadd.f32 %v4342_v11, %v4230_v13  ;;  %v5877_v57 = vunpack.i.l.bf16 %v5876_v47  ;;  %v5878_v45 = vunpack.i.h.bf16 %v5876_v47  ;;  %v5916_v13 = vpop.permute.xlu2 %5915 }
 0x49a   : > { %v4420_v41 = vmax.f32 %v4343_v40, 0.0  ;;  %v3896_v44 = vsel %vm3869_vm1, %v3863_v24, %v5877_v57  ;;  %v3897_v11 = vsel %vm3869_vm1, %v3864_v46, %v5878_v45  ;;  %5280 = vmatmul.msk.f32.gmra.mxu3 %vm2573_vm13, %v2940_v55 }
 0x49b   : > { %v3929_v20 = vsel %vm3902_vm2, %v3896_v44, %v5882_v33  ;;  %v3930_v53 = vsel %vm3902_vm2, %v3897_v11, %v5883_v54  ;;  %v4354_v32 = vpop.f32.mrf.mxu0  ;;  %v5917_v33 = vunpack.i.l.bf16 %v5916_v13  ;;  %v5918_v11 = vunpack.i.h.bf16 %v5916_v13 }
 0x49c   : > { %4276 = vmatmul.f32.gmra.mxu2 %v4060_v34  ;;  %5290 = vmatmul.msk.f32.gmra.mxu1 %vm2573_vm13, %v4420_v41  ;;  %v3962_v23 = vsel %vm3935_vm3, %v3929_v20, %v5887_v7  ;;  %v3963_v60 = vsel %vm3935_vm3, %v3930_v53, %v5888_v29 }
 0x49d   : > { %v4232_v30 = vpop.f32.mrf.mxu2 }
 0x49e   : > { %v4233_v21 = vadd.f32 %v8539_v59, %v4232_v30 }
 0x49f   : > { %v5891_v56 = vpop.permute.xlu0 %5890 }
 0x4a0   : > { %v4346_v38 = vadd.f32 %v4345_v5, %v4233_v21  ;;  %v5892_v22 = vunpack.i.l.bf16 %v5891_v56  ;;  %v5893_v49 = vunpack.i.h.bf16 %v5891_v56 }
 0x4a2   : > { %v4421_v17 = vmax.f32 %v4346_v38, 0.0  ;;  %v3995_v4 = vsel %vm3968_vm4, %v3962_v23, %v5892_v22  ;;  %v3996_v58 = vsel %vm3968_vm4, %v3963_v60, %v5893_v49  ;;  %v8741_v49 = vld [vmem:[%s9201_s8] ss:$0 sm:$0xff] }
 0x4a3   : > { %v4357_v21 = vpop.f32.mrf.mxu0 }
 0x4a4   : > { %5291 = vmatmul.msk.f32.gmra.mxu1 %vm2573_vm13, %v4421_v17 }
 0x4a5   : > { %v4235_v28 = vpop.f32.mrf.mxu2 }
 0x4a6   : > { %v4236_v31 = vadd.f32 %v8539_v59, %v4235_v28 }
 0x4a7   : > { %v5906_v39 = vpop.permute.xlu0 %5905 }
 0x4a8   : > { %v5896_v2 = vpop.permute.xlu1 %5895  ;;  %v4349_v15 = vadd.f32 %v4348_v51, %v4236_v31  ;;  %v5907_v34 = vunpack.i.l.bf16 %v5906_v39  ;;  %v5908_v56 = vunpack.i.h.bf16 %v5906_v39 }
 0x4a9   : > { %v5897_v35 = vunpack.i.l.bf16 %v5896_v2  ;;  %v5898_v1 = vunpack.i.h.bf16 %v5896_v2 }
 0x4aa   : > { %v4422_v12 = vmax.f32 %v4349_v15, 0.0  ;;  %v3865_v57 = vsel %vm2573_vm13, %v8343_v37, %v5907_v34  ;;  %v3866_v28 = vsel %vm2573_vm13, %v8349_v36, %v5908_v56 }
 0x4ab   : > { %v4028_v3 = vsel %vm4001_vm5, %v3995_v4, %v5897_v35  ;;  %v4029_v6 = vsel %vm4001_vm5, %v3996_v58, %v5898_v1 }
 0x4ac   : > { %v4061_v19 = vsel %vm4034_vm6, %v4028_v3, %v5902_v61  ;;  %5292 = vmatmul.msk.f32.gmra.mxu1 %vm2573_vm13, %v4422_v12  ;;  %v4062_v42 = vsel %vm4034_vm6, %v4029_v6, %v5903_v14 }
 0x4ad   : > { %4279 = vmatmul.f32.gmra.mxu2 %v4061_v19  ;;  %v4238_v26 = vpop.f32.mrf.mxu2 }
 0x4ae   : > { %v4239_v52 = vadd.f32 %v8539_v59, %v4238_v26 }
 0x4af   : > { %v5921_v51 = vpop.permute.xlu0 %5920  ;;  %v5931_v38 = vpop.permute.xlu2 %5930 }
 0x4b0   : > { %v5911_v62 = vpop.permute.xlu1 %5910  ;;  %v4352_v48 = vadd.f32 %v4351_v9, %v4239_v52  ;;  %v5922_v22 = vunpack.i.l.bf16 %v5921_v51  ;;  %v5932_v54 = vunpack.i.l.bf16 %v5931_v38  ;;  %v5923_v53 = vunpack.i.h.bf16 %v5921_v51 }
 0x4b1   : > { %v5912_v43 = vunpack.i.l.bf16 %v5911_v62  ;;  %v5913_v7 = vunpack.i.h.bf16 %v5911_v62  ;;  %v5933_v26 = vunpack.i.h.bf16 %v5931_v38 }
 0x4b2   : > { %v4423_v10 = vmax.f32 %v4352_v48, 0.0 }
 0x4b3   : > { %v3898_v24 = vsel %vm3869_vm1, %v3865_v57, %v5912_v43  ;;  %v3899_v31 = vsel %vm3869_vm1, %v3866_v28, %v5913_v7 }
 0x4b4   : > { %5293 = vmatmul.msk.f32.gmra.mxu1 %vm2573_vm13, %v4423_v10  ;;  %v3931_v63 = vsel %vm3902_vm2, %v3898_v24, %v5917_v33  ;;  %v3932_v61 = vsel %vm3902_vm2, %v3899_v31, %v5918_v11  ;;  %v2924_v31 = vld [vmem:[#allocation3 + $0xe2] sm:$0xff] }
 0x4b5   : > { %4282 = vmatmul.f32.gmra.mxu2 %v4062_v42  ;;  %v4241_v16 = vpop.f32.mrf.mxu2  ;;  %v3964_v37 = vsel %vm3935_vm3, %v3931_v63, %v5922_v22  ;;  %v3965_v12 = vsel %vm3935_vm3, %v3932_v61, %v5923_v53 }
 0x4b6   : > { %v4242_v5 = vadd.f32 %v8539_v59, %v4241_v16 }
 0x4b7   : > { %v5946_v15 = vpop.permute.xlu2 %5945 }
 0x4b8   : > { %v4355_v47 = vadd.f32 %v4354_v32, %v4242_v5  ;;  %v5926_v40 = vpop.permute.xlu1 %5925  ;;  %v5947_v60 = vunpack.i.l.bf16 %v5946_v15 }
 0x4b9   : > { %v5927_v17 = vunpack.i.l.bf16 %v5926_v40  ;;  %v5928_v4 = vunpack.i.h.bf16 %v5926_v40 }
 0x4ba   : > { %v4424_v41 = vmax.f32 %v4355_v47, 0.0 }
 0x4bb   : > { %v3997_v46 = vsel %vm3968_vm4, %v3964_v37, %v5927_v17  ;;  %v3998_v1 = vsel %vm3968_vm4, %v3965_v12, %v5928_v4 }
 0x4bc   : > { %5294 = vmatmul.msk.f32.gmra.mxu1 %vm2573_vm13, %v4424_v41  ;;  %v4030_v23 = vsel %vm4001_vm5, %v3997_v46, %v5932_v54  ;;  %v4031_v10 = vsel %vm4001_vm5, %v3998_v1, %v5933_v26  ;;  %v5948_v41 = vunpack.i.h.bf16 %v5946_v15 }
 0x4bd   : > { %v4244_v18 = vpop.f32.mrf.mxu2 }
 0x4be   : > { %v4245_v30 = vadd.f32 %v8539_v59, %v4244_v18 }
 0x4bf   : > { %v3546_v5 = vpop.permute.xlu2 %3545 }
 0x4c0   : > { %v4358_v44 = vadd.f32 %v4357_v21, %v4245_v30  ;;  %v5941_v20 = vpop.permute.xlu1 %5940 }
 0x4c1   : > { %v5942_v3 = vunpack.i.l.bf16 %v5941_v20  ;;  %v5943_v6 = vunpack.i.h.bf16 %v5941_v20 }
 0x4c2   : > { %v4425_v45 = vmax.f32 %v4358_v44, 0.0 }
 0x4c3   : > { %v3867_v19 = vsel %vm2573_vm13, %v8433_v8, %v5942_v3  ;;  %v3868_v40 = vsel %vm2573_vm13, %v8440_v25, %v5943_v6 }
 0x4c4   : > { %5295 = vmatmul.msk.f32.gmra.mxu1 %vm2573_vm13, %v4425_v45  ;;  %v3900_v14 = vsel %vm3869_vm1, %v3867_v19, %v5947_v60  ;;  %v3901_v18 = vsel %vm3869_vm1, %v3868_v40, %v5948_v41  ;;  %v4853_v60 = vld [vmem:[%s9202_s9 + $0x18] sm:$0xff]  ;;  %v4363_v40 = vpop.f32.mrf.mxu3 }
 0x4c5   : > { %v8750_v42 = vpop.f32.mrf.mxu2  ;;  %4966 = vmatpush.msrb.mxu3 %v4853_v60 }
 0x4c7   : > { %v3548_v56 = vpop.permute.xlu2 %3547 }
 0x4c8   : > { %v5936_v2 = vpop.permute.xlu0 %5935  ;;  %v5956_v36 = vpop.permute.xlu1 %5955 }
 0x4c9   : > { %v5937_v35 = vunpack.i.l.bf16 %v5936_v2  ;;  %v5938_v29 = vunpack.i.h.bf16 %v5936_v2  ;;  %v5957_v32 = vunpack.i.l.bf16 %v5956_v36  ;;  %v5958_v33 = vunpack.i.h.bf16 %v5956_v36 }
 0x4cb   : > { %v4063_v9 = vsel %vm4034_vm6, %v4030_v23, %v5937_v35  ;;  %v4064_v39 = vsel %vm4034_vm6, %v4031_v10, %v5938_v29 }
 0x4cc   : > { %4285 = vmatmul.f32.gmra.mxu2 %v4063_v9 }
 0x4cd   : > { %v8764_v38 = vpop.f32.mrf.mxu2 }
 0x4d0   : > { %v5951_v52 = vpop.permute.xlu0 %5950  ;;  %v3802_v47 = vpop.permute.xlu1 %3801 }
 0x4d1   : > { %v5952_v62 = vunpack.i.l.bf16 %v5951_v52  ;;  %v4562_v58 = vpop.f32.mrf.mxu1  ;;  %v5953_v34 = vunpack.i.h.bf16 %v5951_v52  ;;  %v4852_v52 = vld [vmem:[%s9202_s9 + $0x10] sm:$0xff] }
 0x4d2   : > { %v4563_v48 = vadd.f32 %v8741_v49, %v4562_v58  ;;  %4967 = vmatpush.msrb.mxu3 %v4852_v52  ;;  %v4851_v58 = vld [vmem:[%s9202_s9 + $0x8] sm:$0xff] }
 0x4d3   : > { %v3933_v8 = vsel %vm3902_vm2, %v3900_v14, %v5952_v62  ;;  %v3934_v21 = vsel %vm3902_vm2, %v3901_v18, %v5953_v34  ;;  %v4850_v14 = vld [vmem:[%s9202_s9] sm:$0xff] }
 0x4d4   : > { %v4658_v16 = vmax.f32 %v4563_v48, 0.0  ;;  %4288 = vmatmul.f32.gmra.mxu2 %v4064_v39  ;;  %v3966_v13 = vsel %vm3935_vm3, %v3933_v8, %v5957_v32  ;;  %v3967_v44 = vsel %vm3935_vm3, %v3934_v21, %v5958_v33  ;;  %4968 = vmatpush.msrb.mxu3 %v4851_v58  ;;  %v9448_v21 = vld [vmem:[#allocation8_spill] sm:$0xff] }
 0x4d5   : > { %v3999_v27 = vsel %vm3968_vm4, %v3966_v13, %v3546_v5  ;;  %v4000_v45 = vsel %vm3968_vm4, %v3967_v44, %v3548_v56  ;;  %v8773_v28 = vpop.f32.mrf.mxu2 }
 0x4d6   : > { %4722 = vrot.lane.b32.xlu2 %v4658_v16, %s9447_s24  ;;  %4969 = vmatpush.msrb.mxu3 %v4850_v14 }
 0x4d8   : > { %v3674_v43 = vpop.permute.xlu0 %3673  ;;  %v3804_v63 = vpop.permute.xlu1 %3803 }
 0x4d9   : > { %v4032_v57 = vsel %vm4001_vm5, %v3999_v27, %v3674_v43  ;;  %v4565_v30 = vpop.f32.mrf.mxu1 }
 0x4da   : > { %v4566_v51 = vadd.f32 %v8741_v49, %v4565_v30  ;;  %v4065_v24 = vsel %vm4034_vm6, %v4032_v57, %v3802_v47  ;;  %v4366_v57 = vpop.f32.mrf.mxu3 }
 0x4dc   : > { %v4659_v25 = vmax.f32 %v4566_v51, 0.0  ;;  %4291 = vmatmul.f32.gmra.mxu2 %v4065_v24 }
 0x4dd   : > { %v8778_v11 = vpop.f32.mrf.mxu2 }
 0x4de   : > { %4724 = vrot.lane.b32.xlu0 %v4659_v25, %s9447_s24 }
 0x4e0   : > { %v3676_v17 = vpop.permute.xlu0 %3675 }
 0x4e1   : > { %v4033_v20 = vsel %vm4001_vm5, %v4000_v45, %v3676_v17  ;;  %v4568_v22 = vpop.f32.mrf.mxu1 }
 0x4e2   : > { %v4569_v7 = vadd.f32 %v8741_v49, %v4568_v22  ;;  %v4066_v55 = vsel %vm4034_vm6, %v4033_v20, %v3804_v63  ;;  %v4369_v56 = vpop.f32.mrf.mxu3 }
 0x4e4   : > { %v4660_v37 = vmax.f32 %v4569_v7, 0.0  ;;  %4294 = vmatmul.f32.gmra.mxu2 %v4066_v55 }
 0x4e5   : > { %v8783_v3 = vpop.f32.mrf.mxu2 }
 0x4e6   : > { %4726 = vrot.lane.b32.xlu1 %v4660_v37, %s9447_s24 }
 0x4e9   : > { %v4571_v46 = vpop.f32.mrf.mxu1 }
 0x4ea   : > { %v4572_v54 = vadd.f32 %v8741_v49, %v4571_v46  ;;  %v4372_v22 = vpop.f32.mrf.mxu3 }
 0x4ec   : > { %v4661_v2 = vmax.f32 %v4572_v54, 0.0  ;;  %5264 = vmatmul.msk.f32.vlgmr.msra.gmra.mxu2 %vm2573_vm13, %v2924_v31 }
 0x4ed   : > { %v8787_v19 = vpop.f32.mrf.mxu2 }
 0x4ee   : > { %4728 = vrot.lane.b32.xlu2 %v4661_v2, %s9447_s24 }
 0x4f1   : > { %v4574_v35 = vpop.f32.mrf.mxu1 }
 0x4f2   : > { %v4575_v23 = vadd.f32 %v8741_v49, %v4574_v35  ;;  %v8835_v54 = vpop.f32.mrf.mxu3  ;;  %v9449_v35 = vld [vmem:[#allocation10_spill] sm:$0xff] }
 0x4f4   : > { %v4662_v61 = vmax.f32 %v4575_v23, 0.0 }
 0x4f5   : > { %v8798_v62 = vpop.f32.mrf.mxu2 }
 0x4f6   : > { %4730 = vrot.lane.b32.xlu0 %v4662_v61, %s9447_s24 }
 0x4f9   : > { %v4577_v15 = vpop.f32.mrf.mxu1 }
 0x4fa   : > { %v4578_v4 = vadd.f32 %v8741_v49, %v4577_v15  ;;  %v8842_v61 = vpop.f32.mrf.mxu3 }
 0x4fc   : > { %v4663_v9 = vmax.f32 %v4578_v4, 0.0 }
 0x4fd   : > { %v8808_v32 = vpop.f32.mrf.mxu2 }
 0x4fe   : > { %4732 = vrot.lane.b32.xlu1 %v4663_v9, %s9447_s24  ;;  %v9450_v9 = vld [vmem:[#allocation7_spill] sm:$0xff] }
 0x501   : > { %v4580_v53 = vpop.f32.mrf.mxu1 }
 0x502   : > { %v4581_v36 = vadd.f32 %v8741_v49, %v4580_v53 }
 0x504   : > { %v4664_v12 = vmax.f32 %v4581_v36, 0.0  ;;  %v8849_v36 = vpop.f32.mrf.mxu3 }
 0x505   : > { %v8812_v13 = vpop.f32.mrf.mxu2 }
 0x506   : > { %4734 = vrot.lane.b32.xlu2 %v4664_v12, %s9447_s24 }
 0x509   : > { %v4583_v29 = vpop.f32.mrf.mxu1 }
 0x50a   : > { %v4584_v1 = vadd.f32 %v8741_v49, %v4583_v29 }
 0x50c   : > { %v4665_v26 = vmax.f32 %v4584_v1, 0.0  ;;  %v9451_v1 = vld [vmem:[#allocation9_spill] sm:$0xff]  ;;  %v8856_v60 = vpop.f32.mrf.mxu3 }
 0x50e   : > { %4736 = vrot.lane.b32.xlu0 %v4665_v26, %s9447_s24 }
 0x511   : > { %v4586_v6 = vpop.f32.mrf.mxu1 }
 0x512   : > { %v4587_v48 = vadd.f32 %v8741_v49, %v4586_v6  ;;  %v9452_v6 = vld [vmem:[#allocation11_spill] sm:$0xff] }
 0x514   : > { %v4666_v10 = vmax.f32 %v4587_v48, 0.0  ;;  %v8863_v48 = vpop.f32.mrf.mxu3 }
 0x516   : > { %4738 = vrot.lane.b32.xlu1 %v4666_v10, %s9447_s24  ;;  %v4248_v10 = vadd.f32 %v8539_v59, %v8750_v42 }
 0x517   : > { %v8816_v43 = vpop.f32.mrf.mxu2 }
 0x519   : > { %v4589_v8 = vpop.f32.mrf.mxu1 }
 0x51a   : > { %v4590_v39 = vadd.f32 %v8741_v49, %v4589_v8 }
 0x51c   : > { %v4667_v16 = vmax.f32 %v4590_v39, 0.0 }
 0x51e   : > { %4740 = vrot.lane.b32.xlu2 %v4667_v16, %s9447_s24 }
 0x51f   : > { %v8824_v25 = vpop.f32.mrf.mxu2 }
 0x521   : > { %v4592_v5 = vpop.f32.mrf.mxu1 }
 0x522   : > { %v4593_v47 = vadd.f32 %v8741_v49, %v4592_v5  ;;  %v9453_v5 = vld [vmem:[#allocation13_spill] sm:$0xff] }
 0x524   : > { %v4668_v34 = vmax.f32 %v4593_v47, 0.0 }
 0x526   : > { %4742 = vrot.lane.b32.xlu0 %v4668_v34, %s9447_s24  ;;  %v4251_v34 = vadd.f32 %v8539_v59, %v8764_v38 }
 0x529   : > { %v4595_v41 = vpop.f32.mrf.mxu1 }
 0x52a   : > { %v4596_v27 = vadd.f32 %v8741_v49, %v4595_v41 }
 0x52c   : > { %v4669_v18 = vmax.f32 %v4596_v27, 0.0  ;;  %v4364_v27 = vadd.f32 %v4363_v40, %v4251_v34 }
 0x52e   : > { %4744 = vrot.lane.b32.xlu1 %v4669_v18, %s9447_s24 }
 0x530   : > { %v4723_v30 = vpop.permute.xlu2 %4722  ;;  %v8828_v45 = vpop.f32.mrf.mxu2 }
 0x531   : > { %v4818_v51 = vsel %vm417_vm0, %v9448_v21, %v4723_v30  ;;  %v4598_v24 = vpop.f32.mrf.mxu1  ;;  %v8873_v30 = vpop.f32.mrf.mxu3  ;;  %v9454_v21 = vld [vmem:[#allocation12_spill] sm:$0xff] }
 0x532   : > { %5313 = vmatmul.msk.f32.vlgmr.msrb.gmra.mxu3 %vm3869_vm1, %v4818_v51  ;;  %v4599_v33 = vadd.f32 %v8741_v49, %v4598_v24  ;;  %v4427_v51 = vmax.f32 %v4364_v27, 0.0  ;;  %v4254_v24 = vadd.f32 %v8539_v59, %v8773_v28 }
 0x534   : > { %v4670_v44 = vmax.f32 %v4599_v33, 0.0  ;;  %v4367_v38 = vadd.f32 %v4366_v57, %v4254_v24  ;;  %v8894_v57 = vld [vmem:[%s9199_s6] ss:$0 sm:$0xff] }
 0x536   : > { %4746 = vrot.lane.b32.xlu2 %v4670_v44, %s9447_s24 }
 0x538   : > { %v8832_v46 = vpop.f32.mrf.mxu2 }
 0x539   : > { %v4601_v63 = vpop.f32.mrf.mxu1  ;;  %v8881_v33 = vpop.f32.mrf.mxu3 }
 0x53a   : > { %v4602_v17 = vadd.f32 %v8741_v49, %v4601_v63  ;;  %v9455_v63 = vld [vmem:[#allocation14_spill] sm:$0xff] }
 0x53c   : > { %v4671_v20 = vmax.f32 %v4602_v17, 0.0  ;;  %v4428_v17 = vmax.f32 %v4367_v38, 0.0 }
 0x53e   : > { %4748 = vrot.lane.b32.xlu0 %v4671_v20, %s9447_s24  ;;  %v4257_v20 = vadd.f32 %v8539_v59, %v8778_v11 }
 0x540   : > { %v4370_v28 = vadd.f32 %v4369_v56, %v4257_v20 }
 0x541   : > { %v4604_v7 = vpop.f32.mrf.mxu1 }
 0x542   : > { %v4605_v55 = vadd.f32 %v8741_v49, %v4604_v7  ;;  %v8889_v7 = vpop.f32.mrf.mxu3 }
 0x544   : > { %v4672_v37 = vmax.f32 %v4605_v55, 0.0 }
 0x546   : > { %4750 = vrot.lane.b32.xlu1 %v4672_v37, %s9447_s24  ;;  %v4429_v37 = vmax.f32 %v4370_v28, 0.0 }
 0x548   : > { %v4729_v12 = vpop.permute.xlu2 %4728 }
 0x549   : > { %v4821_v26 = vsel %vm417_vm0, %v9451_v1, %v4729_v12 }
 0x54f   : > { %v8837_v31 = vpop.f32.mrf.mxu2 }
 0x550   : > { %v4725_v2 = vpop.permute.xlu0 %4724 }
 0x551   : > { %v4819_v23 = vsel %vm417_vm0, %v9449_v35, %v4725_v2  ;;  %v4260_v2 = vadd.f32 %v8894_v57, %v8783_v3  ;;  %v9456_v35 = vld [vmem:[#allocation16_spill] sm:$0xff] }
 0x552   : > { %5314 = vmatmul.msk.f32.gmra.mxu3 %vm3869_vm1, %v4819_v23  ;;  %v8902_v23 = vpop.f32.mrf.mxu3 }
 0x553   : > { %v4373_v11 = vadd.f32 %v4372_v22, %v4260_v2  ;;  %v4266_v22 = vadd.f32 %v8894_v57, %v8798_v62 }
 0x557   : > { %v8844_v15 = vpop.f32.mrf.mxu2 }
 0x558   : > { %v4727_v4 = vpop.permute.xlu1 %4726 }
 0x559   : > { %v4820_v53 = vsel %vm417_vm0, %v9450_v9, %v4727_v4  ;;  %v4430_v4 = vmax.f32 %v4373_v11, 0.0  ;;  %v4263_v9 = vadd.f32 %v8894_v57, %v8787_v19  ;;  %v4379_v19 = vadd.f32 %v8842_v61, %v4266_v22 }
 0x55a   : > { %5315 = vmatmul.msk.f32.gmra.mxu3 %vm3869_vm1, %v4820_v53  ;;  %v9457_v53 = vld [vmem:[#allocation15_spill] sm:$0xff]  ;;  %v4272_v61 = vadd.f32 %v8894_v57, %v8812_v13 }
 0x55b   : > { %v4376_v3 = vadd.f32 %v8835_v54, %v4263_v9  ;;  %v4269_v54 = vadd.f32 %v8894_v57, %v8808_v32  ;;  %v8942_v13 = vld [vmem:[%s9203_s10] ss:$0 sm:$0xff] }
 0x55f   : > { %v8851_v29 = vpop.f32.mrf.mxu2 }
 0x560   : > { %v4735_v18 = vpop.permute.xlu2 %4734 }
 0x561   : > { %v4824_v42 = vsel %vm417_vm0, %v9454_v21, %v4735_v18  ;;  %v4385_v18 = vadd.f32 %v8856_v60, %v4272_v61 }
 0x562   : > { %5316 = vmatmul.msk.f32.gmra.mxu3 %vm3869_vm1, %v4821_v26  ;;  %v4431_v26 = vmax.f32 %v4376_v3, 0.0 }
 0x567   : > { %v8858_v52 = vpop.f32.mrf.mxu2 }
 0x568   : > { %v4731_v58 = vpop.permute.xlu0 %4730 }
 0x569   : > { %v4822_v14 = vsel %vm417_vm0, %v9452_v6, %v4731_v58  ;;  %v9458_v58 = vld [vmem:[#allocation17_spill] sm:$0xff] }
 0x56a   : > { %5317 = vmatmul.msk.f32.gmra.mxu3 %vm3869_vm1, %v4822_v14  ;;  %v4402_v14 = vpop.f32.mrf.mxu3 }
 0x56f   : > { %v4360_v8 = vpop.f32.mrf.mxu2 }
 0x570   : > { %v4361_v39 = vadd.f32 %v4360_v8, %v4248_v10  ;;  %v4733_v16 = vpop.permute.xlu1 %4732  ;;  %v4432_v8 = vmax.f32 %v4379_v19, 0.0 }
 0x571   : > { %v4823_v47 = vsel %vm417_vm0, %v9453_v5, %v4733_v16  ;;  %v4382_v5 = vadd.f32 %v8849_v36, %v4269_v54  ;;  %v4275_v36 = vadd.f32 %v8894_v57, %v8816_v43 }
 0x572   : > { %v4426_v41 = vmax.f32 %v4361_v39, 0.0  ;;  %5318 = vmatmul.msk.f32.gmra.mxu3 %vm3869_vm1, %v4823_v47  ;;  %v9459_v39 = vld [vmem:[#allocation19_spill] sm:$0xff]  ;;  %v4405_v62 = vpop.f32.mrf.mxu3 }
 0x573   : > { %v4433_v34 = vmax.f32 %v4382_v5, 0.0  ;;  %v4388_v38 = vadd.f32 %v8863_v48, %v4275_v36 }
 0x574   : > { %5296 = vmatmul.msk.f32.gmra.mxu1 %vm2573_vm13, %v4426_v41  ;;  %v9460_v41 = vld [vmem:[#allocation18_spill] sm:$0xff] }
 0x578   : > { %v4741_v56 = vpop.permute.xlu2 %4740 }
 0x579   : > { %v4827_v12 = vsel %vm417_vm0, %v9457_v53, %v4741_v56  ;;  %v4290_v56 = vadd.f32 %v8894_v57, %v8844_v15 }
 0x57a   : > { %5319 = vmatmul.msk.f32.gmra.mxu3 %vm3869_vm1, %v4824_v42  ;;  %v4408_v32 = vpop.f32.mrf.mxu3  ;;  %v4434_v42 = vmax.f32 %v4385_v18, 0.0 }
 0x57c   : > { %5297 = vmatmul.msk.f32.gmra.mxu1 %vm2573_vm13, %v4427_v51  ;;  %v9461_v51 = vld [vmem:[#allocation20_spill] sm:$0xff] }
 0x580   : > { %v4737_v44 = vpop.permute.xlu0 %4736 }
 0x581   : > { %v4825_v40 = vsel %vm417_vm0, %v9455_v63, %v4737_v44  ;;  %v4435_v63 = vmax.f32 %v4388_v38, 0.0 }
 0x582   : > { %5320 = vmatmul.msk.f32.gmra.mxu3 %vm3869_vm1, %v4825_v40  ;;  %v4278_v40 = vadd.f32 %v8894_v57, %v8824_v25  ;;  %v4284_v25 = vadd.f32 %v8894_v57, %v8832_v46 }
 0x584   : > { %5298 = vmatmul.msk.f32.gmra.mxu1 %vm2573_vm13, %v4428_v17  ;;  %v9462_v17 = vld [vmem:[#allocation22_spill] sm:$0xff]  ;;  %v4391_v48 = vadd.f32 %v8873_v30, %v4278_v40  ;;  %v4287_v30 = vadd.f32 %v8894_v57, %v8837_v31 }
 0x586   : > { %v4436_v28 = vmax.f32 %v4391_v48, 0.0  ;;  %v4400_v11 = vadd.f32 %v8902_v23, %v4287_v30  ;;  %v4293_v23 = vadd.f32 %v8894_v57, %v8851_v29 }
 0x588   : > { %v4739_v55 = vpop.permute.xlu1 %4738  ;;  %v4439_v46 = vmax.f32 %v4400_v11, 0.0 }
 0x589   : > { %v4826_v59 = vsel %vm417_vm0, %v9456_v35, %v4739_v55  ;;  %v4281_v55 = vadd.f32 %v8894_v57, %v8828_v45  ;;  %v4397_v35 = vadd.f32 %v8889_v7, %v4284_v25 }
 0x58a   : > { %5321 = vmatmul.msk.f32.gmra.mxu3 %vm3869_vm1, %v4826_v59 }
 0x58b   : > { %v4438_v59 = vmax.f32 %v4397_v35, 0.0 }
 0x58c   : > { %5299 = vmatmul.msk.f32.gmra.mxu1 %vm2573_vm13, %v4429_v37  ;;  %v4394_v37 = vadd.f32 %v8881_v33, %v4281_v55 }
 0x58e   : > { %v4437_v2 = vmax.f32 %v4394_v37, 0.0 }
 0x590   : > { %v4747_v47 = vpop.permute.xlu2 %4746 }
 0x591   : > { %v4830_v27 = vsel %vm417_vm0, %v9460_v41, %v4747_v47 }
 0x592   : > { %5322 = vmatmul.msk.f32.gmra.mxu3 %vm3869_vm1, %v4827_v12  ;;  %v4406_v12 = vadd.f32 %v4405_v62, %v4293_v23 }
 0x594   : > { %5300 = vmatmul.msk.f32.gmra.mxu1 %vm2573_vm13, %v4430_v4  ;;  %v4403_v4 = vadd.f32 %v4402_v14, %v4290_v56  ;;  %v4441_v15 = vmax.f32 %v4406_v12, 0.0 }
 0x596   : > { %v4440_v9 = vmax.f32 %v4403_v4, 0.0 }
 0x598   : > { %v4743_v1 = vpop.permute.xlu0 %4742 }
 0x599   : > { %v4828_v6 = vsel %vm417_vm0, %v9458_v58, %v4743_v1  ;;  %v4296_v1 = vadd.f32 %v8894_v57, %v8858_v52 }
 0x59a   : > { %5323 = vmatmul.msk.f32.gmra.mxu3 %vm3869_vm1, %v4828_v6 }
 0x59b   : > { %v4409_v22 = vadd.f32 %v4408_v32, %v4296_v1 }
 0x59c   : > { %5301 = vmatmul.msk.f32.gmra.mxu1 %vm2573_vm13, %v4431_v26 }
 0x59d   : > { %v4442_v6 = vmax.f32 %v4409_v22, 0.0  ;;  %v9463_v22 = vld [vmem:[#allocation21_spill] sm:$0xff] }
 0x5a0   : > { %v4745_v10 = vpop.permute.xlu1 %4744 }
 0x5a1   : > { %v4829_v16 = vsel %vm417_vm0, %v9459_v39, %v4745_v10 }
 0x5a2   : > { %5324 = vmatmul.msk.f32.gmra.mxu3 %vm3869_vm1, %v4829_v16 }
 0x5a4   : > { %5302 = vmatmul.msk.f32.gmra.mxu1 %vm2573_vm13, %v4432_v8 }
 0x5aa   : > { %5325 = vmatmul.msk.f32.gmra.mxu3 %vm3869_vm1, %v4830_v27 }
 0x5ac   : > { %5303 = vmatmul.msk.f32.gmra.mxu1 %vm2573_vm13, %v4433_v34 }
 0x5b0   : > { %v4749_v21 = vpop.permute.xlu0 %4748 }
 0x5b1   : > { %v4831_v24 = vsel %vm417_vm0, %v9461_v51, %v4749_v21 }
 0x5b2   : > { %5326 = vmatmul.msk.f32.gmra.mxu3 %vm3869_vm1, %v4831_v24 }
 0x5b4   : > { %5304 = vmatmul.msk.f32.gmra.mxu1 %vm2573_vm13, %v4434_v42 }
 0x5b5   : > { %v4971_v60 = vpop.f32.mrf.mxu3 }
 0x5b6   : > { %v4972_v44 = vadd.f32 %v8942_v13, %v4971_v60 }
 0x5b8   : > { %5067 = vst.msk [vmem:[%s8948_s0] sm:$0xff] %vm3869_vm1, %v4972_v44  ;;  %v4751_v43 = vpop.permute.xlu1 %4750 }
 0x5b9   : > { %v4832_v20 = vsel %vm417_vm0, %v9462_v17, %v4751_v43 }
 0x5ba   : > { %5327 = vmatmul.msk.f32.gmra.mxu3 %vm3869_vm1, %v4832_v20 }
 0x5bc   : > { %5305 = vmatmul.msk.f32.gmra.mxu1 %vm2573_vm13, %v4435_v63 }
 0x5c4   : > { %5306 = vmatmul.msk.f32.gmra.mxu1 %vm2573_vm13, %v4436_v28 }
 0x5cc   : > { %5307 = vmatmul.msk.f32.gmra.mxu1 %vm2573_vm13, %v4437_v2 }
 0x5d4   : > { %5308 = vmatmul.msk.f32.gmra.mxu1 %vm2573_vm13, %v4438_v59 }
 0x5d5   : > { %v4974_v45 = vpop.f32.mrf.mxu3 }
 0x5d6   : > { %v4975_v33 = vadd.f32 %v8942_v13, %v4974_v45 }
 0x5d8   : > { %5068 = vst.msk [vmem:[%s8948_s0 + $0x8] sm:$0xff] %vm3869_vm1, %v4975_v33 }
 0x5dc   : > { %5309 = vmatmul.msk.f32.gmra.mxu1 %vm2573_vm13, %v4439_v46 }
 0x5dd   : > { %v4977_v7 = vpop.f32.mrf.mxu3 }
 0x5de   : > { %v4978_v31 = vadd.f32 %v8942_v13, %v4977_v7 }
 0x5e0   : > { %5069 = vst.msk [vmem:[%s8948_s0 + $0x10] sm:$0xff] %vm3869_vm1, %v4978_v31 }
 0x5e4   : > { %5310 = vmatmul.msk.f32.gmra.mxu1 %vm2573_vm13, %v4440_v9 }
 0x5e5   : > { %v4980_v53 = vpop.f32.mrf.mxu3 }
 0x5e6   : > { %v4981_v3 = vadd.f32 %v8942_v13, %v4980_v53 }
 0x5e8   : > { %5070 = vst.msk [vmem:[%s8948_s0 + $0x18] sm:$0xff] %vm3869_vm1, %v4981_v3 }
 0x5ec   : > { %5311 = vmatmul.msk.f32.gmra.mxu1 %vm2573_vm13, %v4441_v15 }
 0x5ed   : > { %v4983_v26 = vpop.f32.mrf.mxu3 }
 0x5ee   : > { %v4984_v58 = vadd.f32 %v8942_v13, %v4983_v26 }
 0x5f0   : > { %5071 = vst.msk [vmem:[%s8948_s0 + $0x20] sm:$0xff] %vm3869_vm1, %v4984_v58 }
 0x5f1   : > { %v4607_v29 = vpop.f32.mrf.mxu1 }
 0x5f2   : > { %v4608_v14 = vadd.f32 %v8741_v49, %v4607_v29 }
 0x5f4   : > { %v4673_v19 = vmax.f32 %v4608_v14, 0.0  ;;  %5312 = vmatmul.msk.f32.gmra.mxu1 %vm2573_vm13, %v4442_v6 }
 0x5f5   : > { %v4986_v10 = vpop.f32.mrf.mxu3 }
 0x5f6   : > { %4752 = vrot.lane.b32.xlu2 %v4673_v19, %s9447_s24  ;;  %v4987_v52 = vadd.f32 %v8942_v13, %v4986_v10 }
 0x5f8   : > { %5072 = vst.msk [vmem:[%s8948_s0 + $0x28] sm:$0xff] %vm3869_vm1, %v4987_v52 }
 0x5f9   : > { %v4610_v57 = vpop.f32.mrf.mxu1 }
 0x5fa   : > { %v4611_v8 = vadd.f32 %v8741_v49, %v4610_v57 }
 0x5fc   : > { %v4674_v54 = vmax.f32 %v4611_v8, 0.0 }
 0x5fd   : > { %v4989_v39 = vpop.f32.mrf.mxu3 }
 0x5fe   : > { %4754 = vrot.lane.b32.xlu0 %v4674_v54, %s9447_s24  ;;  %v4990_v16 = vadd.f32 %v8942_v13, %v4989_v39 }
 0x600   : > { %5073 = vst.msk [vmem:[%s8948_s0 + $0x30] sm:$0xff] %vm3869_vm1, %v4990_v16 }
 0x601   : > { %v4613_v62 = vpop.f32.mrf.mxu1 }
 0x602   : > { %v4614_v5 = vadd.f32 %v8741_v49, %v4613_v62 }
 0x604   : > { %v4675_v47 = vmax.f32 %v4614_v5, 0.0 }
 0x605   : > { %v4992_v34 = vpop.f32.mrf.mxu3 }
 0x606   : > { %4756 = vrot.lane.b32.xlu1 %v4675_v47, %s9447_s24  ;;  %v4993_v61 = vadd.f32 %v8942_v13, %v4992_v34  ;;  %v9464_v47 = vld [vmem:[#allocation23_spill] sm:$0xff] }
 0x608   : > { %5074 = vst.msk [vmem:[%s8948_s0 + $0x38] sm:$0xff] %vm3869_vm1, %v4993_v61 }
 0x609   : > { %v4616_v41 = vpop.f32.mrf.mxu1 }
 0x60a   : > { %v4617_v27 = vadd.f32 %v8741_v49, %v4616_v41 }
 0x60c   : > { %v4676_v32 = vmax.f32 %v4617_v27, 0.0 }
 0x60d   : > { %v4995_v18 = vpop.f32.mrf.mxu3 }
 0x60e   : > { %4758 = vrot.lane.b32.xlu2 %v4676_v32, %s9447_s24  ;;  %v4996_v21 = vadd.f32 %v8942_v13, %v4995_v18  ;;  %v9465_v18 = vld [vmem:[#allocation25_spill] sm:$0xff] }
 0x610   : > { %5075 = vst.msk [vmem:[%s8948_s0 + $0x40] sm:$0xff] %vm3869_vm1, %v4996_v21 }
 0x611   : > { %v4619_v42 = vpop.f32.mrf.mxu1 }
 0x612   : > { %v4620_v36 = vadd.f32 %v8741_v49, %v4619_v42 }
 0x614   : > { %v4677_v51 = vmax.f32 %v4620_v36, 0.0  ;;  %v9466_v36 = vld [vmem:[#allocation24_spill] sm:$0xff] }
 0x615   : > { %v4998_v24 = vpop.f32.mrf.mxu3 }
 0x616   : > { %4760 = vrot.lane.b32.xlu0 %v4677_v51, %s9447_s24  ;;  %v4999_v60 = vadd.f32 %v8942_v13, %v4998_v24 }
 0x618   : > { %5076 = vst.msk [vmem:[%s8948_s0 + $0x48] sm:$0xff] %vm3869_vm1, %v4999_v60  ;;  %v9467_v60 = vld [vmem:[#allocation26_spill] sm:$0xff] }
 0x619   : > { %v4622_v38 = vpop.f32.mrf.mxu1 }
 0x61a   : > { %v4623_v44 = vadd.f32 %v8741_v49, %v4622_v38 }
 0x61c   : > { %v4678_v43 = vmax.f32 %v4623_v44, 0.0  ;;  %v9468_v44 = vld [vmem:[#allocation28_spill] sm:$0xff] }
 0x61d   : > { %v5001_v63 = vpop.f32.mrf.mxu3 }
 0x61e   : > { %4762 = vrot.lane.b32.xlu1 %v4678_v43, %s9447_s24  ;;  %v5002_v40 = vadd.f32 %v8942_v13, %v5001_v63 }
 0x620   : > { %5077 = vst.msk [vmem:[%s8948_s0 + $0x50] sm:$0xff] %vm3869_vm1, %v5002_v40  ;;  %v9469_v40 = vld [vmem:[#allocation27_spill] sm:$0xff] }
 0x621   : > { %v4625_v17 = vpop.f32.mrf.mxu1 }
 0x622   : > { %v4626_v20 = vadd.f32 %v8741_v49, %v4625_v17 }
 0x624   : > { %v4679_v48 = vmax.f32 %v4626_v20, 0.0 }
 0x625   : > { %v5004_v28 = vpop.f32.mrf.mxu3 }
 0x626   : > { %4764 = vrot.lane.b32.xlu2 %v4679_v48, %s9447_s24  ;;  %v5005_v55 = vadd.f32 %v8942_v13, %v5004_v28  ;;  %v9470_v48 = vld [vmem:[#allocation29_spill] sm:$0xff] }
 0x628   : > { %5078 = vst.msk [vmem:[%s8948_s0 + $0x58] sm:$0xff] %vm3869_vm1, %v5005_v55 }
 0x629   : > { %v4628_v37 = vpop.f32.mrf.mxu1 }
 0x62a   : > { %v4629_v2 = vadd.f32 %v8741_v49, %v4628_v37  ;;  %v9471_v37 = vld [vmem:[#allocation31_spill] sm:$0xff] }
 0x62c   : > { %v4680_v25 = vmax.f32 %v4629_v2, 0.0 }
 0x62d   : > { %v5007_v35 = vpop.f32.mrf.mxu3 }
 0x62e   : > { %4766 = vrot.lane.b32.xlu0 %v4680_v25, %s9447_s24  ;;  %v5008_v59 = vadd.f32 %v8942_v13, %v5007_v35  ;;  %v9472_v35 = vld [vmem:[#allocation30_spill] sm:$0xff] }
 0x630   : > { %5079 = vst.msk [vmem:[%s8948_s0 + $0x60] sm:$0xff] %vm3869_vm1, %v5008_v59 }
 0x631   : > { %v4631_v30 = vpop.f32.mrf.mxu1 }
 0x632   : > { %v4632_v45 = vadd.f32 %v8741_v49, %v4631_v30 }
 0x634   : > { %v4681_v11 = vmax.f32 %v4632_v45, 0.0  ;;  %v9473_v45 = vld [vmem:[#allocation32_spill] sm:$0xff] }
 0x635   : > { %v5010_v33 = vpop.f32.mrf.mxu3 }
 0x636   : > { %4768 = vrot.lane.b32.xlu1 %v4681_v11, %s9447_s24  ;;  %v5011_v46 = vadd.f32 %v8942_v13, %v5010_v33 }
 0x638   : > { %5080 = vst.msk [vmem:[%s8948_s0 + $0x68] sm:$0xff] %vm3869_vm1, %v5011_v46  ;;  %v9474_v46 = vld [vmem:[#allocation34_spill] sm:$0xff] }
 0x639   : > { %v4634_v56 = vpop.f32.mrf.mxu1 }
 0x63a   : > { %v4635_v7 = vadd.f32 %v8741_v49, %v4634_v56 }
 0x63c   : > { %v4682_v4 = vmax.f32 %v4635_v7, 0.0 }
 0x63d   : > { %v5013_v31 = vpop.f32.mrf.mxu3 }
 0x63e   : > { %4770 = vrot.lane.b32.xlu2 %v4682_v4, %s9447_s24  ;;  %v5014_v9 = vadd.f32 %v8942_v13, %v5013_v31  ;;  %v9475_v4 = vld [vmem:[#allocation33_spill] sm:$0xff] }
 0x640   : > { %5081 = vst.msk [vmem:[%s8948_s0 + $0x70] sm:$0xff] %vm3869_vm1, %v5014_v9 }
 0x641   : > { %v4637_v23 = vpop.f32.mrf.mxu1 }
 0x642   : > { %v4638_v53 = vadd.f32 %v8741_v49, %v4637_v23  ;;  %v9476_v23 = vld [vmem:[#allocation35_spill] sm:$0xff] }
 0x644   : > { %v4683_v12 = vmax.f32 %v4638_v53, 0.0 }
 0x646   : > { %4772 = vrot.lane.b32.xlu0 %v4683_v12, %s9447_s24 }
 0x649   : > { %v4640_v3 = vpop.f32.mrf.mxu1 }
 0x64a   : > { %v4641_v15 = vadd.f32 %v8741_v49, %v4640_v3 }
 0x64c   : > { %v4684_v1 = vmax.f32 %v4641_v15, 0.0 }
 0x64e   : > { %4774 = vrot.lane.b32.xlu1 %v4684_v1, %s9447_s24  ;;  %v9477_v1 = vld [vmem:[#allocation36_spill] sm:$0xff] }
 0x650   : > { %v4753_v26 = vpop.permute.xlu2 %4752 }
 0x651   : > { %v4833_v58 = vsel %vm417_vm0, %v9463_v22, %v4753_v26  ;;  %v4643_v29 = vpop.f32.mrf.mxu1 }
 0x652   : > { %v4644_v6 = vadd.f32 %v8741_v49, %v4643_v29  ;;  %5328 = vmatmul.msk.f32.gmra.mxu3 %vm3869_vm1, %v4833_v58 }
 0x654   : > { %v4685_v14 = vmax.f32 %v4644_v6, 0.0 }
 0x656   : > { %4776 = vrot.lane.b32.xlu2 %v4685_v14, %s9447_s24 }
 0x659   : > { %v4646_v19 = vpop.f32.mrf.mxu1 }
 0x65a   : > { %v4647_v10 = vadd.f32 %v8741_v49, %v4646_v19 }
 0x65c   : > { %v4686_v52 = vmax.f32 %v4647_v10, 0.0 }
 0x65e   : > { %4778 = vrot.lane.b32.xlu0 %v4686_v52, %s9447_s24 }
 0x661   : > { %v4649_v57 = vpop.f32.mrf.mxu1 }
 0x662   : > { %v4650_v8 = vadd.f32 %v8741_v49, %v4649_v57 }
 0x664   : > { %v4687_v54 = vmax.f32 %v4650_v8, 0.0 }
 0x666   : > { %4780 = vrot.lane.b32.xlu1 %v4687_v54, %s9447_s24 }
 0x668   : > { %v4759_v42 = vpop.permute.xlu2 %4758 }
 0x669   : > { %v4652_v39 = vpop.f32.mrf.mxu1  ;;  %v4836_v51 = vsel %vm417_vm0, %v9466_v36, %v4759_v42 }
 0x66a   : > { %v4653_v16 = vadd.f32 %v8741_v49, %v4652_v39 }
 0x66c   : > { %v4688_v62 = vmax.f32 %v4653_v16, 0.0 }
 0x66e   : > { %4782 = vrot.lane.b32.xlu2 %v4688_v62, %s9447_s24 }
 0x670   : > { %v4755_v5 = vpop.permute.xlu0 %4754 }
 0x671   : > { %v4834_v34 = vsel %vm417_vm0, %v9464_v47, %v4755_v5  ;;  %v4655_v61 = vpop.f32.mrf.mxu1 }
 0x672   : > { %v4656_v41 = vadd.f32 %v8741_v49, %v4655_v61  ;;  %5329 = vmatmul.msk.f32.gmra.mxu3 %vm3869_vm1, %v4834_v34 }
 0x674   : > { %v4689_v27 = vmax.f32 %v4656_v41, 0.0 }
 0x676   : > { %4784 = vrot.lane.b32.xlu0 %v4689_v27, %s9447_s24  ;;  %s5351_s24 = sshll.u32 %s6172_s21, 8  ;;  %s5100_s21 = scalar_lea.sflag [#allocation5], %s377_s12 }
 0x677   : > { %s5111_s15 = scalar_lea.hbm %s9204_s11, %s5351_s24 }
 0x678   : > { %v4757_v32 = vpop.permute.xlu1 %4756  ;;  %s5114_s13 = sshll.u32 %s5111_s15, 4  ;;  %s5115_s13 = int_to_ptr.hbm [resolvable:$true] %s5114_s13 }
 0x679   : > { %v4835_v21 = vsel %vm417_vm0, %v9465_v18, %v4757_v32  ;;  %s6023_s14 = sshra.s32 %s5115_s13, 4  ;;  %s6024_s14 = int_to_ptr.hbm [resolvable:$true] %s6023_s14 }
 0x67a   : > { %5330 = vmatmul.msk.f32.gmra.mxu3 %vm3869_vm1, %v4835_v21  ;;  %s6025_s29 = scalar_lea.hbm %s6024_s14, 256  ;;  %p6030_p0 = scmp.lt.s32.totalorder %s6024_s14, %s9204_s11 }
 0x67b   : > { %p6026_p11 = scmp.ne.s32.totalorder %s6024_s14, %s6025_s29  ;;  %p6031_p1 = scmp.lt.s32.totalorder %s6029_s25, %s6025_s29 }
 0x67d   : > { %p6027_p12 = pnand %p6026_p11, %p6189_p5  ;;  %p6032_p2 = por %p6031_p1, %p6030_p0 }
 0x67f   : > { %p6028_p13 = pneg %p6027_p12 }
 0x680   : > { %v4765_v63 = vpop.permute.xlu2 %4764 }
 0x681   : > { %v4839_v17 = vsel %vm417_vm0, %v9469_v40, %v4765_v63  ;;  %p6033_p3 = pnand %p6032_p2, %p6028_p13 }
 0x682   : > { %5331 = vmatmul.msk.f32.gmra.mxu3 %vm3869_vm1, %v4836_v51 }
 0x688   : > { %v4761_v24 = vpop.permute.xlu0 %4760 }
 0x689   : > { %v4837_v49 = vsel %vm417_vm0, %v9467_v60, %v4761_v24 }
 0x68a   : > { %5332 = vmatmul.msk.f32.gmra.mxu3 %vm3869_vm1, %v4837_v49 }
 0x690   : > { %v4763_v38 = vpop.permute.xlu1 %4762 }
 0x691   : > { %v4838_v43 = vsel %vm417_vm0, %v9468_v44, %v4763_v38 }
 0x692   : > { %5333 = vmatmul.msk.f32.gmra.mxu3 %vm3869_vm1, %v4838_v43 }
 0x698   : > { %v4771_v25 = vpop.permute.xlu2 %4770 }
 0x699   : > { %v4842_v59 = vsel %vm417_vm0, %v9472_v35, %v4771_v25 }
 0x69a   : > { %5334 = vmatmul.msk.f32.gmra.mxu3 %vm3869_vm1, %v4839_v17 }
 0x6a0   : > { %v4767_v20 = vpop.permute.xlu0 %4766 }
 0x6a1   : > { %v4840_v28 = vsel %vm417_vm0, %v9470_v48, %v4767_v20 }
 0x6a2   : > { %5335 = vmatmul.msk.f32.gmra.mxu3 %vm3869_vm1, %v4840_v28 }
 0x6a8   : > { %v4769_v55 = vpop.permute.xlu1 %4768 }
 0x6a9   : > { %v4841_v2 = vsel %vm417_vm0, %v9471_v37, %v4769_v55 }
 0x6aa   : > { %5336 = vmatmul.msk.f32.gmra.mxu3 %vm3869_vm1, %v4841_v2 }
 0x6b0   : > { %v4777_v7 = vpop.permute.xlu2 %4776 }
 0x6b1   : > { %v4845_v31 = vsel %vm417_vm0, %v9475_v4, %v4777_v7 }
 0x6b2   : > { %5337 = vmatmul.msk.f32.gmra.mxu3 %vm3869_vm1, %v4842_v59 }
 0x6b8   : > { %v4773_v30 = vpop.permute.xlu0 %4772 }
 0x6b9   : > { %v4843_v11 = vsel %vm417_vm0, %v9473_v45, %v4773_v30 }
 0x6ba   : > { %5338 = vmatmul.msk.f32.gmra.mxu3 %vm3869_vm1, %v4843_v11 }
 0x6c0   : > { %v4775_v33 = vpop.permute.xlu1 %4774 }
 0x6c1   : > { %v4844_v56 = vsel %vm417_vm0, %v9474_v46, %v4775_v33 }
 0x6c2   : > { %5339 = vmatmul.msk.f32.gmra.mxu3 %vm3869_vm1, %v4844_v56 }
 0x6c8   : > { %v4783_v22 = vpop.permute.xlu2 %4782 }
 0x6c9   : > { %v4848_v58 = vsel %vm417_vm0, %v7292_v50, %v4783_v22 }
 0x6ca   : > { %5340 = vmatmul.msk.f32.gmra.mxu3 %vm3869_vm1, %v4845_v31 }
 0x6d0   : > { %v4779_v9 = vpop.permute.xlu0 %4778 }
 0x6d1   : > { %v4846_v53 = vsel %vm417_vm0, %v9476_v23, %v4779_v9 }
 0x6d2   : > { %5341 = vmatmul.msk.f32.gmra.mxu3 %vm3869_vm1, %v4846_v53 }
 0x6d5   : > { %v5016_v12 = vpop.f32.mrf.mxu3 }
 0x6d6   : > { %v5017_v3 = vadd.f32 %v8942_v13, %v5016_v12 }
 0x6d8   : > { %5082 = vst.msk [vmem:[%s8948_s0 + $0x78] sm:$0xff] %vm3869_vm1, %v5017_v3  ;;  %v4781_v15 = vpop.permute.xlu1 %4780 }
 0x6d9   : > { %v4847_v26 = vsel %vm417_vm0, %v9477_v1, %v4781_v15 }
 0x6da   : > { %5342 = vmatmul.msk.f32.gmra.mxu3 %vm3869_vm1, %v4847_v26 }
 0x6e2   : > { %5343 = vmatmul.msk.f32.gmra.mxu3 %vm3869_vm1, %v4848_v58 }
 0x6e8   : > { %v4785_v29 = vpop.permute.xlu0 %4784 }
 0x6e9   : > { %v4849_v6 = vsel %vm417_vm0, %v7310_v0, %v4785_v29 }
 0x6ea   : > { %5344 = vmatmul.msk.f32.gmra.mxu3 %vm3869_vm1, %v4849_v6 }
 0x6f5   : > { %v5019_v14 = vpop.f32.mrf.mxu3 }
 0x6f6   : > { %v5020_v19 = vadd.f32 %v8942_v13, %v5019_v14 }
 0x6f8   : > { %5083 = vst.msk [vmem:[%s8948_s0 + $0x80] sm:$0xff] %vm3869_vm1, %v5020_v19 }
 0x6fd   : > { %v5022_v10 = vpop.f32.mrf.mxu3 }
 0x6fe   : > { %v5023_v52 = vadd.f32 %v8942_v13, %v5022_v10 }
 0x700   : > { %5084 = vst.msk [vmem:[%s8948_s0 + $0x88] sm:$0xff] %vm3869_vm1, %v5023_v52 }
 0x705   : > { %v5025_v50 = vpop.f32.mrf.mxu3 }
 0x706   : > { %v5026_v57 = vadd.f32 %v8942_v13, %v5025_v50 }
 0x708   : > { %5085 = vst.msk [vmem:[%s8948_s0 + $0x90] sm:$0xff] %vm3869_vm1, %v5026_v57 }
 0x70d   : > { %v5028_v0 = vpop.f32.mrf.mxu3 }
 0x70e   : > { %v5029_v8 = vadd.f32 %v8942_v13, %v5028_v0 }
 0x710   : > { %5086 = vst.msk [vmem:[%s8948_s0 + $0x98] sm:$0xff] %vm3869_vm1, %v5029_v8 }
 0x715   : > { %v5031_v54 = vpop.f32.mrf.mxu3 }
 0x716   : > { %v5032_v39 = vadd.f32 %v8942_v13, %v5031_v54 }
 0x718   : > { %5087 = vst.msk [vmem:[%s8948_s0 + $0xa0] sm:$0xff] %vm3869_vm1, %v5032_v39 }
 0x71d   : > { %v5034_v16 = vpop.f32.mrf.mxu3 }
 0x71e   : > { %v5035_v62 = vadd.f32 %v8942_v13, %v5034_v16 }
 0x720   : > { %5088 = vst.msk [vmem:[%s8948_s0 + $0xa8] sm:$0xff] %vm3869_vm1, %v5035_v62 }
 0x725   : > { %v5037_v5 = vpop.f32.mrf.mxu3 }
 0x726   : > { %v5038_v47 = vadd.f32 %v8942_v13, %v5037_v5 }
 0x728   : > { %5089 = vst.msk [vmem:[%s8948_s0 + $0xb0] sm:$0xff] %vm3869_vm1, %v5038_v47 }
 0x72d   : > { %v5040_v34 = vpop.f32.mrf.mxu3 }
 0x72e   : > { %v5041_v61 = vadd.f32 %v8942_v13, %v5040_v34 }
 0x730   : > { %5090 = vst.msk [vmem:[%s8948_s0 + $0xb8] sm:$0xff] %vm3869_vm1, %v5041_v61 }
 0x735   : > { %v5043_v41 = vpop.f32.mrf.mxu3 }
 0x736   : > { %v5044_v27 = vadd.f32 %v8942_v13, %v5043_v41 }
 0x738   : > { %5091 = vst.msk [vmem:[%s8948_s0 + $0xc0] sm:$0xff] %vm3869_vm1, %v5044_v27 }
 0x73d   : > { %v5046_v32 = vpop.f32.mrf.mxu3 }
 0x73e   : > { %v5047_v18 = vadd.f32 %v8942_v13, %v5046_v32 }
 0x740   : > { %5092 = vst.msk [vmem:[%s8948_s0 + $0xc8] sm:$0xff] %vm3869_vm1, %v5047_v18 }
 0x745   : > { %v5049_v21 = vpop.f32.mrf.mxu3 }
 0x746   : > { %v5050_v42 = vadd.f32 %v8942_v13, %v5049_v21 }
 0x748   : > { %5093 = vst.msk [vmem:[%s8948_s0 + $0xd0] sm:$0xff] %vm3869_vm1, %v5050_v42 }
 0x74d   : > { %v5052_v36 = vpop.f32.mrf.mxu3 }
 0x74e   : > { %v5053_v51 = vadd.f32 %v8942_v13, %v5052_v36 }
 0x750   : > { %5094 = vst.msk [vmem:[%s8948_s0 + $0xd8] sm:$0xff] %vm3869_vm1, %v5053_v51 }
 0x755   : > { %v5055_v24 = vpop.f32.mrf.mxu3 }
 0x756   : > { %v5056_v60 = vadd.f32 %v8942_v13, %v5055_v24 }
 0x758   : > { %5095 = vst.msk [vmem:[%s8948_s0 + $0xe0] sm:$0xff] %vm3869_vm1, %v5056_v60 }
 0x75d   : > { %v5058_v49 = vpop.f32.mrf.mxu3 }
 0x75e   : > { %v5059_v38 = vadd.f32 %v8942_v13, %v5058_v49 }
 0x760   : > { %5096 = vst.msk [vmem:[%s8948_s0 + $0xe8] sm:$0xff] %vm3869_vm1, %v5059_v38 }
 0x765   : > { %v5061_v44 = vpop.f32.mrf.mxu3 }
 0x766   : > { %v5062_v43 = vadd.f32 %v8942_v13, %v5061_v44 }
 0x768   : > { %5097 = vst.msk [vmem:[%s8948_s0 + $0xf0] sm:$0xff] %vm3869_vm1, %v5062_v43 }
 0x76d   : > { %v5064_v63 = vpop.f32.mrf.mxu3 }
 0x76e   : > { %v5065_v40 = vadd.f32 %v8942_v13, %v5064_v63 }
 0x770   : > { %5098 = vst.msk [vmem:[%s8948_s0 + $0xf8] sm:$0xff] %vm3869_vm1, %v5065_v40 }
 0x771   : > { %6036 = shalt.err (!%p6033_p3)
}
 0x772   : > { %s6089_s12 = smov 128   ;;  %s6090_s0 = smov 8  }
 0x773   : > { %5357 = dma.vmem_to_hbm [thread:$0]  (%p6189_p5), %s5113_s22, 4096, %s5115_s13, %s5100_s21, %s6089_s12, %s6089_s12, %s6090_s0  }
 0x774 PF: > { %p5363_p4 = scmp.ge.s32.totalorder %s6071_s20, 2  ;;  %s5129_s16 = sand.u32 1, %s6059_s17  }
 0x775   : > { %s5130_s24 = scalar_lea.sflag [#allocation5], %s5129_s16 }
 0x776   : > { %p5360_p7 = pnand %p5363_p4, %p6193_p6 }
 0x778   : > { %p5361_p8 = pneg %p5360_p7 }
 0x77a   : > { %6054 = dma.done.wait (%p5361_p8), %s5130_s24, 4096  }
 0x77b   : > { %6056 = vsyncadd (%p5361_p8), %s5130_s24, 4294963200  ;;  %p21_p9 = scmp.ge.s32.totalorder %s6176_s23, 4   ;;  %s9478_s17 = smov %s6063_s18 }
 0x77c   : > { %s9479_s18 = smov %s6067_s19  ;;  %s9480_s19 = smov %s6187_s26 }
 0x77d   : > { %s9481_s20 = smov %s6176_s23  ;;  %23 = sbr.rel (!%p21_p9) target bundleno = 5 (0x5), region = 105 }
 0x782   :  { %5136 = vsyncpa [#allocation5], 1 }
 0x783   :  { %5138 = vsyncpa [#allocation5 + $0x1], 1 }

</bundles_post_ra>
